<compile_context>
chip_gen: v7x
topology: tpu7x:2x2x1
jax: 0.10.0
libtpu: 0.0.40
codegen_flags: <defaults>
</compile_context>

<pallas_src>
import functools

import jax
import jax.numpy as jnp
from jax import lax
from jax.experimental import pallas as pl
from jax.experimental.pallas import tpu as pltpu


def _round_up(x, m):
    return (x + m - 1) // m * m


def _vmem_capacity_bytes():
    """Per-TensorCore VMEM (v5e/v6e: 128 MiB, v7x: 64 MiB); conservative fallback."""
    try:
        info = pltpu.get_tpu_info()
        for name in ("vmem_capacity_bytes", "vmem_capacity", "vmem_bytes"):
            v = getattr(info, name, None)
            if v:
                return int(v)
    except Exception:
        pass
    return 64 * 1024 * 1024          # v7x per-core VMEM (smallest generation)


# --------------------------------------------------------------------------- #
# Kernel 1: tiled  Y = act(X @ W + b)   (used for fc_out)
# --------------------------------------------------------------------------- #
def _matmul_bias_kernel(x_ref, w_ref, b_ref, o_ref, *, relu):
    acc = jnp.dot(x_ref[...], w_ref[...], preferred_element_type=jnp.float32)
    acc = acc + b_ref[...]
    if relu:
        acc = jnp.maximum(acc, 0.0)
    o_ref[...] = acc.astype(o_ref.dtype)


def matmul_bias(x, w, b, *, relu, matmul_dtype, out_dtype=jnp.float32,
                tm_max=512, tn_max=512, vmem_limit=32 << 20):
    """x: (M, K), w: (K, N), b: (1, N) -> (M, N) f32 (optionally relu'd).
    N must be a multiple of 128 (weights are pre-padded)."""
    M, K = x.shape
    N = w.shape[1]

    # Adaptive tm: largest tile whose M-padding waste stays <= ~12.5% of M.
    Mp8 = _round_up(M, 8)
    tm = 8
    for cand in (512, 256, 128, 64, 32, 16, 8):
        if cand > tm_max:
            continue
        if (_round_up(Mp8, cand) - Mp8) * 8 <= Mp8:
            tm = cand
            break
    Mp = _round_up(Mp8, tm)

    # Tile N so large feature widths stay VMEM-resident (tn=256 matches the
    # v6e/v7x MXU tile; N is always a multiple of 128 here).
    if N <= tn_max:
        tn = N
    elif N % 256 == 0:
        tn = 256
    else:
        tn = 128

    x = jnp.pad(x, ((0, Mp - M), (0, 0))).astype(matmul_dtype)
    w = w.astype(matmul_dtype)
    b = b.astype(jnp.float32)

    out = pl.pallas_call(
        functools.partial(_matmul_bias_kernel, relu=relu),
        out_shape=jax.ShapeDtypeStruct((Mp, N), out_dtype),
        grid_spec=pltpu.PrefetchScalarGridSpec(
            num_scalar_prefetch=0,
            grid=(Mp // tm, N // tn),
            in_specs=[pl.BlockSpec((tm, K), lambda i, j: (i, 0)),
                      pl.BlockSpec((K, tn), lambda i, j: (0, j)),
                      pl.BlockSpec((1, tn), lambda i, j: (0, j))],
            out_specs=pl.BlockSpec((tm, tn), lambda i, j: (i, j)),
        ),
        compiler_params=pltpu.CompilerParams(
            dimension_semantics=("parallel", "parallel"),
            vmem_limit_bytes=int(vmem_limit)),
    )(x, w, b)
    return out[:M]


# --------------------------------------------------------------------------- #
# Kernel 2: fused LSTM layer (chunked input projection + time recurrence)
# --------------------------------------------------------------------------- #
def _make_lstm_kernel(tc, tb, Dp, Hp, rem, unroll_main, unroll_tail, mm_dtype):
    last_is_partial = rem != tc

    def kernel(h0_ref, c0_ref, x_ref, w_ih_ref, w_hh_ref, b_ref,
               hseq_ref, h_out_ref, c_out_ref,
               pre_scr, h_scr, c_scr):
        t_blk = pl.program_id(1)
        n_tblk = pl.num_programs(1)

        @pl.when(t_blk == 0)
        def _():
            h_scr[...] = h0_ref[...]
            c_scr[...] = c0_ref[...]

        # Hoisted input projection for the whole chunk (one MXU matmul, off the
        # serial path); bias folded here.  Pre-gates live only in VMEM scratch —
        # no HBM round trip of the wide (T, B, 4H) tensor.
        x_chunk = x_ref[...].reshape(tc * tb, Dp)
        pre = jnp.dot(x_chunk, w_ih_ref[...], preferred_element_type=jnp.float32)
        pre_scr[...] = (pre + b_ref[...]).reshape(tc, tb, 4 * Hp)

        def step(t, carry):
            h = h_scr[...]
            c = c_scr[...]
            # Only the small recurrent matmul is on the serial path; w_hh is
            # streamed from VMEM each step instead of being pinned in vregs.
            gates = pre_scr[t] + jnp.dot(h.astype(mm_dtype), w_hh_ref[...],
                                         preferred_element_type=jnp.float32)
            # Gate columns are pre-permuted to [i, f, o, g]: one tanh slab covers
            # the 3 sigmoid gates (sigmoid(x) = 0.5*tanh(0.5*x) + 0.5) and one
            # covers g -> 2 transcendental slabs per step instead of 4+.
            sfo = 0.5 * jnp.tanh(0.5 * gates[:, :3 * Hp]) + 0.5
            g_g = jnp.tanh(gates[:, 3 * Hp:])
            i_g = sfo[:, 0 * Hp:1 * Hp]
            f_g = sfo[:, 1 * Hp:2 * Hp]
            o_g = sfo[:, 2 * Hp:3 * Hp]
            c_new = f_g * c + i_g * g_g
            h_new = o_g * jnp.tanh(c_new)
            h_scr[...] = h_new
            c_scr[...] = c_new
            hseq_ref[t] = h_new.astype(hseq_ref.dtype)
            return carry

        if not last_is_partial:
            # tc divides T: every chunk runs a mask-free loop.
            lax.fori_loop(0, tc, step, 0, unroll=unroll_main)
        else:
            # Tail handling confined to the final chunk — no per-step masking.
            @pl.when(t_blk < n_tblk - 1)
            def _():
                lax.fori_loop(0, tc, step, 0, unroll=unroll_main)

            @pl.when(t_blk == n_tblk - 1)
            def _():
                hseq_ref[...] = jnp.zeros_like(hseq_ref)   # deterministic tail
                lax.fori_loop(0, rem, step, 0, unroll=unroll_tail)

        h_out_ref[...] = h_scr[...]
        c_out_ref[...] = c_scr[...]

    return kernel


def lstm_recurrence(x_tm, w_ih, w_hh, b, h0, c0, *, t_real, tc, tb,
                    matmul_dtype, hseq_dtype, vmem_limit):
    """x_tm: (Tp, Bp, Dp); w_ih: (Dp, 4Hp); w_hh: (Hp, 4Hp); b: (1, 4Hp);
    h0/c0: (Bp, Hp) f32.  Returns (hseq (Tp,Bp,Hp), h (Bp,Hp), c (Bp,Hp))."""
    Tp, Bp, Dp = x_tm.shape
    Hp = w_hh.shape[0]
    num_chunks = Tp // tc
    rem = t_real - (num_chunks - 1) * tc          # valid steps in the last chunk

    if tc <= 8:
        unroll_main = unroll_tail = True
    else:
        state_vregs = (tb // 8) * (Hp // 128)     # vregs per (tb, Hp) f32 tile
        u = 8 if state_vregs <= 4 else 2          # low unroll for big tiles (spills)
        unroll_main = min(u, tc)
        unroll_tail = True if rem <= 8 else min(u, rem)

    kernel = _make_lstm_kernel(tc, tb, Dp, Hp, rem, unroll_main, unroll_tail,
                               matmul_dtype)

    hseq, h_out, c_out = pl.pallas_call(
        kernel,
        out_shape=(jax.ShapeDtypeStruct((Tp, Bp, Hp), hseq_dtype),
                   jax.ShapeDtypeStruct((Bp, Hp), jnp.float32),
                   jax.ShapeDtypeStruct((Bp, Hp), jnp.float32)),
        grid_spec=pltpu.PrefetchScalarGridSpec(
            num_scalar_prefetch=0,
            grid=(Bp // tb, num_chunks),
            in_specs=[pl.BlockSpec((tb, Hp), lambda bb, t: (bb, 0)),
                      pl.BlockSpec((tb, Hp), lambda bb, t: (bb, 0)),
                      pl.BlockSpec((tc, tb, Dp), lambda bb, t: (t, bb, 0)),
                      pl.BlockSpec((Dp, 4 * Hp), lambda bb, t: (0, 0)),
                      pl.BlockSpec((Hp, 4 * Hp), lambda bb, t: (0, 0)),
                      pl.BlockSpec((1, 4 * Hp), lambda bb, t: (0, 0))],
            out_specs=(pl.BlockSpec((tc, tb, Hp), lambda bb, t: (t, bb, 0)),
                       pl.BlockSpec((tb, Hp), lambda bb, t: (bb, 0)),
                       pl.BlockSpec((tb, Hp), lambda bb, t: (bb, 0))),
            scratch_shapes=[pltpu.VMEM((tc, tb, 4 * Hp), jnp.float32),
                            pltpu.VMEM((tb, Hp), jnp.float32),
                            pltpu.VMEM((tb, Hp), jnp.float32)]),
        compiler_params=pltpu.CompilerParams(
            dimension_semantics=("parallel", "arbitrary"),
            vmem_limit_bytes=int(vmem_limit)),
    )(h0.astype(jnp.float32), c0.astype(jnp.float32),
      x_tm.astype(matmul_dtype), w_ih.astype(matmul_dtype),
      w_hh.astype(matmul_dtype), b.astype(jnp.float32))
    return hseq, h_out, c_out


def _pick_time_chunk(T, tb, Dp_max, Hp, mm_isize, hseq_isize, tc_cap, budget):
    """Largest time chunk whose (double-buffered) blocks + scratch fit `budget`,
    preferring an exact divisor of T so no tail chunk is ever generated."""
    fixed = 2 * (Dp_max + Hp) * 4 * Hp * mm_isize      # W_ih + W_hh  (x2 buffers)
    fixed += 2 * 4 * Hp * 4                            # bias         (x2 buffers)
    fixed += 8 * tb * Hp * 4                           # h0/c0 in + h/c out (x2)
    fixed += 2 * tb * Hp * 4                           # h/c scratch
    per_tc = 2 * tb * Dp_max * mm_isize                # x chunk      (x2 buffers)
    per_tc += 2 * tb * Hp * hseq_isize                 # hseq chunk   (x2 buffers)
    per_tc += 2 * tb * 4 * Hp * 4                      # pre-gate scratch + matmul temp
    avail = budget - fixed
    tc = int(max(1, min(tc_cap, T, avail // per_tc if avail > 0 else 1)))
    best_div = 1
    for cand in range(tc, 0, -1):
        if T % cand == 0:
            best_div = cand
            break
    if best_div * 2 >= tc:          # accept a divisor unless it is much smaller
        tc = best_div
    needed = fixed + per_tc * tc
    return tc, needed


# --------------------------------------------------------------------------- #
# Decoder forward
# --------------------------------------------------------------------------- #
def decoder_forward(x, h0, c0, lstm_params, fc_params, duration_time_loc,
                    *, matmul_dtype=jnp.float32, tc_max=128, tb_max=128):
    """x: (B, T, input_size); h0/c0: (n_layers, B, hid_dim).
    Returns (prediction (B,T,input_size), hidden, cell) like the PyTorch Decoder.
    The module's second ReLU on `prediction[:, :, duration_time_loc]` is a
    bit-exact no-op after the full-tensor ReLU and is therefore not re-applied."""
    del duration_time_loc
    B, T, D = x.shape
    _, _, H = h0.shape
    Dp = lstm_params[0][0].shape[0]        # padded input feature dim
    Hp = lstm_params[0][1].shape[0]        # padded hidden dim
    Op = fc_params[0].shape[1]             # padded output feature dim

    # Batch tiling: multiple of 8 sublanes; >=2 blocks (when B is big enough)
    # lets v7x's two TensorCores share the 'parallel' batch axis.
    Bp8 = _round_up(B, 8)
    if Bp8 <= tb_max:
        tb = Bp8
    else:
        nblk = -(-Bp8 // tb_max)
        tb = _round_up(-(-Bp8 // nblk), 8)
    Bp = _round_up(Bp8, tb)

    # Generation-aware VMEM budget and an explicit scoped-VMEM limit so we never
    # rely on the 16/32 MiB defaults (v5e/v6e) or overflow v7x's 64 MiB.
    cap = _vmem_capacity_bytes()
    budget = int(min(max(12 << 20, cap // 2 - (8 << 20)), 56 << 20))
    mm_isize = jnp.dtype(matmul_dtype).itemsize
    hseq_dtype = matmul_dtype          # bf16 path also halves inter-layer HBM traffic
    tc, needed = _pick_time_chunk(T, tb, max(Dp, Hp), Hp, mm_isize,
                                  jnp.dtype(hseq_dtype).itemsize,
                                  min(tc_max, T), budget)
    vmem_limit = int(max(32 << 20, min(cap - (12 << 20), needed + (8 << 20))))
    Tp = _round_up(T, tc)

    # Time-major, padded once to (sublane=8, lane=128)-friendly geometry.
    x_tm = jnp.transpose(x, (1, 0, 2))
    x_tm = jnp.pad(x_tm, ((0, Tp - T), (0, Bp - B), (0, Dp - D)))
    x_tm = x_tm.astype(matmul_dtype)
    h_prev = jnp.pad(h0, ((0, 0), (0, Bp - B), (0, Hp - H)))
    c_prev = jnp.pad(c0, ((0, 0), (0, Bp - B), (0, Hp - H)))

    hs, cs = [], []
    inp = x_tm
    for l, (w_ih_p, w_hh_p, b_p) in enumerate(lstm_params):
        hseq, h_l, c_l = lstm_recurrence(
            inp, w_ih_p, w_hh_p, b_p, h_prev[l], c_prev[l],
            t_real=T, tc=tc, tb=tb,
            matmul_dtype=matmul_dtype, hseq_dtype=hseq_dtype,
            vmem_limit=vmem_limit)
        hs.append(h_l)
        cs.append(c_l)
        # Feed the padded (Tp, Bp, Hp) sequence straight into the next layer —
        # no [:T] slice (which would force an extra HBM copy per layer).
        inp = hseq
        # TODO(synk): nn.LSTM inter-layer dropout (p=dropout) is train-mode only;
        # eval-mode (no dropout) semantics are implemented here.

    # fc_out + ReLU fused in one tiled MXU matmul kernel.
    w_fc_p, b_fc_p = fc_params
    pred = matmul_bias(inp.reshape(Tp * Bp, Hp), w_fc_p, b_fc_p,
                       relu=True, matmul_dtype=matmul_dtype,
                       vmem_limit=vmem_limit)
    pred = pred.reshape(Tp, Bp, Op)[:T, :B, :D]
    pred = jnp.transpose(pred, (1, 0, 2))                    # (B, T, input_size)

    hidden = jnp.stack(hs)[:, :B, :H]
    cell = jnp.stack(cs)[:, :B, :H]
    return pred, hidden, cell


# --------------------------------------------------------------------------- #
# Parameter init (PyTorch-style) + gate-aware padding to vreg geometry
# --------------------------------------------------------------------------- #
_GATE_PERM = (0, 1, 3, 2)   # PyTorch/ref gate order [i, f, g, o] -> kernel [i, f, o, g]


def init_decoder_params(key, input_size, hidden_size, num_layers):
    """Math layout (unpadded): w_ih (D_in, 4H), w_hh (H, 4H), b = b_ih+b_hh (1, 4H),
    gate order [i, f, g, o]; fc: (H, input_size), (1, input_size)."""
    k = 1.0 / (hidden_size ** 0.5)
    lstm = []
    for layer in range(num_layers):
        d_in = input_size if layer == 0 else hidden_size
        key, k1, k2, k3, k4 = jax.random.split(key, 5)
        w_ih = jax.random.uniform(k1, (d_in, 4 * hidden_size), jnp.float32, -k, k)
        w_hh = jax.random.uniform(k2, (hidden_size, 4 * hidden_size), jnp.float32, -k, k)
        b_ih = jax.random.uniform(k3, (4 * hidden_size,), jnp.float32, -k, k)
        b_hh = jax.random.uniform(k4, (4 * hidden_size,), jnp.float32, -k, k)
        lstm.append((w_ih, w_hh, (b_ih + b_hh).reshape(1, 4 * hidden_size)))
    key, k5, k6 = jax.random.split(key, 3)
    w_fc = jax.random.uniform(k5, (hidden_size, input_size), jnp.float32, -k, k)
    b_fc = jax.random.uniform(k6, (1, input_size), jnp.float32, -k, k)
    return {"lstm": lstm, "fc": (w_fc, b_fc)}


def _pad_gates(w, rows_p, H, Hp):
    rows = w.shape[0]
    w = w.reshape(rows, 4, H)[:, _GATE_PERM, :]     # reorder gates for the kernel
    w = jnp.pad(w, ((0, rows_p - rows), (0, 0), (0, Hp - H)))
    return w.reshape(rows_p, 4 * Hp)


def prepare_padded_params(raw, input_size, hidden_size):
    # NOTE: each gate is padded to a full 128-lane group.  For tiny hidden sizes
    # (4*H <= 128) a packed gate layout would cut VMEM/EUP work ~4x but needs
    # unaligned lane slicing in the recurrence; not implemented here.
    D, H = input_size, hidden_size
    Dp, Hp = _round_up(D, 128), _round_up(H, 128)
    lstm_p = []
    for layer, (w_ih, w_hh, b) in enumerate(raw["lstm"]):
        rows_p = Dp if layer == 0 else Hp
        lstm_p.append((_pad_gates(w_ih, rows_p, H, Hp),
                       _pad_gates(w_hh, Hp, H, Hp),
                       _pad_gates(b, 1, H, Hp)))
    w_fc, b_fc = raw["fc"]
    w_fc_p = jnp.pad(w_fc, ((0, Hp - H), (0, Dp - D)))
    b_fc_p = jnp.pad(b_fc, ((0, 0), (0, Dp - D)))
    return lstm_p, (w_fc_p, b_fc_p)


# --------------------------------------------------------------------------- #
# Pure-JAX reference (unpadded, f32)
# --------------------------------------------------------------------------- #
def ref_decoder(x, h0, c0, raw, duration_time_loc):
    B, T, _ = x.shape
    inp = x
    hs, cs = [], []
    for l, (w_ih, w_hh, b) in enumerate(raw["lstm"]):
        H = w_hh.shape[0]
        h, c = h0[l], c0[l]
        outs = []
        for t in range(T):
            gates = inp[:, t, :] @ w_ih + h @ w_hh + b
            i = jax.nn.sigmoid(gates[:, 0:H])
            f = jax.nn.sigmoid(gates[:, H:2 * H])
            g = jnp.tanh(gates[:, 2 * H:3 * H])
            o = jax.nn.sigmoid(gates[:, 3 * H:4 * H])
            c = f * c + i * g
            h = o * jnp.tanh(c)
            outs.append(h)
        inp = jnp.stack(outs, axis=1)
        hs.append(h)
        cs.append(c)
    w_fc, b_fc = raw["fc"]
    pred = jnp.maximum(inp @ w_fc + b_fc, 0.0)
    pred = pred.at[:, :, duration_time_loc].set(
        jnp.maximum(pred[:, :, duration_time_loc], 0.0))
    return pred, jnp.stack(hs), jnp.stack(cs)


if __name__ == "__main__":
    # Decoder(input_size, batch, hid_dim, n_layers, dropout)
    batch, seq, input_size, hidden_size, num_layers = 2, 8, 16, 32, 2
    duration_time_loc = 3     # supplied by pr.Preprocessing in the original module

    key = jax.random.PRNGKey(0)
    key, kx, kh, kc = jax.random.split(key, 4)
    x = jax.random.normal(kx, (batch, seq, input_size), jnp.float32)
    h0 = jax.random.normal(kh, (num_layers, batch, hidden_size), jnp.float32)
    c0 = jax.random.normal(kc, (num_layers, batch, hidden_size), jnp.float32)

    raw = init_decoder_params(key, input_size, hidden_size, num_layers)
    lstm_p, fc_p = prepare_padded_params(raw, input_size, hidden_size)

    pred_ref, h_ref, c_ref = ref_decoder(x, h0, c0, raw, duration_time_loc)

    # f32 path: parity with the reference.
    run_f32 = jax.jit(lambda xx, hh, cc, lp, fp: decoder_forward(
        xx, hh, cc, lp, fp, duration_time_loc, matmul_dtype=jnp.float32))
    pred, h, c = jax.block_until_ready(run_f32(x, h0, c0, lstm_p, fc_p))

    assert pred.shape == (batch, seq, input_size)
    assert h.shape == (num_layers, batch, hidden_size)
    assert c.shape == (num_layers, batch, hidden_size)
    assert jnp.allclose(pred, pred_ref, atol=1e-4, rtol=1e-4)
    assert jnp.allclose(h, h_ref, atol=1e-4, rtol=1e-4)
    assert jnp.allclose(c, c_ref, atol=1e-4, rtol=1e-4)

    # bf16-operand / f32-accumulate fast path (MXU speed on v5e/v6e/v7x): loose tol.
    run_bf16 = jax.jit(lambda xx, hh, cc, lp, fp: decoder_forward(
        xx, hh, cc, lp, fp, duration_time_loc, matmul_dtype=jnp.bfloat16))
    pred_b, h_b, c_b = jax.block_until_ready(run_bf16(x, h0, c0, lstm_p, fc_p))
    assert jnp.allclose(pred_b, pred_ref, atol=2e-1, rtol=2e-1)
    assert jnp.allclose(h_b, h_ref, atol=2e-1, rtol=2e-1)
    assert jnp.allclose(c_b, c_ref, atol=2e-1, rtol=2e-1)

    print("KERNEL_OK")
</pallas_src>

<mosaic_0001>
module attributes {stable_mosaic.version = 11 : i64} {
  func.func @kernel(%arg0: i32, %arg1: i32, %arg2: memref<8x128xf32, #tpu.memory_space<vmem>>, %arg3: memref<8x128xf32, #tpu.memory_space<vmem>>, %arg4: memref<8x8x128xf32, #tpu.memory_space<vmem>>, %arg5: memref<128x512xf32, #tpu.memory_space<vmem>>, %arg6: memref<128x512xf32, #tpu.memory_space<vmem>>, %arg7: memref<1x512xf32, #tpu.memory_space<vmem>>, %arg8: memref<8x8x128xf32, #tpu.memory_space<vmem>>, %arg9: memref<8x128xf32, #tpu.memory_space<vmem>>, %arg10: memref<8x128xf32, #tpu.memory_space<vmem>>, %arg11: memref<8x8x512xf32, #tpu.memory_space<vmem>>, %arg12: memref<8x128xf32, #tpu.memory_space<vmem>>, %arg13: memref<8x128xf32, #tpu.memory_space<vmem>>) attributes {dimension_semantics = [#tpu.dimension_semantics<parallel>, #tpu.dimension_semantics<arbitrary>], iteration_bounds = array<i64: 1, 1>, scalar_prefetch = 0 : i64, scratch_operands = 3 : i64, tpu.core_type = #tpu.core_type<tc>, window_params = [{transform_indices = @transform_0, window_bounds = array<i64: 8, 128>}, {transform_indices = @transform_1, window_bounds = array<i64: 8, 128>}, {transform_indices = @transform_2, window_bounds = array<i64: 8, 8, 128>}, {pipeline_mode = #tpu.pipeline_mode<synchronous>, transform_indices = @transform_3, window_bounds = array<i64: 128, 512>}, {pipeline_mode = #tpu.pipeline_mode<synchronous>, transform_indices = @transform_4, window_bounds = array<i64: 128, 512>}, {pipeline_mode = #tpu.pipeline_mode<synchronous>, transform_indices = @transform_5, window_bounds = array<i64: 1, 512>}, {transform_indices = @transform_6, window_bounds = array<i64: 8, 8, 128>}, {transform_indices = @transform_7, window_bounds = array<i64: 8, 128>}, {transform_indices = @transform_8, window_bounds = array<i64: 8, 128>}]} {
    %c0_i32 = arith.constant 0 : i32
    %0 = arith.cmpi eq, %arg1, %c0_i32 : i32
    %1 = arith.extui %0 : i1 to i32
    %c0_i32_0 = arith.constant 0 : i32
    %2 = arith.cmpi ne, %1, %c0_i32_0 : i32
    scf.if %2 {
      %c0_163 = arith.constant 0 : index
      %c0_164 = arith.constant 0 : index
      %272 = vector.load %arg2[%c0_163, %c0_164] : memref<8x128xf32, #tpu.memory_space<vmem>>, vector<8x128xf32>
      %c0_165 = arith.constant 0 : index
      %c0_166 = arith.constant 0 : index
      %273 = vector.load %arg12[%c0_165, %c0_166] : memref<8x128xf32, #tpu.memory_space<vmem>>, vector<8x128xf32>
      tpu.vector_store %arg12[%c0_165, %c0_166], %272 {strides = array<i32>} : memref<8x128xf32, #tpu.memory_space<vmem>>, vector<8x128xf32>,
      %c0_167 = arith.constant 0 : index
      %c0_168 = arith.constant 0 : index
      %274 = vector.load %arg3[%c0_167, %c0_168] : memref<8x128xf32, #tpu.memory_space<vmem>>, vector<8x128xf32>
      %c0_169 = arith.constant 0 : index
      %c0_170 = arith.constant 0 : index
      %275 = vector.load %arg13[%c0_169, %c0_170] : memref<8x128xf32, #tpu.memory_space<vmem>>, vector<8x128xf32>
      tpu.vector_store %arg13[%c0_169, %c0_170], %274 {strides = array<i32>} : memref<8x128xf32, #tpu.memory_space<vmem>>, vector<8x128xf32>,
    } else {
    }
    %c0 = arith.constant 0 : index
    %c0_1 = arith.constant 0 : index
    %c0_2 = arith.constant 0 : index
    %3 = vector.load %arg4[%c0, %c0_1, %c0_2] : memref<8x8x128xf32, #tpu.memory_space<vmem>>, vector<8x8x128xf32>
    %4 = vector.shape_cast %3 : vector<8x8x128xf32> to vector<64x128xf32>
    %c0_3 = arith.constant 0 : index
    %c0_4 = arith.constant 0 : index
    %5 = vector.load %arg5[%c0_3, %c0_4] : memref<128x512xf32, #tpu.memory_space<vmem>>, vector<128x512xf32>
    %cst = arith.constant dense<0.000000e+00> : vector<64x512xf32>
    %6 = tpu.matmul %4, %5, %cst {dimension_numbers = #tpu.dot_dimension_numbers<[1], [0], [0], [1], [0, 0, 1, 1], [], []>} : vector<64x128xf32>, vector<128x512xf32>, vector<64x512xf32> -> vector<64x512xf32>
    %c0_5 = arith.constant 0 : index
    %c0_6 = arith.constant 0 : index
    %7 = vector.load %arg7[%c0_5, %c0_6] : memref<1x512xf32, #tpu.memory_space<vmem>>, vector<1x512xf32>
    %8 = vector.broadcast %7 : vector<1x512xf32> to vector<64x512xf32>
    %9 = arith.addf %6, %8 : vector<64x512xf32>
    %10 = vector.shape_cast %9 : vector<64x512xf32> to vector<8x8x512xf32>
    %c0_7 = arith.constant 0 : index
    %c0_8 = arith.constant 0 : index
    %c0_9 = arith.constant 0 : index
    %11 = vector.load %arg11[%c0_7, %c0_8, %c0_9] : memref<8x8x512xf32, #tpu.memory_space<vmem>>, vector<8x8x512xf32>
    tpu.vector_store %arg11[%c0_7, %c0_8, %c0_9], %10 {strides = array<i32>} : memref<8x8x512xf32, #tpu.memory_space<vmem>>, vector<8x8x512xf32>,
    %c0_i32_10 = arith.constant 0 : i32
    %c0_11 = arith.constant 0 : index
    %c0_12 = arith.constant 0 : index
    %12 = vector.load %arg12[%c0_11, %c0_12] : memref<8x128xf32, #tpu.memory_space<vmem>>, vector<8x128xf32>
    %c0_13 = arith.constant 0 : index
    %c0_14 = arith.constant 0 : index
    %13 = vector.load %arg13[%c0_13, %c0_14] : memref<8x128xf32, #tpu.memory_space<vmem>>, vector<8x128xf32>
    %14 = arith.index_cast %c0_i32_10 : i32 to index
    %c0_15 = arith.constant 0 : index
    %c0_16 = arith.constant 0 : index
    %15 = vector.load %arg11[%14, %c0_15, %c0_16] : memref<8x8x512xf32, #tpu.memory_space<vmem>>, vector<1x8x512xf32>
    %16 = vector.shape_cast %15 : vector<1x8x512xf32> to vector<8x512xf32>
    %c0_17 = arith.constant 0 : index
    %c0_18 = arith.constant 0 : index
    %17 = vector.load %arg6[%c0_17, %c0_18] : memref<128x512xf32, #tpu.memory_space<vmem>>, vector<128x512xf32>
    %cst_19 = arith.constant dense<0.000000e+00> : vector<8x512xf32>
    %18 = tpu.matmul %12, %17, %cst_19 {dimension_numbers = #tpu.dot_dimension_numbers<[1], [0], [0], [1], [0, 0, 1, 1], [], []>} : vector<8x128xf32>, vector<128x512xf32>, vector<8x512xf32> -> vector<8x512xf32>
    %19 = arith.addf %16, %18 : vector<8x512xf32>
    %20 = vector.extract_strided_slice %19 {offsets = [0, 0], sizes = [8, 384], strides = [1, 1]} : vector<8x512xf32> to vector<8x384xf32>
    %cst_20 = arith.constant 5.000000e-01 : f32
    %21 = vector.broadcast %cst_20 : f32 to vector<8x384xf32>
    %22 = arith.mulf %21, %20 : vector<8x384xf32>
    %23 = math.tanh %22 : vector<8x384xf32>
    %cst_21 = arith.constant 5.000000e-01 : f32
    %24 = vector.broadcast %cst_21 : f32 to vector<8x384xf32>
    %25 = arith.mulf %24, %23 : vector<8x384xf32>
    %cst_22 = arith.constant 5.000000e-01 : f32
    %26 = vector.broadcast %cst_22 : f32 to vector<8x384xf32>
    %27 = arith.addf %25, %26 : vector<8x384xf32>
    %28 = vector.extract_strided_slice %19 {offsets = [0, 384], sizes = [8, 128], strides = [1, 1]} : vector<8x512xf32> to vector<8x128xf32>
    %29 = math.tanh %28 : vector<8x128xf32>
    %30 = vector.extract_strided_slice %27 {offsets = [0, 0], sizes = [8, 128], strides = [1, 1]} : vector<8x384xf32> to vector<8x128xf32>
    %31 = vector.extract_strided_slice %27 {offsets = [0, 128], sizes = [8, 128], strides = [1, 1]} : vector<8x384xf32> to vector<8x128xf32>
    %32 = vector.extract_strided_slice %27 {offsets = [0, 256], sizes = [8, 128], strides = [1, 1]} : vector<8x384xf32> to vector<8x128xf32>
    %33 = arith.mulf %31, %13 : vector<8x128xf32>
    %34 = arith.mulf %30, %29 : vector<8x128xf32>
    %35 = arith.addf %33, %34 : vector<8x128xf32>
    %36 = math.tanh %35 : vector<8x128xf32>
    %37 = arith.mulf %32, %36 : vector<8x128xf32>
    %c0_23 = arith.constant 0 : index
    %c0_24 = arith.constant 0 : index
    %38 = vector.load %arg12[%c0_23, %c0_24] : memref<8x128xf32, #tpu.memory_space<vmem>>, vector<8x128xf32>
    tpu.vector_store %arg12[%c0_23, %c0_24], %37 {strides = array<i32>} : memref<8x128xf32, #tpu.memory_space<vmem>>, vector<8x128xf32>,
    %c0_25 = arith.constant 0 : index
    %c0_26 = arith.constant 0 : index
    %39 = vector.load %arg13[%c0_25, %c0_26] : memref<8x128xf32, #tpu.memory_space<vmem>>, vector<8x128xf32>
    tpu.vector_store %arg13[%c0_25, %c0_26], %35 {strides = array<i32>} : memref<8x128xf32, #tpu.memory_space<vmem>>, vector<8x128xf32>,
    %40 = arith.index_cast %c0_i32_10 : i32 to index
    %c0_27 = arith.constant 0 : index
    %c0_28 = arith.constant 0 : index
    %41 = vector.load %arg8[%40, %c0_27, %c0_28] : memref<8x8x128xf32, #tpu.memory_space<vmem>>, vector<1x8x128xf32>
    %42 = vector.shape_cast %41 : vector<1x8x128xf32> to vector<8x128xf32>
    %43 = vector.shape_cast %37 : vector<8x128xf32> to vector<1x8x128xf32>
    tpu.vector_store %arg8[%40, %c0_27, %c0_28], %43 {strides = array<i32>} : memref<8x8x128xf32, #tpu.memory_space<vmem>>, vector<1x8x128xf32>,
    %c1_i32 = arith.constant 1 : i32
    %c0_29 = arith.constant 0 : index
    %c0_30 = arith.constant 0 : index
    %44 = vector.load %arg12[%c0_29, %c0_30] : memref<8x128xf32, #tpu.memory_space<vmem>>, vector<8x128xf32>
    %c0_31 = arith.constant 0 : index
    %c0_32 = arith.constant 0 : index
    %45 = vector.load %arg13[%c0_31, %c0_32] : memref<8x128xf32, #tpu.memory_space<vmem>>, vector<8x128xf32>
    %46 = arith.index_cast %c1_i32 : i32 to index
    %c0_33 = arith.constant 0 : index
    %c0_34 = arith.constant 0 : index
    %47 = vector.load %arg11[%46, %c0_33, %c0_34] : memref<8x8x512xf32, #tpu.memory_space<vmem>>, vector<1x8x512xf32>
    %48 = vector.shape_cast %47 : vector<1x8x512xf32> to vector<8x512xf32>
    %c0_35 = arith.constant 0 : index
    %c0_36 = arith.constant 0 : index
    %49 = vector.load %arg6[%c0_35, %c0_36] : memref<128x512xf32, #tpu.memory_space<vmem>>, vector<128x512xf32>
    %cst_37 = arith.constant dense<0.000000e+00> : vector<8x512xf32>
    %50 = tpu.matmul %44, %49, %cst_37 {dimension_numbers = #tpu.dot_dimension_numbers<[1], [0], [0], [1], [0, 0, 1, 1], [], []>} : vector<8x128xf32>, vector<128x512xf32>, vector<8x512xf32> -> vector<8x512xf32>
    %51 = arith.addf %48, %50 : vector<8x512xf32>
    %52 = vector.extract_strided_slice %51 {offsets = [0, 0], sizes = [8, 384], strides = [1, 1]} : vector<8x512xf32> to vector<8x384xf32>
    %cst_38 = arith.constant 5.000000e-01 : f32
    %53 = vector.broadcast %cst_38 : f32 to vector<8x384xf32>
    %54 = arith.mulf %53, %52 : vector<8x384xf32>
    %55 = math.tanh %54 : vector<8x384xf32>
    %cst_39 = arith.constant 5.000000e-01 : f32
    %56 = vector.broadcast %cst_39 : f32 to vector<8x384xf32>
    %57 = arith.mulf %56, %55 : vector<8x384xf32>
    %cst_40 = arith.constant 5.000000e-01 : f32
    %58 = vector.broadcast %cst_40 : f32 to vector<8x384xf32>
    %59 = arith.addf %57, %58 : vector<8x384xf32>
    %60 = vector.extract_strided_slice %51 {offsets = [0, 384], sizes = [8, 128], strides = [1, 1]} : vector<8x512xf32> to vector<8x128xf32>
    %61 = math.tanh %60 : vector<8x128xf32>
    %62 = vector.extract_strided_slice %59 {offsets = [0, 0], sizes = [8, 128], strides = [1, 1]} : vector<8x384xf32> to vector<8x128xf32>
    %63 = vector.extract_strided_slice %59 {offsets = [0, 128], sizes = [8, 128], strides = [1, 1]} : vector<8x384xf32> to vector<8x128xf32>
    %64 = vector.extract_strided_slice %59 {offsets = [0, 256], sizes = [8, 128], strides = [1, 1]} : vector<8x384xf32> to vector<8x128xf32>
    %65 = arith.mulf %63, %45 : vector<8x128xf32>
    %66 = arith.mulf %62, %61 : vector<8x128xf32>
    %67 = arith.addf %65, %66 : vector<8x128xf32>
    %68 = math.tanh %67 : vector<8x128xf32>
    %69 = arith.mulf %64, %68 : vector<8x128xf32>
    %c0_41 = arith.constant 0 : index
    %c0_42 = arith.constant 0 : index
    %70 = vector.load %arg12[%c0_41, %c0_42] : memref<8x128xf32, #tpu.memory_space<vmem>>, vector<8x128xf32>
    tpu.vector_store %arg12[%c0_41, %c0_42], %69 {strides = array<i32>} : memref<8x128xf32, #tpu.memory_space<vmem>>, vector<8x128xf32>,
    %c0_43 = arith.constant 0 : index
    %c0_44 = arith.constant 0 : index
    %71 = vector.load %arg13[%c0_43, %c0_44] : memref<8x128xf32, #tpu.memory_space<vmem>>, vector<8x128xf32>
    tpu.vector_store %arg13[%c0_43, %c0_44], %67 {strides = array<i32>} : memref<8x128xf32, #tpu.memory_space<vmem>>, vector<8x128xf32>,
    %72 = arith.index_cast %c1_i32 : i32 to index
    %c0_45 = arith.constant 0 : index
    %c0_46 = arith.constant 0 : index
    %73 = vector.load %arg8[%72, %c0_45, %c0_46] : memref<8x8x128xf32, #tpu.memory_space<vmem>>, vector<1x8x128xf32>
    %74 = vector.shape_cast %73 : vector<1x8x128xf32> to vector<8x128xf32>
    %75 = vector.shape_cast %69 : vector<8x128xf32> to vector<1x8x128xf32>
    tpu.vector_store %arg8[%72, %c0_45, %c0_46], %75 {strides = array<i32>} : memref<8x8x128xf32, #tpu.memory_space<vmem>>, vector<1x8x128xf32>,
    %c2_i32 = arith.constant 2 : i32
    %c0_47 = arith.constant 0 : index
    %c0_48 = arith.constant 0 : index
    %76 = vector.load %arg12[%c0_47, %c0_48] : memref<8x128xf32, #tpu.memory_space<vmem>>, vector<8x128xf32>
    %c0_49 = arith.constant 0 : index
    %c0_50 = arith.constant 0 : index
    %77 = vector.load %arg13[%c0_49, %c0_50] : memref<8x128xf32, #tpu.memory_space<vmem>>, vector<8x128xf32>
    %78 = arith.index_cast %c2_i32 : i32 to index
    %c0_51 = arith.constant 0 : index
    %c0_52 = arith.constant 0 : index
    %79 = vector.load %arg11[%78, %c0_51, %c0_52] : memref<8x8x512xf32, #tpu.memory_space<vmem>>, vector<1x8x512xf32>
    %80 = vector.shape_cast %79 : vector<1x8x512xf32> to vector<8x512xf32>
    %c0_53 = arith.constant 0 : index
    %c0_54 = arith.constant 0 : index
    %81 = vector.load %arg6[%c0_53, %c0_54] : memref<128x512xf32, #tpu.memory_space<vmem>>, vector<128x512xf32>
    %cst_55 = arith.constant dense<0.000000e+00> : vector<8x512xf32>
    %82 = tpu.matmul %76, %81, %cst_55 {dimension_numbers = #tpu.dot_dimension_numbers<[1], [0], [0], [1], [0, 0, 1, 1], [], []>} : vector<8x128xf32>, vector<128x512xf32>, vector<8x512xf32> -> vector<8x512xf32>
    %83 = arith.addf %80, %82 : vector<8x512xf32>
    %84 = vector.extract_strided_slice %83 {offsets = [0, 0], sizes = [8, 384], strides = [1, 1]} : vector<8x512xf32> to vector<8x384xf32>
    %cst_56 = arith.constant 5.000000e-01 : f32
    %85 = vector.broadcast %cst_56 : f32 to vector<8x384xf32>
    %86 = arith.mulf %85, %84 : vector<8x384xf32>
    %87 = math.tanh %86 : vector<8x384xf32>
    %cst_57 = arith.constant 5.000000e-01 : f32
    %88 = vector.broadcast %cst_57 : f32 to vector<8x384xf32>
    %89 = arith.mulf %88, %87 : vector<8x384xf32>
    %cst_58 = arith.constant 5.000000e-01 : f32
    %90 = vector.broadcast %cst_58 : f32 to vector<8x384xf32>
    %91 = arith.addf %89, %90 : vector<8x384xf32>
    %92 = vector.extract_strided_slice %83 {offsets = [0, 384], sizes = [8, 128], strides = [1, 1]} : vector<8x512xf32> to vector<8x128xf32>
    %93 = math.tanh %92 : vector<8x128xf32>
    %94 = vector.extract_strided_slice %91 {offsets = [0, 0], sizes = [8, 128], strides = [1, 1]} : vector<8x384xf32> to vector<8x128xf32>
    %95 = vector.extract_strided_slice %91 {offsets = [0, 128], sizes = [8, 128], strides = [1, 1]} : vector<8x384xf32> to vector<8x128xf32>
    %96 = vector.extract_strided_slice %91 {offsets = [0, 256], sizes = [8, 128], strides = [1, 1]} : vector<8x384xf32> to vector<8x128xf32>
    %97 = arith.mulf %95, %77 : vector<8x128xf32>
    %98 = arith.mulf %94, %93 : vector<8x128xf32>
    %99 = arith.addf %97, %98 : vector<8x128xf32>
    %100 = math.tanh %99 : vector<8x128xf32>
    %101 = arith.mulf %96, %100 : vector<8x128xf32>
    %c0_59 = arith.constant 0 : index
    %c0_60 = arith.constant 0 : index
    %102 = vector.load %arg12[%c0_59, %c0_60] : memref<8x128xf32, #tpu.memory_space<vmem>>, vector<8x128xf32>
    tpu.vector_store %arg12[%c0_59, %c0_60], %101 {strides = array<i32>} : memref<8x128xf32, #tpu.memory_space<vmem>>, vector<8x128xf32>,
    %c0_61 = arith.constant 0 : index
    %c0_62 = arith.constant 0 : index
    %103 = vector.load %arg13[%c0_61, %c0_62] : memref<8x128xf32, #tpu.memory_space<vmem>>, vector<8x128xf32>
    tpu.vector_store %arg13[%c0_61, %c0_62], %99 {strides = array<i32>} : memref<8x128xf32, #tpu.memory_space<vmem>>, vector<8x128xf32>,
    %104 = arith.index_cast %c2_i32 : i32 to index
    %c0_63 = arith.constant 0 : index
    %c0_64 = arith.constant 0 : index
    %105 = vector.load %arg8[%104, %c0_63, %c0_64] : memref<8x8x128xf32, #tpu.memory_space<vmem>>, vector<1x8x128xf32>
    %106 = vector.shape_cast %105 : vector<1x8x128xf32> to vector<8x128xf32>
    %107 = vector.shape_cast %101 : vector<8x128xf32> to vector<1x8x128xf32>
    tpu.vector_store %arg8[%104, %c0_63, %c0_64], %107 {strides = array<i32>} : memref<8x8x128xf32, #tpu.memory_space<vmem>>, vector<1x8x128xf32>,
    %c3_i32 = arith.constant 3 : i32
    %c0_65 = arith.constant 0 : index
    %c0_66 = arith.constant 0 : index
    %108 = vector.load %arg12[%c0_65, %c0_66] : memref<8x128xf32, #tpu.memory_space<vmem>>, vector<8x128xf32>
    %c0_67 = arith.constant 0 : index
    %c0_68 = arith.constant 0 : index
    %109 = vector.load %arg13[%c0_67, %c0_68] : memref<8x128xf32, #tpu.memory_space<vmem>>, vector<8x128xf32>
    %110 = arith.index_cast %c3_i32 : i32 to index
    %c0_69 = arith.constant 0 : index
    %c0_70 = arith.constant 0 : index
    %111 = vector.load %arg11[%110, %c0_69, %c0_70] : memref<8x8x512xf32, #tpu.memory_space<vmem>>, vector<1x8x512xf32>
    %112 = vector.shape_cast %111 : vector<1x8x512xf32> to vector<8x512xf32>
    %c0_71 = arith.constant 0 : index
    %c0_72 = arith.constant 0 : index
    %113 = vector.load %arg6[%c0_71, %c0_72] : memref<128x512xf32, #tpu.memory_space<vmem>>, vector<128x512xf32>
    %cst_73 = arith.constant dense<0.000000e+00> : vector<8x512xf32>
    %114 = tpu.matmul %108, %113, %cst_73 {dimension_numbers = #tpu.dot_dimension_numbers<[1], [0], [0], [1], [0, 0, 1, 1], [], []>} : vector<8x128xf32>, vector<128x512xf32>, vector<8x512xf32> -> vector<8x512xf32>
    %115 = arith.addf %112, %114 : vector<8x512xf32>
    %116 = vector.extract_strided_slice %115 {offsets = [0, 0], sizes = [8, 384], strides = [1, 1]} : vector<8x512xf32> to vector<8x384xf32>
    %cst_74 = arith.constant 5.000000e-01 : f32
    %117 = vector.broadcast %cst_74 : f32 to vector<8x384xf32>
    %118 = arith.mulf %117, %116 : vector<8x384xf32>
    %119 = math.tanh %118 : vector<8x384xf32>
    %cst_75 = arith.constant 5.000000e-01 : f32
    %120 = vector.broadcast %cst_75 : f32 to vector<8x384xf32>
    %121 = arith.mulf %120, %119 : vector<8x384xf32>
    %cst_76 = arith.constant 5.000000e-01 : f32
    %122 = vector.broadcast %cst_76 : f32 to vector<8x384xf32>
    %123 = arith.addf %121, %122 : vector<8x384xf32>
    %124 = vector.extract_strided_slice %115 {offsets = [0, 384], sizes = [8, 128], strides = [1, 1]} : vector<8x512xf32> to vector<8x128xf32>
    %125 = math.tanh %124 : vector<8x128xf32>
    %126 = vector.extract_strided_slice %123 {offsets = [0, 0], sizes = [8, 128], strides = [1, 1]} : vector<8x384xf32> to vector<8x128xf32>
    %127 = vector.extract_strided_slice %123 {offsets = [0, 128], sizes = [8, 128], strides = [1, 1]} : vector<8x384xf32> to vector<8x128xf32>
    %128 = vector.extract_strided_slice %123 {offsets = [0, 256], sizes = [8, 128], strides = [1, 1]} : vector<8x384xf32> to vector<8x128xf32>
    %129 = arith.mulf %127, %109 : vector<8x128xf32>
    %130 = arith.mulf %126, %125 : vector<8x128xf32>
    %131 = arith.addf %129, %130 : vector<8x128xf32>
    %132 = math.tanh %131 : vector<8x128xf32>
    %133 = arith.mulf %128, %132 : vector<8x128xf32>
    %c0_77 = arith.constant 0 : index
    %c0_78 = arith.constant 0 : index
    %134 = vector.load %arg12[%c0_77, %c0_78] : memref<8x128xf32, #tpu.memory_space<vmem>>, vector<8x128xf32>
    tpu.vector_store %arg12[%c0_77, %c0_78], %133 {strides = array<i32>} : memref<8x128xf32, #tpu.memory_space<vmem>>, vector<8x128xf32>,
    %c0_79 = arith.constant 0 : index
    %c0_80 = arith.constant 0 : index
    %135 = vector.load %arg13[%c0_79, %c0_80] : memref<8x128xf32, #tpu.memory_space<vmem>>, vector<8x128xf32>
    tpu.vector_store %arg13[%c0_79, %c0_80], %131 {strides = array<i32>} : memref<8x128xf32, #tpu.memory_space<vmem>>, vector<8x128xf32>,
    %136 = arith.index_cast %c3_i32 : i32 to index
    %c0_81 = arith.constant 0 : index
    %c0_82 = arith.constant 0 : index
    %137 = vector.load %arg8[%136, %c0_81, %c0_82] : memref<8x8x128xf32, #tpu.memory_space<vmem>>, vector<1x8x128xf32>
    %138 = vector.shape_cast %137 : vector<1x8x128xf32> to vector<8x128xf32>
    %139 = vector.shape_cast %133 : vector<8x128xf32> to vector<1x8x128xf32>
    tpu.vector_store %arg8[%136, %c0_81, %c0_82], %139 {strides = array<i32>} : memref<8x8x128xf32, #tpu.memory_space<vmem>>, vector<1x8x128xf32>,
    %c4_i32 = arith.constant 4 : i32
    %c0_83 = arith.constant 0 : index
    %c0_84 = arith.constant 0 : index
    %140 = vector.load %arg12[%c0_83, %c0_84] : memref<8x128xf32, #tpu.memory_space<vmem>>, vector<8x128xf32>
    %c0_85 = arith.constant 0 : index
    %c0_86 = arith.constant 0 : index
    %141 = vector.load %arg13[%c0_85, %c0_86] : memref<8x128xf32, #tpu.memory_space<vmem>>, vector<8x128xf32>
    %142 = arith.index_cast %c4_i32 : i32 to index
    %c0_87 = arith.constant 0 : index
    %c0_88 = arith.constant 0 : index
    %143 = vector.load %arg11[%142, %c0_87, %c0_88] : memref<8x8x512xf32, #tpu.memory_space<vmem>>, vector<1x8x512xf32>
    %144 = vector.shape_cast %143 : vector<1x8x512xf32> to vector<8x512xf32>
    %c0_89 = arith.constant 0 : index
    %c0_90 = arith.constant 0 : index
    %145 = vector.load %arg6[%c0_89, %c0_90] : memref<128x512xf32, #tpu.memory_space<vmem>>, vector<128x512xf32>
    %cst_91 = arith.constant dense<0.000000e+00> : vector<8x512xf32>
    %146 = tpu.matmul %140, %145, %cst_91 {dimension_numbers = #tpu.dot_dimension_numbers<[1], [0], [0], [1], [0, 0, 1, 1], [], []>} : vector<8x128xf32>, vector<128x512xf32>, vector<8x512xf32> -> vector<8x512xf32>
    %147 = arith.addf %144, %146 : vector<8x512xf32>
    %148 = vector.extract_strided_slice %147 {offsets = [0, 0], sizes = [8, 384], strides = [1, 1]} : vector<8x512xf32> to vector<8x384xf32>
    %cst_92 = arith.constant 5.000000e-01 : f32
    %149 = vector.broadcast %cst_92 : f32 to vector<8x384xf32>
    %150 = arith.mulf %149, %148 : vector<8x384xf32>
    %151 = math.tanh %150 : vector<8x384xf32>
    %cst_93 = arith.constant 5.000000e-01 : f32
    %152 = vector.broadcast %cst_93 : f32 to vector<8x384xf32>
    %153 = arith.mulf %152, %151 : vector<8x384xf32>
    %cst_94 = arith.constant 5.000000e-01 : f32
    %154 = vector.broadcast %cst_94 : f32 to vector<8x384xf32>
    %155 = arith.addf %153, %154 : vector<8x384xf32>
    %156 = vector.extract_strided_slice %147 {offsets = [0, 384], sizes = [8, 128], strides = [1, 1]} : vector<8x512xf32> to vector<8x128xf32>
    %157 = math.tanh %156 : vector<8x128xf32>
    %158 = vector.extract_strided_slice %155 {offsets = [0, 0], sizes = [8, 128], strides = [1, 1]} : vector<8x384xf32> to vector<8x128xf32>
    %159 = vector.extract_strided_slice %155 {offsets = [0, 128], sizes = [8, 128], strides = [1, 1]} : vector<8x384xf32> to vector<8x128xf32>
    %160 = vector.extract_strided_slice %155 {offsets = [0, 256], sizes = [8, 128], strides = [1, 1]} : vector<8x384xf32> to vector<8x128xf32>
    %161 = arith.mulf %159, %141 : vector<8x128xf32>
    %162 = arith.mulf %158, %157 : vector<8x128xf32>
    %163 = arith.addf %161, %162 : vector<8x128xf32>
    %164 = math.tanh %163 : vector<8x128xf32>
    %165 = arith.mulf %160, %164 : vector<8x128xf32>
    %c0_95 = arith.constant 0 : index
    %c0_96 = arith.constant 0 : index
    %166 = vector.load %arg12[%c0_95, %c0_96] : memref<8x128xf32, #tpu.memory_space<vmem>>, vector<8x128xf32>
    tpu.vector_store %arg12[%c0_95, %c0_96], %165 {strides = array<i32>} : memref<8x128xf32, #tpu.memory_space<vmem>>, vector<8x128xf32>,
    %c0_97 = arith.constant 0 : index
    %c0_98 = arith.constant 0 : index
    %167 = vector.load %arg13[%c0_97, %c0_98] : memref<8x128xf32, #tpu.memory_space<vmem>>, vector<8x128xf32>
    tpu.vector_store %arg13[%c0_97, %c0_98], %163 {strides = array<i32>} : memref<8x128xf32, #tpu.memory_space<vmem>>, vector<8x128xf32>,
    %168 = arith.index_cast %c4_i32 : i32 to index
    %c0_99 = arith.constant 0 : index
    %c0_100 = arith.constant 0 : index
    %169 = vector.load %arg8[%168, %c0_99, %c0_100] : memref<8x8x128xf32, #tpu.memory_space<vmem>>, vector<1x8x128xf32>
    %170 = vector.shape_cast %169 : vector<1x8x128xf32> to vector<8x128xf32>
    %171 = vector.shape_cast %165 : vector<8x128xf32> to vector<1x8x128xf32>
    tpu.vector_store %arg8[%168, %c0_99, %c0_100], %171 {strides = array<i32>} : memref<8x8x128xf32, #tpu.memory_space<vmem>>, vector<1x8x128xf32>,
    %c5_i32 = arith.constant 5 : i32
    %c0_101 = arith.constant 0 : index
    %c0_102 = arith.constant 0 : index
    %172 = vector.load %arg12[%c0_101, %c0_102] : memref<8x128xf32, #tpu.memory_space<vmem>>, vector<8x128xf32>
    %c0_103 = arith.constant 0 : index
    %c0_104 = arith.constant 0 : index
    %173 = vector.load %arg13[%c0_103, %c0_104] : memref<8x128xf32, #tpu.memory_space<vmem>>, vector<8x128xf32>
    %174 = arith.index_cast %c5_i32 : i32 to index
    %c0_105 = arith.constant 0 : index
    %c0_106 = arith.constant 0 : index
    %175 = vector.load %arg11[%174, %c0_105, %c0_106] : memref<8x8x512xf32, #tpu.memory_space<vmem>>, vector<1x8x512xf32>
    %176 = vector.shape_cast %175 : vector<1x8x512xf32> to vector<8x512xf32>
    %c0_107 = arith.constant 0 : index
    %c0_108 = arith.constant 0 : index
    %177 = vector.load %arg6[%c0_107, %c0_108] : memref<128x512xf32, #tpu.memory_space<vmem>>, vector<128x512xf32>
    %cst_109 = arith.constant dense<0.000000e+00> : vector<8x512xf32>
    %178 = tpu.matmul %172, %177, %cst_109 {dimension_numbers = #tpu.dot_dimension_numbers<[1], [0], [0], [1], [0, 0, 1, 1], [], []>} : vector<8x128xf32>, vector<128x512xf32>, vector<8x512xf32> -> vector<8x512xf32>
    %179 = arith.addf %176, %178 : vector<8x512xf32>
    %180 = vector.extract_strided_slice %179 {offsets = [0, 0], sizes = [8, 384], strides = [1, 1]} : vector<8x512xf32> to vector<8x384xf32>
    %cst_110 = arith.constant 5.000000e-01 : f32
    %181 = vector.broadcast %cst_110 : f32 to vector<8x384xf32>
    %182 = arith.mulf %181, %180 : vector<8x384xf32>
    %183 = math.tanh %182 : vector<8x384xf32>
    %cst_111 = arith.constant 5.000000e-01 : f32
    %184 = vector.broadcast %cst_111 : f32 to vector<8x384xf32>
    %185 = arith.mulf %184, %183 : vector<8x384xf32>
    %cst_112 = arith.constant 5.000000e-01 : f32
    %186 = vector.broadcast %cst_112 : f32 to vector<8x384xf32>
    %187 = arith.addf %185, %186 : vector<8x384xf32>
    %188 = vector.extract_strided_slice %179 {offsets = [0, 384], sizes = [8, 128], strides = [1, 1]} : vector<8x512xf32> to vector<8x128xf32>
    %189 = math.tanh %188 : vector<8x128xf32>
    %190 = vector.extract_strided_slice %187 {offsets = [0, 0], sizes = [8, 128], strides = [1, 1]} : vector<8x384xf32> to vector<8x128xf32>
    %191 = vector.extract_strided_slice %187 {offsets = [0, 128], sizes = [8, 128], strides = [1, 1]} : vector<8x384xf32> to vector<8x128xf32>
    %192 = vector.extract_strided_slice %187 {offsets = [0, 256], sizes = [8, 128], strides = [1, 1]} : vector<8x384xf32> to vector<8x128xf32>
    %193 = arith.mulf %191, %173 : vector<8x128xf32>
    %194 = arith.mulf %190, %189 : vector<8x128xf32>
    %195 = arith.addf %193, %194 : vector<8x128xf32>
    %196 = math.tanh %195 : vector<8x128xf32>
    %197 = arith.mulf %192, %196 : vector<8x128xf32>
    %c0_113 = arith.constant 0 : index
    %c0_114 = arith.constant 0 : index
    %198 = vector.load %arg12[%c0_113, %c0_114] : memref<8x128xf32, #tpu.memory_space<vmem>>, vector<8x128xf32>
    tpu.vector_store %arg12[%c0_113, %c0_114], %197 {strides = array<i32>} : memref<8x128xf32, #tpu.memory_space<vmem>>, vector<8x128xf32>,
    %c0_115 = arith.constant 0 : index
    %c0_116 = arith.constant 0 : index
    %199 = vector.load %arg13[%c0_115, %c0_116] : memref<8x128xf32, #tpu.memory_space<vmem>>, vector<8x128xf32>
    tpu.vector_store %arg13[%c0_115, %c0_116], %195 {strides = array<i32>} : memref<8x128xf32, #tpu.memory_space<vmem>>, vector<8x128xf32>,
    %200 = arith.index_cast %c5_i32 : i32 to index
    %c0_117 = arith.constant 0 : index
    %c0_118 = arith.constant 0 : index
    %201 = vector.load %arg8[%200, %c0_117, %c0_118] : memref<8x8x128xf32, #tpu.memory_space<vmem>>, vector<1x8x128xf32>
    %202 = vector.shape_cast %201 : vector<1x8x128xf32> to vector<8x128xf32>
    %203 = vector.shape_cast %197 : vector<8x128xf32> to vector<1x8x128xf32>
    tpu.vector_store %arg8[%200, %c0_117, %c0_118], %203 {strides = array<i32>} : memref<8x8x128xf32, #tpu.memory_space<vmem>>, vector<1x8x128xf32>,
    %c6_i32 = arith.constant 6 : i32
    %c0_119 = arith.constant 0 : index
    %c0_120 = arith.constant 0 : index
    %204 = vector.load %arg12[%c0_119, %c0_120] : memref<8x128xf32, #tpu.memory_space<vmem>>, vector<8x128xf32>
    %c0_121 = arith.constant 0 : index
    %c0_122 = arith.constant 0 : index
    %205 = vector.load %arg13[%c0_121, %c0_122] : memref<8x128xf32, #tpu.memory_space<vmem>>, vector<8x128xf32>
    %206 = arith.index_cast %c6_i32 : i32 to index
    %c0_123 = arith.constant 0 : index
    %c0_124 = arith.constant 0 : index
    %207 = vector.load %arg11[%206, %c0_123, %c0_124] : memref<8x8x512xf32, #tpu.memory_space<vmem>>, vector<1x8x512xf32>
    %208 = vector.shape_cast %207 : vector<1x8x512xf32> to vector<8x512xf32>
    %c0_125 = arith.constant 0 : index
    %c0_126 = arith.constant 0 : index
    %209 = vector.load %arg6[%c0_125, %c0_126] : memref<128x512xf32, #tpu.memory_space<vmem>>, vector<128x512xf32>
    %cst_127 = arith.constant dense<0.000000e+00> : vector<8x512xf32>
    %210 = tpu.matmul %204, %209, %cst_127 {dimension_numbers = #tpu.dot_dimension_numbers<[1], [0], [0], [1], [0, 0, 1, 1], [], []>} : vector<8x128xf32>, vector<128x512xf32>, vector<8x512xf32> -> vector<8x512xf32>
    %211 = arith.addf %208, %210 : vector<8x512xf32>
    %212 = vector.extract_strided_slice %211 {offsets = [0, 0], sizes = [8, 384], strides = [1, 1]} : vector<8x512xf32> to vector<8x384xf32>
    %cst_128 = arith.constant 5.000000e-01 : f32
    %213 = vector.broadcast %cst_128 : f32 to vector<8x384xf32>
    %214 = arith.mulf %213, %212 : vector<8x384xf32>
    %215 = math.tanh %214 : vector<8x384xf32>
    %cst_129 = arith.constant 5.000000e-01 : f32
    %216 = vector.broadcast %cst_129 : f32 to vector<8x384xf32>
    %217 = arith.mulf %216, %215 : vector<8x384xf32>
    %cst_130 = arith.constant 5.000000e-01 : f32
    %218 = vector.broadcast %cst_130 : f32 to vector<8x384xf32>
    %219 = arith.addf %217, %218 : vector<8x384xf32>
    %220 = vector.extract_strided_slice %211 {offsets = [0, 384], sizes = [8, 128], strides = [1, 1]} : vector<8x512xf32> to vector<8x128xf32>
    %221 = math.tanh %220 : vector<8x128xf32>
    %222 = vector.extract_strided_slice %219 {offsets = [0, 0], sizes = [8, 128], strides = [1, 1]} : vector<8x384xf32> to vector<8x128xf32>
    %223 = vector.extract_strided_slice %219 {offsets = [0, 128], sizes = [8, 128], strides = [1, 1]} : vector<8x384xf32> to vector<8x128xf32>
    %224 = vector.extract_strided_slice %219 {offsets = [0, 256], sizes = [8, 128], strides = [1, 1]} : vector<8x384xf32> to vector<8x128xf32>
    %225 = arith.mulf %223, %205 : vector<8x128xf32>
    %226 = arith.mulf %222, %221 : vector<8x128xf32>
    %227 = arith.addf %225, %226 : vector<8x128xf32>
    %228 = math.tanh %227 : vector<8x128xf32>
    %229 = arith.mulf %224, %228 : vector<8x128xf32>
    %c0_131 = arith.constant 0 : index
    %c0_132 = arith.constant 0 : index
    %230 = vector.load %arg12[%c0_131, %c0_132] : memref<8x128xf32, #tpu.memory_space<vmem>>, vector<8x128xf32>
    tpu.vector_store %arg12[%c0_131, %c0_132], %229 {strides = array<i32>} : memref<8x128xf32, #tpu.memory_space<vmem>>, vector<8x128xf32>,
    %c0_133 = arith.constant 0 : index
    %c0_134 = arith.constant 0 : index
    %231 = vector.load %arg13[%c0_133, %c0_134] : memref<8x128xf32, #tpu.memory_space<vmem>>, vector<8x128xf32>
    tpu.vector_store %arg13[%c0_133, %c0_134], %227 {strides = array<i32>} : memref<8x128xf32, #tpu.memory_space<vmem>>, vector<8x128xf32>,
    %232 = arith.index_cast %c6_i32 : i32 to index
    %c0_135 = arith.constant 0 : index
    %c0_136 = arith.constant 0 : index
    %233 = vector.load %arg8[%232, %c0_135, %c0_136] : memref<8x8x128xf32, #tpu.memory_space<vmem>>, vector<1x8x128xf32>
    %234 = vector.shape_cast %233 : vector<1x8x128xf32> to vector<8x128xf32>
    %235 = vector.shape_cast %229 : vector<8x128xf32> to vector<1x8x128xf32>
    tpu.vector_store %arg8[%232, %c0_135, %c0_136], %235 {strides = array<i32>} : memref<8x8x128xf32, #tpu.memory_space<vmem>>, vector<1x8x128xf32>,
    %c7_i32 = arith.constant 7 : i32
    %c0_137 = arith.constant 0 : index
    %c0_138 = arith.constant 0 : index
    %236 = vector.load %arg12[%c0_137, %c0_138] : memref<8x128xf32, #tpu.memory_space<vmem>>, vector<8x128xf32>
    %c0_139 = arith.constant 0 : index
    %c0_140 = arith.constant 0 : index
    %237 = vector.load %arg13[%c0_139, %c0_140] : memref<8x128xf32, #tpu.memory_space<vmem>>, vector<8x128xf32>
    %238 = arith.index_cast %c7_i32 : i32 to index
    %c0_141 = arith.constant 0 : index
    %c0_142 = arith.constant 0 : index
    %239 = vector.load %arg11[%238, %c0_141, %c0_142] : memref<8x8x512xf32, #tpu.memory_space<vmem>>, vector<1x8x512xf32>
    %240 = vector.shape_cast %239 : vector<1x8x512xf32> to vector<8x512xf32>
    %c0_143 = arith.constant 0 : index
    %c0_144 = arith.constant 0 : index
    %241 = vector.load %arg6[%c0_143, %c0_144] : memref<128x512xf32, #tpu.memory_space<vmem>>, vector<128x512xf32>
    %cst_145 = arith.constant dense<0.000000e+00> : vector<8x512xf32>
    %242 = tpu.matmul %236, %241, %cst_145 {dimension_numbers = #tpu.dot_dimension_numbers<[1], [0], [0], [1], [0, 0, 1, 1], [], []>} : vector<8x128xf32>, vector<128x512xf32>, vector<8x512xf32> -> vector<8x512xf32>
    %243 = arith.addf %240, %242 : vector<8x512xf32>
    %244 = vector.extract_strided_slice %243 {offsets = [0, 0], sizes = [8, 384], strides = [1, 1]} : vector<8x512xf32> to vector<8x384xf32>
    %cst_146 = arith.constant 5.000000e-01 : f32
    %245 = vector.broadcast %cst_146 : f32 to vector<8x384xf32>
    %246 = arith.mulf %245, %244 : vector<8x384xf32>
    %247 = math.tanh %246 : vector<8x384xf32>
    %cst_147 = arith.constant 5.000000e-01 : f32
    %248 = vector.broadcast %cst_147 : f32 to vector<8x384xf32>
    %249 = arith.mulf %248, %247 : vector<8x384xf32>
    %cst_148 = arith.constant 5.000000e-01 : f32
    %250 = vector.broadcast %cst_148 : f32 to vector<8x384xf32>
    %251 = arith.addf %249, %250 : vector<8x384xf32>
    %252 = vector.extract_strided_slice %243 {offsets = [0, 384], sizes = [8, 128], strides = [1, 1]} : vector<8x512xf32> to vector<8x128xf32>
    %253 = math.tanh %252 : vector<8x128xf32>
    %254 = vector.extract_strided_slice %251 {offsets = [0, 0], sizes = [8, 128], strides = [1, 1]} : vector<8x384xf32> to vector<8x128xf32>
    %255 = vector.extract_strided_slice %251 {offsets = [0, 128], sizes = [8, 128], strides = [1, 1]} : vector<8x384xf32> to vector<8x128xf32>
    %256 = vector.extract_strided_slice %251 {offsets = [0, 256], sizes = [8, 128], strides = [1, 1]} : vector<8x384xf32> to vector<8x128xf32>
    %257 = arith.mulf %255, %237 : vector<8x128xf32>
    %258 = arith.mulf %254, %253 : vector<8x128xf32>
    %259 = arith.addf %257, %258 : vector<8x128xf32>
    %260 = math.tanh %259 : vector<8x128xf32>
    %261 = arith.mulf %256, %260 : vector<8x128xf32>
    %c0_149 = arith.constant 0 : index
    %c0_150 = arith.constant 0 : index
    %262 = vector.load %arg12[%c0_149, %c0_150] : memref<8x128xf32, #tpu.memory_space<vmem>>, vector<8x128xf32>
    tpu.vector_store %arg12[%c0_149, %c0_150], %261 {strides = array<i32>} : memref<8x128xf32, #tpu.memory_space<vmem>>, vector<8x128xf32>,
    %c0_151 = arith.constant 0 : index
    %c0_152 = arith.constant 0 : index
    %263 = vector.load %arg13[%c0_151, %c0_152] : memref<8x128xf32, #tpu.memory_space<vmem>>, vector<8x128xf32>
    tpu.vector_store %arg13[%c0_151, %c0_152], %259 {strides = array<i32>} : memref<8x128xf32, #tpu.memory_space<vmem>>, vector<8x128xf32>,
    %264 = arith.index_cast %c7_i32 : i32 to index
    %c0_153 = arith.constant 0 : index
    %c0_154 = arith.constant 0 : index
    %265 = vector.load %arg8[%264, %c0_153, %c0_154] : memref<8x8x128xf32, #tpu.memory_space<vmem>>, vector<1x8x128xf32>
    %266 = vector.shape_cast %265 : vector<1x8x128xf32> to vector<8x128xf32>
    %267 = vector.shape_cast %261 : vector<8x128xf32> to vector<1x8x128xf32>
    tpu.vector_store %arg8[%264, %c0_153, %c0_154], %267 {strides = array<i32>} : memref<8x8x128xf32, #tpu.memory_space<vmem>>, vector<1x8x128xf32>,
    %c8_i32 = arith.constant 8 : i32
    %c0_155 = arith.constant 0 : index
    %c0_156 = arith.constant 0 : index
    %268 = vector.load %arg12[%c0_155, %c0_156] : memref<8x128xf32, #tpu.memory_space<vmem>>, vector<8x128xf32>
    %c0_157 = arith.constant 0 : index
    %c0_158 = arith.constant 0 : index
    %269 = vector.load %arg9[%c0_157, %c0_158] : memref<8x128xf32, #tpu.memory_space<vmem>>, vector<8x128xf32>
    tpu.vector_store %arg9[%c0_157, %c0_158], %268 {strides = array<i32>} : memref<8x128xf32, #tpu.memory_space<vmem>>, vector<8x128xf32>,
    %c0_159 = arith.constant 0 : index
    %c0_160 = arith.constant 0 : index
    %270 = vector.load %arg13[%c0_159, %c0_160] : memref<8x128xf32, #tpu.memory_space<vmem>>, vector<8x128xf32>
    %c0_161 = arith.constant 0 : index
    %c0_162 = arith.constant 0 : index
    %271 = vector.load %arg10[%c0_161, %c0_162] : memref<8x128xf32, #tpu.memory_space<vmem>>, vector<8x128xf32>
    tpu.vector_store %arg10[%c0_161, %c0_162], %270 {strides = array<i32>} : memref<8x128xf32, #tpu.memory_space<vmem>>, vector<8x128xf32>,
    return
  }
  func.func @transform_0(%arg0: i32, %arg1: i32) -> (i32, i32) {
    %c0_i32 = arith.constant 0 : i32
    %c0_i32_0 = arith.constant 0 : i32
    return %arg0, %c0_i32 : i32, i32
  }
  func.func @transform_1(%arg0: i32, %arg1: i32) -> (i32, i32) {
    %c0_i32 = arith.constant 0 : i32
    %c0_i32_0 = arith.constant 0 : i32
    return %arg0, %c0_i32 : i32, i32
  }
  func.func @transform_2(%arg0: i32, %arg1: i32) -> (i32, i32, i32) {
    %c0_i32 = arith.constant 0 : i32
    %c0_i32_0 = arith.constant 0 : i32
    return %arg1, %arg0, %c0_i32 : i32, i32, i32
  }
  func.func @transform_3(%arg0: i32, %arg1: i32) -> (i32, i32) {
    %c0_i32 = arith.constant 0 : i32
    %c0_i32_0 = arith.constant 0 : i32
    %c0_i32_1 = arith.constant 0 : i32
    return %c0_i32, %c0_i32_0 : i32, i32
  }
  func.func @transform_4(%arg0: i32, %arg1: i32) -> (i32, i32) {
    %c0_i32 = arith.constant 0 : i32
    %c0_i32_0 = arith.constant 0 : i32
    %c0_i32_1 = arith.constant 0 : i32
    return %c0_i32, %c0_i32_0 : i32, i32
  }
  func.func @transform_5(%arg0: i32, %arg1: i32) -> (i32, i32) {
    %c0_i32 = arith.constant 0 : i32
    %c0_i32_0 = arith.constant 0 : i32
    %c0_i32_1 = arith.constant 0 : i32
    return %c0_i32, %c0_i32_0 : i32, i32
  }
  func.func @transform_6(%arg0: i32, %arg1: i32) -> (i32, i32, i32) {
    %c0_i32 = arith.constant 0 : i32
    %c0_i32_0 = arith.constant 0 : i32
    return %arg1, %arg0, %c0_i32 : i32, i32, i32
  }
  func.func @transform_7(%arg0: i32, %arg1: i32) -> (i32, i32) {
    %c0_i32 = arith.constant 0 : i32
    %c0_i32_0 = arith.constant 0 : i32
    return %arg0, %c0_i32 : i32, i32
  }
  func.func @transform_8(%arg0: i32, %arg1: i32) -> (i32, i32) {
    %c0_i32 = arith.constant 0 : i32
    %c0_i32_0 = arith.constant 0 : i32
    return %arg0, %c0_i32 : i32, i32
  }
}

module attributes {stable_mosaic.version = 11 : i64} {
  func.func @_matmul_bias_kernel(%arg0: i32, %arg1: i32, %arg2: memref<64x128xf32, #tpu.memory_space<vmem>>, %arg3: memref<128x128xf32, #tpu.memory_space<vmem>>, %arg4: memref<1x128xf32, #tpu.memory_space<vmem>>, %arg5: memref<64x128xf32, #tpu.memory_space<vmem>>) attributes {dimension_semantics = [#tpu.dimension_semantics<parallel>, #tpu.dimension_semantics<parallel>], iteration_bounds = array<i64: 1, 1>, scalar_prefetch = 0 : i64, scratch_operands = 0 : i64, tpu.core_type = #tpu.core_type<tc>, window_params = [{transform_indices = @transform_0, window_bounds = array<i64: 64, 128>}, {transform_indices = @transform_1, window_bounds = array<i64: 128, 128>}, {transform_indices = @transform_2, window_bounds = array<i64: 1, 128>}, {transform_indices = @transform_3, window_bounds = array<i64: 64, 128>}]} {
    %c0 = arith.constant 0 : index
    %c0_0 = arith.constant 0 : index
    %0 = vector.load %arg2[%c0, %c0_0] : memref<64x128xf32, #tpu.memory_space<vmem>>, vector<64x128xf32>
    %c0_1 = arith.constant 0 : index
    %c0_2 = arith.constant 0 : index
    %1 = vector.load %arg3[%c0_1, %c0_2] : memref<128x128xf32, #tpu.memory_space<vmem>>, vector<128x128xf32>
    %cst = arith.constant dense<0.000000e+00> : vector<64x128xf32>
    %2 = tpu.matmul %0, %1, %cst {dimension_numbers = #tpu.dot_dimension_numbers<[1], [0], [0], [1], [0, 0, 1, 1], [], []>} : vector<64x128xf32>, vector<128x128xf32>, vector<64x128xf32> -> vector<64x128xf32>
    %c0_3 = arith.constant 0 : index
    %c0_4 = arith.constant 0 : index
    %3 = vector.load %arg4[%c0_3, %c0_4] : memref<1x128xf32, #tpu.memory_space<vmem>>, vector<1x128xf32>
    %4 = vector.broadcast %3 : vector<1x128xf32> to vector<64x128xf32>
    %5 = arith.addf %2, %4 : vector<64x128xf32>
    %cst_5 = arith.constant 0.000000e+00 : f32
    %6 = vector.broadcast %cst_5 : f32 to vector<64x128xf32>
    %7 = arith.maximumf %5, %6 : vector<64x128xf32>
    %c0_6 = arith.constant 0 : index
    %c0_7 = arith.constant 0 : index
    %8 = vector.load %arg5[%c0_6, %c0_7] : memref<64x128xf32, #tpu.memory_space<vmem>>, vector<64x128xf32>
    tpu.vector_store %arg5[%c0_6, %c0_7], %7 {strides = array<i32>} : memref<64x128xf32, #tpu.memory_space<vmem>>, vector<64x128xf32>,
    return
  }
  func.func @transform_0(%arg0: i32, %arg1: i32) -> (i32, i32) {
    %c0_i32 = arith.constant 0 : i32
    %c0_i32_0 = arith.constant 0 : i32
    return %arg0, %c0_i32 : i32, i32
  }
  func.func @transform_1(%arg0: i32, %arg1: i32) -> (i32, i32) {
    %c0_i32 = arith.constant 0 : i32
    %c0_i32_0 = arith.constant 0 : i32
    return %c0_i32, %arg1 : i32, i32
  }
  func.func @transform_2(%arg0: i32, %arg1: i32) -> (i32, i32) {
    %c0_i32 = arith.constant 0 : i32
    %c0_i32_0 = arith.constant 0 : i32
    return %c0_i32, %arg1 : i32, i32
  }
  func.func @transform_3(%arg0: i32, %arg1: i32) -> (i32, i32) {
    %c0_i32 = arith.constant 0 : i32
    return %arg0, %arg1 : i32, i32
  }
}

module attributes {stable_mosaic.version = 11 : i64} {
  func.func @kernel(%arg0: i32, %arg1: i32, %arg2: memref<8x128xf32, #tpu.memory_space<vmem>>, %arg3: memref<8x128xf32, #tpu.memory_space<vmem>>, %arg4: memref<8x8x128xf32, #tpu.memory_space<vmem>>, %arg5: memref<128x512xf32, #tpu.memory_space<vmem>>, %arg6: memref<128x512xf32, #tpu.memory_space<vmem>>, %arg7: memref<1x512xf32, #tpu.memory_space<vmem>>, %arg8: memref<8x8x128xf32, #tpu.memory_space<vmem>>, %arg9: memref<8x128xf32, #tpu.memory_space<vmem>>, %arg10: memref<8x128xf32, #tpu.memory_space<vmem>>, %arg11: memref<8x8x512xf32, #tpu.memory_space<vmem>>, %arg12: memref<8x128xf32, #tpu.memory_space<vmem>>, %arg13: memref<8x128xf32, #tpu.memory_space<vmem>>) attributes {dimension_semantics = [#tpu.dimension_semantics<parallel>, #tpu.dimension_semantics<arbitrary>], iteration_bounds = array<i64: 1, 1>, scalar_prefetch = 0 : i64, scratch_operands = 3 : i64, tpu.core_type = #tpu.core_type<tc>, window_params = [{transform_indices = @transform_0, window_bounds = array<i64: 8, 128>}, {transform_indices = @transform_1, window_bounds = array<i64: 8, 128>}, {transform_indices = @transform_2, window_bounds = array<i64: 8, 8, 128>}, {pipeline_mode = #tpu.pipeline_mode<synchronous>, transform_indices = @transform_3, window_bounds = array<i64: 128, 512>}, {pipeline_mode = #tpu.pipeline_mode<synchronous>, transform_indices = @transform_4, window_bounds = array<i64: 128, 512>}, {pipeline_mode = #tpu.pipeline_mode<synchronous>, transform_indices = @transform_5, window_bounds = array<i64: 1, 512>}, {transform_indices = @transform_6, window_bounds = array<i64: 8, 8, 128>}, {transform_indices = @transform_7, window_bounds = array<i64: 8, 128>}, {transform_indices = @transform_8, window_bounds = array<i64: 8, 128>}]} {
    %c0_i32 = arith.constant 0 : i32
    %0 = arith.cmpi eq, %arg1, %c0_i32 : i32
    %1 = arith.extui %0 : i1 to i32
    %c0_i32_0 = arith.constant 0 : i32
    %2 = arith.cmpi ne, %1, %c0_i32_0 : i32
    scf.if %2 {
      %c0_163 = arith.constant 0 : index
      %c0_164 = arith.constant 0 : index
      %272 = vector.load %arg2[%c0_163, %c0_164] : memref<8x128xf32, #tpu.memory_space<vmem>>, vector<8x128xf32>
      %c0_165 = arith.constant 0 : index
      %c0_166 = arith.constant 0 : index
      %273 = vector.load %arg12[%c0_165, %c0_166] : memref<8x128xf32, #tpu.memory_space<vmem>>, vector<8x128xf32>
      tpu.vector_store %arg12[%c0_165, %c0_166], %272 {strides = array<i32>} : memref<8x128xf32, #tpu.memory_space<vmem>>, vector<8x128xf32>,
      %c0_167 = arith.constant 0 : index
      %c0_168 = arith.constant 0 : index
      %274 = vector.load %arg3[%c0_167, %c0_168] : memref<8x128xf32, #tpu.memory_space<vmem>>, vector<8x128xf32>
      %c0_169 = arith.constant 0 : index
      %c0_170 = arith.constant 0 : index
      %275 = vector.load %arg13[%c0_169, %c0_170] : memref<8x128xf32, #tpu.memory_space<vmem>>, vector<8x128xf32>
      tpu.vector_store %arg13[%c0_169, %c0_170], %274 {strides = array<i32>} : memref<8x128xf32, #tpu.memory_space<vmem>>, vector<8x128xf32>,
    } else {
    }
    %c0 = arith.constant 0 : index
    %c0_1 = arith.constant 0 : index
    %c0_2 = arith.constant 0 : index
    %3 = vector.load %arg4[%c0, %c0_1, %c0_2] : memref<8x8x128xf32, #tpu.memory_space<vmem>>, vector<8x8x128xf32>
    %4 = vector.shape_cast %3 : vector<8x8x128xf32> to vector<64x128xf32>
    %c0_3 = arith.constant 0 : index
    %c0_4 = arith.constant 0 : index
    %5 = vector.load %arg5[%c0_3, %c0_4] : memref<128x512xf32, #tpu.memory_space<vmem>>, vector<128x512xf32>
    %cst = arith.constant dense<0.000000e+00> : vector<64x512xf32>
    %6 = tpu.matmul %4, %5, %cst {dimension_numbers = #tpu.dot_dimension_numbers<[1], [0], [0], [1], [0, 0, 1, 1], [], []>} : vector<64x128xf32>, vector<128x512xf32>, vector<64x512xf32> -> vector<64x512xf32>
    %c0_5 = arith.constant 0 : index
    %c0_6 = arith.constant 0 : index
    %7 = vector.load %arg7[%c0_5, %c0_6] : memref<1x512xf32, #tpu.memory_space<vmem>>, vector<1x512xf32>
    %8 = vector.broadcast %7 : vector<1x512xf32> to vector<64x512xf32>
    %9 = arith.addf %6, %8 : vector<64x512xf32>
    %10 = vector.shape_cast %9 : vector<64x512xf32> to vector<8x8x512xf32>
    %c0_7 = arith.constant 0 : index
    %c0_8 = arith.constant 0 : index
    %c0_9 = arith.constant 0 : index
    %11 = vector.load %arg11[%c0_7, %c0_8, %c0_9] : memref<8x8x512xf32, #tpu.memory_space<vmem>>, vector<8x8x512xf32>
    tpu.vector_store %arg11[%c0_7, %c0_8, %c0_9], %10 {strides = array<i32>} : memref<8x8x512xf32, #tpu.memory_space<vmem>>, vector<8x8x512xf32>,
    %c0_i32_10 = arith.constant 0 : i32
    %c0_11 = arith.constant 0 : index
    %c0_12 = arith.constant 0 : index
    %12 = vector.load %arg12[%c0_11, %c0_12] : memref<8x128xf32, #tpu.memory_space<vmem>>, vector<8x128xf32>
    %c0_13 = arith.constant 0 : index
    %c0_14 = arith.constant 0 : index
    %13 = vector.load %arg13[%c0_13, %c0_14] : memref<8x128xf32, #tpu.memory_space<vmem>>, vector<8x128xf32>
    %14 = arith.index_cast %c0_i32_10 : i32 to index
    %c0_15 = arith.constant 0 : index
    %c0_16 = arith.constant 0 : index
    %15 = vector.load %arg11[%14, %c0_15, %c0_16] : memref<8x8x512xf32, #tpu.memory_space<vmem>>, vector<1x8x512xf32>
    %16 = vector.shape_cast %15 : vector<1x8x512xf32> to vector<8x512xf32>
    %c0_17 = arith.constant 0 : index
    %c0_18 = arith.constant 0 : index
    %17 = vector.load %arg6[%c0_17, %c0_18] : memref<128x512xf32, #tpu.memory_space<vmem>>, vector<128x512xf32>
    %cst_19 = arith.constant dense<0.000000e+00> : vector<8x512xf32>
    %18 = tpu.matmul %12, %17, %cst_19 {dimension_numbers = #tpu.dot_dimension_numbers<[1], [0], [0], [1], [0, 0, 1, 1], [], []>} : vector<8x128xf32>, vector<128x512xf32>, vector<8x512xf32> -> vector<8x512xf32>
    %19 = arith.addf %16, %18 : vector<8x512xf32>
    %20 = vector.extract_strided_slice %19 {offsets = [0, 0], sizes = [8, 384], strides = [1, 1]} : vector<8x512xf32> to vector<8x384xf32>
    %cst_20 = arith.constant 5.000000e-01 : f32
    %21 = vector.broadcast %cst_20 : f32 to vector<8x384xf32>
    %22 = arith.mulf %21, %20 : vector<8x384xf32>
    %23 = math.tanh %22 : vector<8x384xf32>
    %cst_21 = arith.constant 5.000000e-01 : f32
    %24 = vector.broadcast %cst_21 : f32 to vector<8x384xf32>
    %25 = arith.mulf %24, %23 : vector<8x384xf32>
    %cst_22 = arith.constant 5.000000e-01 : f32
    %26 = vector.broadcast %cst_22 : f32 to vector<8x384xf32>
    %27 = arith.addf %25, %26 : vector<8x384xf32>
    %28 = vector.extract_strided_slice %19 {offsets = [0, 384], sizes = [8, 128], strides = [1, 1]} : vector<8x512xf32> to vector<8x128xf32>
    %29 = math.tanh %28 : vector<8x128xf32>
    %30 = vector.extract_strided_slice %27 {offsets = [0, 0], sizes = [8, 128], strides = [1, 1]} : vector<8x384xf32> to vector<8x128xf32>
    %31 = vector.extract_strided_slice %27 {offsets = [0, 128], sizes = [8, 128], strides = [1, 1]} : vector<8x384xf32> to vector<8x128xf32>
    %32 = vector.extract_strided_slice %27 {offsets = [0, 256], sizes = [8, 128], strides = [1, 1]} : vector<8x384xf32> to vector<8x128xf32>
    %33 = arith.mulf %31, %13 : vector<8x128xf32>
    %34 = arith.mulf %30, %29 : vector<8x128xf32>
    %35 = arith.addf %33, %34 : vector<8x128xf32>
    %36 = math.tanh %35 : vector<8x128xf32>
    %37 = arith.mulf %32, %36 : vector<8x128xf32>
    %c0_23 = arith.constant 0 : index
    %c0_24 = arith.constant 0 : index
    %38 = vector.load %arg12[%c0_23, %c0_24] : memref<8x128xf32, #tpu.memory_space<vmem>>, vector<8x128xf32>
    tpu.vector_store %arg12[%c0_23, %c0_24], %37 {strides = array<i32>} : memref<8x128xf32, #tpu.memory_space<vmem>>, vector<8x128xf32>,
    %c0_25 = arith.constant 0 : index
    %c0_26 = arith.constant 0 : index
    %39 = vector.load %arg13[%c0_25, %c0_26] : memref<8x128xf32, #tpu.memory_space<vmem>>, vector<8x128xf32>
    tpu.vector_store %arg13[%c0_25, %c0_26], %35 {strides = array<i32>} : memref<8x128xf32, #tpu.memory_space<vmem>>, vector<8x128xf32>,
    %40 = arith.index_cast %c0_i32_10 : i32 to index
    %c0_27 = arith.constant 0 : index
    %c0_28 = arith.constant 0 : index
    %41 = vector.load %arg8[%40, %c0_27, %c0_28] : memref<8x8x128xf32, #tpu.memory_space<vmem>>, vector<1x8x128xf32>
    %42 = vector.shape_cast %41 : vector<1x8x128xf32> to vector<8x128xf32>
    %43 = vector.shape_cast %37 : vector<8x128xf32> to vector<1x8x128xf32>
    tpu.vector_store %arg8[%40, %c0_27, %c0_28], %43 {strides = array<i32>} : memref<8x8x128xf32, #tpu.memory_space<vmem>>, vector<1x8x128xf32>,
    %c1_i32 = arith.constant 1 : i32
    %c0_29 = arith.constant 0 : index
    %c0_30 = arith.constant 0 : index
    %44 = vector.load %arg12[%c0_29, %c0_30] : memref<8x128xf32, #tpu.memory_space<vmem>>, vector<8x128xf32>
    %c0_31 = arith.constant 0 : index
    %c0_32 = arith.constant 0 : index
    %45 = vector.load %arg13[%c0_31, %c0_32] : memref<8x128xf32, #tpu.memory_space<vmem>>, vector<8x128xf32>
    %46 = arith.index_cast %c1_i32 : i32 to index
    %c0_33 = arith.constant 0 : index
    %c0_34 = arith.constant 0 : index
    %47 = vector.load %arg11[%46, %c0_33, %c0_34] : memref<8x8x512xf32, #tpu.memory_space<vmem>>, vector<1x8x512xf32>
    %48 = vector.shape_cast %47 : vector<1x8x512xf32> to vector<8x512xf32>
    %c0_35 = arith.constant 0 : index
    %c0_36 = arith.constant 0 : index
    %49 = vector.load %arg6[%c0_35, %c0_36] : memref<128x512xf32, #tpu.memory_space<vmem>>, vector<128x512xf32>
    %cst_37 = arith.constant dense<0.000000e+00> : vector<8x512xf32>
    %50 = tpu.matmul %44, %49, %cst_37 {dimension_numbers = #tpu.dot_dimension_numbers<[1], [0], [0], [1], [0, 0, 1, 1], [], []>} : vector<8x128xf32>, vector<128x512xf32>, vector<8x512xf32> -> vector<8x512xf32>
    %51 = arith.addf %48, %50 : vector<8x512xf32>
    %52 = vector.extract_strided_slice %51 {offsets = [0, 0], sizes = [8, 384], strides = [1, 1]} : vector<8x512xf32> to vector<8x384xf32>
    %cst_38 = arith.constant 5.000000e-01 : f32
    %53 = vector.broadcast %cst_38 : f32 to vector<8x384xf32>
    %54 = arith.mulf %53, %52 : vector<8x384xf32>
    %55 = math.tanh %54 : vector<8x384xf32>
    %cst_39 = arith.constant 5.000000e-01 : f32
    %56 = vector.broadcast %cst_39 : f32 to vector<8x384xf32>
    %57 = arith.mulf %56, %55 : vector<8x384xf32>
    %cst_40 = arith.constant 5.000000e-01 : f32
    %58 = vector.broadcast %cst_40 : f32 to vector<8x384xf32>
    %59 = arith.addf %57, %58 : vector<8x384xf32>
    %60 = vector.extract_strided_slice %51 {offsets = [0, 384], sizes = [8, 128], strides = [1, 1]} : vector<8x512xf32> to vector<8x128xf32>
    %61 = math.tanh %60 : vector<8x128xf32>
    %62 = vector.extract_strided_slice %59 {offsets = [0, 0], sizes = [8, 128], strides = [1, 1]} : vector<8x384xf32> to vector<8x128xf32>
    %63 = vector.extract_strided_slice %59 {offsets = [0, 128], sizes = [8, 128], strides = [1, 1]} : vector<8x384xf32> to vector<8x128xf32>
    %64 = vector.extract_strided_slice %59 {offsets = [0, 256], sizes = [8, 128], strides = [1, 1]} : vector<8x384xf32> to vector<8x128xf32>
    %65 = arith.mulf %63, %45 : vector<8x128xf32>
    %66 = arith.mulf %62, %61 : vector<8x128xf32>
    %67 = arith.addf %65, %66 : vector<8x128xf32>
    %68 = math.tanh %67 : vector<8x128xf32>
    %69 = arith.mulf %64, %68 : vector<8x128xf32>
    %c0_41 = arith.constant 0 : index
    %c0_42 = arith.constant 0 : index
    %70 = vector.load %arg12[%c0_41, %c0_42] : memref<8x128xf32, #tpu.memory_space<vmem>>, vector<8x128xf32>
    tpu.vector_store %arg12[%c0_41, %c0_42], %69 {strides = array<i32>} : memref<8x128xf32, #tpu.memory_space<vmem>>, vector<8x128xf32>,
    %c0_43 = arith.constant 0 : index
    %c0_44 = arith.constant 0 : index
    %71 = vector.load %arg13[%c0_43, %c0_44] : memref<8x128xf32, #tpu.memory_space<vmem>>, vector<8x128xf32>
    tpu.vector_store %arg13[%c0_43, %c0_44], %67 {strides = array<i32>} : memref<8x128xf32, #tpu.memory_space<vmem>>, vector<8x128xf32>,
    %72 = arith.index_cast %c1_i32 : i32 to index
    %c0_45 = arith.constant 0 : index
    %c0_46 = arith.constant 0 : index
    %73 = vector.load %arg8[%72, %c0_45, %c0_46] : memref<8x8x128xf32, #tpu.memory_space<vmem>>, vector<1x8x128xf32>
    %74 = vector.shape_cast %73 : vector<1x8x128xf32> to vector<8x128xf32>
    %75 = vector.shape_cast %69 : vector<8x128xf32> to vector<1x8x128xf32>
    tpu.vector_store %arg8[%72, %c0_45, %c0_46], %75 {strides = array<i32>} : memref<8x8x128xf32, #tpu.memory_space<vmem>>, vector<1x8x128xf32>,
    %c2_i32 = arith.constant 2 : i32
    %c0_47 = arith.constant 0 : index
    %c0_48 = arith.constant 0 : index
    %76 = vector.load %arg12[%c0_47, %c0_48] : memref<8x128xf32, #tpu.memory_space<vmem>>, vector<8x128xf32>
    %c0_49 = arith.constant 0 : index
    %c0_50 = arith.constant 0 : index
    %77 = vector.load %arg13[%c0_49, %c0_50] : memref<8x128xf32, #tpu.memory_space<vmem>>, vector<8x128xf32>
    %78 = arith.index_cast %c2_i32 : i32 to index
    %c0_51 = arith.constant 0 : index
    %c0_52 = arith.constant 0 : index
    %79 = vector.load %arg11[%78, %c0_51, %c0_52] : memref<8x8x512xf32, #tpu.memory_space<vmem>>, vector<1x8x512xf32>
    %80 = vector.shape_cast %79 : vector<1x8x512xf32> to vector<8x512xf32>
    %c0_53 = arith.constant 0 : index
    %c0_54 = arith.constant 0 : index
    %81 = vector.load %arg6[%c0_53, %c0_54] : memref<128x512xf32, #tpu.memory_space<vmem>>, vector<128x512xf32>
    %cst_55 = arith.constant dense<0.000000e+00> : vector<8x512xf32>
    %82 = tpu.matmul %76, %81, %cst_55 {dimension_numbers = #tpu.dot_dimension_numbers<[1], [0], [0], [1], [0, 0, 1, 1], [], []>} : vector<8x128xf32>, vector<128x512xf32>, vector<8x512xf32> -> vector<8x512xf32>
    %83 = arith.addf %80, %82 : vector<8x512xf32>
    %84 = vector.extract_strided_slice %83 {offsets = [0, 0], sizes = [8, 384], strides = [1, 1]} : vector<8x512xf32> to vector<8x384xf32>
    %cst_56 = arith.constant 5.000000e-01 : f32
    %85 = vector.broadcast %cst_56 : f32 to vector<8x384xf32>
    %86 = arith.mulf %85, %84 : vector<8x384xf32>
    %87 = math.tanh %86 : vector<8x384xf32>
    %cst_57 = arith.constant 5.000000e-01 : f32
    %88 = vector.broadcast %cst_57 : f32 to vector<8x384xf32>
    %89 = arith.mulf %88, %87 : vector<8x384xf32>
    %cst_58 = arith.constant 5.000000e-01 : f32
    %90 = vector.broadcast %cst_58 : f32 to vector<8x384xf32>
    %91 = arith.addf %89, %90 : vector<8x384xf32>
    %92 = vector.extract_strided_slice %83 {offsets = [0, 384], sizes = [8, 128], strides = [1, 1]} : vector<8x512xf32> to vector<8x128xf32>
    %93 = math.tanh %92 : vector<8x128xf32>
    %94 = vector.extract_strided_slice %91 {offsets = [0, 0], sizes = [8, 128], strides = [1, 1]} : vector<8x384xf32> to vector<8x128xf32>
    %95 = vector.extract_strided_slice %91 {offsets = [0, 128], sizes = [8, 128], strides = [1, 1]} : vector<8x384xf32> to vector<8x128xf32>
    %96 = vector.extract_strided_slice %91 {offsets = [0, 256], sizes = [8, 128], strides = [1, 1]} : vector<8x384xf32> to vector<8x128xf32>
    %97 = arith.mulf %95, %77 : vector<8x128xf32>
    %98 = arith.mulf %94, %93 : vector<8x128xf32>
    %99 = arith.addf %97, %98 : vector<8x128xf32>
    %100 = math.tanh %99 : vector<8x128xf32>
    %101 = arith.mulf %96, %100 : vector<8x128xf32>
    %c0_59 = arith.constant 0 : index
    %c0_60 = arith.constant 0 : index
    %102 = vector.load %arg12[%c0_59, %c0_60] : memref<8x128xf32, #tpu.memory_space<vmem>>, vector<8x128xf32>
    tpu.vector_store %arg12[%c0_59, %c0_60], %101 {strides = array<i32>} : memref<8x128xf32, #tpu.memory_space<vmem>>, vector<8x128xf32>,
    %c0_61 = arith.constant 0 : index
    %c0_62 = arith.constant 0 : index
    %103 = vector.load %arg13[%c0_61, %c0_62] : memref<8x128xf32, #tpu.memory_space<vmem>>, vector<8x128xf32>
    tpu.vector_store %arg13[%c0_61, %c0_62], %99 {strides = array<i32>} : memref<8x128xf32, #tpu.memory_space<vmem>>, vector<8x128xf32>,
    %104 = arith.index_cast %c2_i32 : i32 to index
    %c0_63 = arith.constant 0 : index
    %c0_64 = arith.constant 0 : index
    %105 = vector.load %arg8[%104, %c0_63, %c0_64] : memref<8x8x128xf32, #tpu.memory_space<vmem>>, vector<1x8x128xf32>
    %106 = vector.shape_cast %105 : vector<1x8x128xf32> to vector<8x128xf32>
    %107 = vector.shape_cast %101 : vector<8x128xf32> to vector<1x8x128xf32>
    tpu.vector_store %arg8[%104, %c0_63, %c0_64], %107 {strides = array<i32>} : memref<8x8x128xf32, #tpu.memory_space<vmem>>, vector<1x8x128xf32>,
    %c3_i32 = arith.constant 3 : i32
    %c0_65 = arith.constant 0 : index
    %c0_66 = arith.constant 0 : index
    %108 = vector.load %arg12[%c0_65, %c0_66] : memref<8x128xf32, #tpu.memory_space<vmem>>, vector<8x128xf32>
    %c0_67 = arith.constant 0 : index
    %c0_68 = arith.constant 0 : index
    %109 = vector.load %arg13[%c0_67, %c0_68] : memref<8x128xf32, #tpu.memory_space<vmem>>, vector<8x128xf32>
    %110 = arith.index_cast %c3_i32 : i32 to index
    %c0_69 = arith.constant 0 : index
    %c0_70 = arith.constant 0 : index
    %111 = vector.load %arg11[%110, %c0_69, %c0_70] : memref<8x8x512xf32, #tpu.memory_space<vmem>>, vector<1x8x512xf32>
    %112 = vector.shape_cast %111 : vector<1x8x512xf32> to vector<8x512xf32>
    %c0_71 = arith.constant 0 : index
    %c0_72 = arith.constant 0 : index
    %113 = vector.load %arg6[%c0_71, %c0_72] : memref<128x512xf32, #tpu.memory_space<vmem>>, vector<128x512xf32>
    %cst_73 = arith.constant dense<0.000000e+00> : vector<8x512xf32>
    %114 = tpu.matmul %108, %113, %cst_73 {dimension_numbers = #tpu.dot_dimension_numbers<[1], [0], [0], [1], [0, 0, 1, 1], [], []>} : vector<8x128xf32>, vector<128x512xf32>, vector<8x512xf32> -> vector<8x512xf32>
    %115 = arith.addf %112, %114 : vector<8x512xf32>
    %116 = vector.extract_strided_slice %115 {offsets = [0, 0], sizes = [8, 384], strides = [1, 1]} : vector<8x512xf32> to vector<8x384xf32>
    %cst_74 = arith.constant 5.000000e-01 : f32
    %117 = vector.broadcast %cst_74 : f32 to vector<8x384xf32>
    %118 = arith.mulf %117, %116 : vector<8x384xf32>
    %119 = math.tanh %118 : vector<8x384xf32>
    %cst_75 = arith.constant 5.000000e-01 : f32
    %120 = vector.broadcast %cst_75 : f32 to vector<8x384xf32>
    %121 = arith.mulf %120, %119 : vector<8x384xf32>
    %cst_76 = arith.constant 5.000000e-01 : f32
    %122 = vector.broadcast %cst_76 : f32 to vector<8x384xf32>
    %123 = arith.addf %121, %122 : vector<8x384xf32>
    %124 = vector.extract_strided_slice %115 {offsets = [0, 384], sizes = [8, 128], strides = [1, 1]} : vector<8x512xf32> to vector<8x128xf32>
    %125 = math.tanh %124 : vector<8x128xf32>
    %126 = vector.extract_strided_slice %123 {offsets = [0, 0], sizes = [8, 128], strides = [1, 1]} : vector<8x384xf32> to vector<8x128xf32>
    %127 = vector.extract_strided_slice %123 {offsets = [0, 128], sizes = [8, 128], strides = [1, 1]} : vector<8x384xf32> to vector<8x128xf32>
    %128 = vector.extract_strided_slice %123 {offsets = [0, 256], sizes = [8, 128], strides = [1, 1]} : vector<8x384xf32> to vector<8x128xf32>
    %129 = arith.mulf %127, %109 : vector<8x128xf32>
    %130 = arith.mulf %126, %125 : vector<8x128xf32>
    %131 = arith.addf %129, %130 : vector<8x128xf32>
    %132 = math.tanh %131 : vector<8x128xf32>
    %133 = arith.mulf %128, %132 : vector<8x128xf32>
    %c0_77 = arith.constant 0 : index
    %c0_78 = arith.constant 0 : index
    %134 = vector.load %arg12[%c0_77, %c0_78] : memref<8x128xf32, #tpu.memory_space<vmem>>, vector<8x128xf32>
    tpu.vector_store %arg12[%c0_77, %c0_78], %133 {strides = array<i32>} : memref<8x128xf32, #tpu.memory_space<vmem>>, vector<8x128xf32>,
    %c0_79 = arith.constant 0 : index
    %c0_80 = arith.constant 0 : index
    %135 = vector.load %arg13[%c0_79, %c0_80] : memref<8x128xf32, #tpu.memory_space<vmem>>, vector<8x128xf32>
    tpu.vector_store %arg13[%c0_79, %c0_80], %131 {strides = array<i32>} : memref<8x128xf32, #tpu.memory_space<vmem>>, vector<8x128xf32>,
    %136 = arith.index_cast %c3_i32 : i32 to index
    %c0_81 = arith.constant 0 : index
    %c0_82 = arith.constant 0 : index
    %137 = vector.load %arg8[%136, %c0_81, %c0_82] : memref<8x8x128xf32, #tpu.memory_space<vmem>>, vector<1x8x128xf32>
    %138 = vector.shape_cast %137 : vector<1x8x128xf32> to vector<8x128xf32>
    %139 = vector.shape_cast %133 : vector<8x128xf32> to vector<1x8x128xf32>
    tpu.vector_store %arg8[%136, %c0_81, %c0_82], %139 {strides = array<i32>} : memref<8x8x128xf32, #tpu.memory_space<vmem>>, vector<1x8x128xf32>,
    %c4_i32 = arith.constant 4 : i32
    %c0_83 = arith.constant 0 : index
    %c0_84 = arith.constant 0 : index
    %140 = vector.load %arg12[%c0_83, %c0_84] : memref<8x128xf32, #tpu.memory_space<vmem>>, vector<8x128xf32>
    %c0_85 = arith.constant 0 : index
    %c0_86 = arith.constant 0 : index
    %141 = vector.load %arg13[%c0_85, %c0_86] : memref<8x128xf32, #tpu.memory_space<vmem>>, vector<8x128xf32>
    %142 = arith.index_cast %c4_i32 : i32 to index
    %c0_87 = arith.constant 0 : index
    %c0_88 = arith.constant 0 : index
    %143 = vector.load %arg11[%142, %c0_87, %c0_88] : memref<8x8x512xf32, #tpu.memory_space<vmem>>, vector<1x8x512xf32>
    %144 = vector.shape_cast %143 : vector<1x8x512xf32> to vector<8x512xf32>
    %c0_89 = arith.constant 0 : index
    %c0_90 = arith.constant 0 : index
    %145 = vector.load %arg6[%c0_89, %c0_90] : memref<128x512xf32, #tpu.memory_space<vmem>>, vector<128x512xf32>
    %cst_91 = arith.constant dense<0.000000e+00> : vector<8x512xf32>
    %146 = tpu.matmul %140, %145, %cst_91 {dimension_numbers = #tpu.dot_dimension_numbers<[1], [0], [0], [1], [0, 0, 1, 1], [], []>} : vector<8x128xf32>, vector<128x512xf32>, vector<8x512xf32> -> vector<8x512xf32>
    %147 = arith.addf %144, %146 : vector<8x512xf32>
    %148 = vector.extract_strided_slice %147 {offsets = [0, 0], sizes = [8, 384], strides = [1, 1]} : vector<8x512xf32> to vector<8x384xf32>
    %cst_92 = arith.constant 5.000000e-01 : f32
    %149 = vector.broadcast %cst_92 : f32 to vector<8x384xf32>
    %150 = arith.mulf %149, %148 : vector<8x384xf32>
    %151 = math.tanh %150 : vector<8x384xf32>
    %cst_93 = arith.constant 5.000000e-01 : f32
    %152 = vector.broadcast %cst_93 : f32 to vector<8x384xf32>
    %153 = arith.mulf %152, %151 : vector<8x384xf32>
    %cst_94 = arith.constant 5.000000e-01 : f32
    %154 = vector.broadcast %cst_94 : f32 to vector<8x384xf32>
    %155 = arith.addf %153, %154 : vector<8x384xf32>
    %156 = vector.extract_strided_slice %147 {offsets = [0, 384], sizes = [8, 128], strides = [1, 1]} : vector<8x512xf32> to vector<8x128xf32>
    %157 = math.tanh %156 : vector<8x128xf32>
    %158 = vector.extract_strided_slice %155 {offsets = [0, 0], sizes = [8, 128], strides = [1, 1]} : vector<8x384xf32> to vector<8x128xf32>
    %159 = vector.extract_strided_slice %155 {offsets = [0, 128], sizes = [8, 128], strides = [1, 1]} : vector<8x384xf32> to vector<8x128xf32>
    %160 = vector.extract_strided_slice %155 {offsets = [0, 256], sizes = [8, 128], strides = [1, 1]} : vector<8x384xf32> to vector<8x128xf32>
    %161 = arith.mulf %159, %141 : vector<8x128xf32>
    %162 = arith.mulf %158, %157 : vector<8x128xf32>
    %163 = arith.addf %161, %162 : vector<8x128xf32>
    %164 = math.tanh %163 : vector<8x128xf32>
    %165 = arith.mulf %160, %164 : vector<8x128xf32>
    %c0_95 = arith.constant 0 : index
    %c0_96 = arith.constant 0 : index
    %166 = vector.load %arg12[%c0_95, %c0_96] : memref<8x128xf32, #tpu.memory_space<vmem>>, vector<8x128xf32>
    tpu.vector_store %arg12[%c0_95, %c0_96], %165 {strides = array<i32>} : memref<8x128xf32, #tpu.memory_space<vmem>>, vector<8x128xf32>,
    %c0_97 = arith.constant 0 : index
    %c0_98 = arith.constant 0 : index
    %167 = vector.load %arg13[%c0_97, %c0_98] : memref<8x128xf32, #tpu.memory_space<vmem>>, vector<8x128xf32>
    tpu.vector_store %arg13[%c0_97, %c0_98], %163 {strides = array<i32>} : memref<8x128xf32, #tpu.memory_space<vmem>>, vector<8x128xf32>,
    %168 = arith.index_cast %c4_i32 : i32 to index
    %c0_99 = arith.constant 0 : index
    %c0_100 = arith.constant 0 : index
    %169 = vector.load %arg8[%168, %c0_99, %c0_100] : memref<8x8x128xf32, #tpu.memory_space<vmem>>, vector<1x8x128xf32>
    %170 = vector.shape_cast %169 : vector<1x8x128xf32> to vector<8x128xf32>
    %171 = vector.shape_cast %165 : vector<8x128xf32> to vector<1x8x128xf32>
    tpu.vector_store %arg8[%168, %c0_99, %c0_100], %171 {strides = array<i32>} : memref<8x8x128xf32, #tpu.memory_space<vmem>>, vector<1x8x128xf32>,
    %c5_i32 = arith.constant 5 : i32
    %c0_101 = arith.constant 0 : index
    %c0_102 = arith.constant 0 : index
    %172 = vector.load %arg12[%c0_101, %c0_102] : memref<8x128xf32, #tpu.memory_space<vmem>>, vector<8x128xf32>
    %c0_103 = arith.constant 0 : index
    %c0_104 = arith.constant 0 : index
    %173 = vector.load %arg13[%c0_103, %c0_104] : memref<8x128xf32, #tpu.memory_space<vmem>>, vector<8x128xf32>
    %174 = arith.index_cast %c5_i32 : i32 to index
    %c0_105 = arith.constant 0 : index
    %c0_106 = arith.constant 0 : index
    %175 = vector.load %arg11[%174, %c0_105, %c0_106] : memref<8x8x512xf32, #tpu.memory_space<vmem>>, vector<1x8x512xf32>
    %176 = vector.shape_cast %175 : vector<1x8x512xf32> to vector<8x512xf32>
    %c0_107 = arith.constant 0 : index
    %c0_108 = arith.constant 0 : index
    %177 = vector.load %arg6[%c0_107, %c0_108] : memref<128x512xf32, #tpu.memory_space<vmem>>, vector<128x512xf32>
    %cst_109 = arith.constant dense<0.000000e+00> : vector<8x512xf32>
    %178 = tpu.matmul %172, %177, %cst_109 {dimension_numbers = #tpu.dot_dimension_numbers<[1], [0], [0], [1], [0, 0, 1, 1], [], []>} : vector<8x128xf32>, vector<128x512xf32>, vector<8x512xf32> -> vector<8x512xf32>
    %179 = arith.addf %176, %178 : vector<8x512xf32>
    %180 = vector.extract_strided_slice %179 {offsets = [0, 0], sizes = [8, 384], strides = [1, 1]} : vector<8x512xf32> to vector<8x384xf32>
    %cst_110 = arith.constant 5.000000e-01 : f32
    %181 = vector.broadcast %cst_110 : f32 to vector<8x384xf32>
    %182 = arith.mulf %181, %180 : vector<8x384xf32>
    %183 = math.tanh %182 : vector<8x384xf32>
    %cst_111 = arith.constant 5.000000e-01 : f32
    %184 = vector.broadcast %cst_111 : f32 to vector<8x384xf32>
    %185 = arith.mulf %184, %183 : vector<8x384xf32>
    %cst_112 = arith.constant 5.000000e-01 : f32
    %186 = vector.broadcast %cst_112 : f32 to vector<8x384xf32>
    %187 = arith.addf %185, %186 : vector<8x384xf32>
    %188 = vector.extract_strided_slice %179 {offsets = [0, 384], sizes = [8, 128], strides = [1, 1]} : vector<8x512xf32> to vector<8x128xf32>
    %189 = math.tanh %188 : vector<8x128xf32>
    %190 = vector.extract_strided_slice %187 {offsets = [0, 0], sizes = [8, 128], strides = [1, 1]} : vector<8x384xf32> to vector<8x128xf32>
    %191 = vector.extract_strided_slice %187 {offsets = [0, 128], sizes = [8, 128], strides = [1, 1]} : vector<8x384xf32> to vector<8x128xf32>
    %192 = vector.extract_strided_slice %187 {offsets = [0, 256], sizes = [8, 128], strides = [1, 1]} : vector<8x384xf32> to vector<8x128xf32>
    %193 = arith.mulf %191, %173 : vector<8x128xf32>
    %194 = arith.mulf %190, %189 : vector<8x128xf32>
    %195 = arith.addf %193, %194 : vector<8x128xf32>
    %196 = math.tanh %195 : vector<8x128xf32>
    %197 = arith.mulf %192, %196 : vector<8x128xf32>
    %c0_113 = arith.constant 0 : index
    %c0_114 = arith.constant 0 : index
    %198 = vector.load %arg12[%c0_113, %c0_114] : memref<8x128xf32, #tpu.memory_space<vmem>>, vector<8x128xf32>
    tpu.vector_store %arg12[%c0_113, %c0_114], %197 {strides = array<i32>} : memref<8x128xf32, #tpu.memory_space<vmem>>, vector<8x128xf32>,
    %c0_115 = arith.constant 0 : index
    %c0_116 = arith.constant 0 : index
    %199 = vector.load %arg13[%c0_115, %c0_116] : memref<8x128xf32, #tpu.memory_space<vmem>>, vector<8x128xf32>
    tpu.vector_store %arg13[%c0_115, %c0_116], %195 {strides = array<i32>} : memref<8x128xf32, #tpu.memory_space<vmem>>, vector<8x128xf32>,
    %200 = arith.index_cast %c5_i32 : i32 to index
    %c0_117 = arith.constant 0 : index
    %c0_118 = arith.constant 0 : index
    %201 = vector.load %arg8[%200, %c0_117, %c0_118] : memref<8x8x128xf32, #tpu.memory_space<vmem>>, vector<1x8x128xf32>
    %202 = vector.shape_cast %201 : vector<1x8x128xf32> to vector<8x128xf32>
    %203 = vector.shape_cast %197 : vector<8x128xf32> to vector<1x8x128xf32>
    tpu.vector_store %arg8[%200, %c0_117, %c0_118], %203 {strides = array<i32>} : memref<8x8x128xf32, #tpu.memory_space<vmem>>, vector<1x8x128xf32>,
    %c6_i32 = arith.constant 6 : i32
    %c0_119 = arith.constant 0 : index
    %c0_120 = arith.constant 0 : index
    %204 = vector.load %arg12[%c0_119, %c0_120] : memref<8x128xf32, #tpu.memory_space<vmem>>, vector<8x128xf32>
    %c0_121 = arith.constant 0 : index
    %c0_122 = arith.constant 0 : index
    %205 = vector.load %arg13[%c0_121, %c0_122] : memref<8x128xf32, #tpu.memory_space<vmem>>, vector<8x128xf32>
    %206 = arith.index_cast %c6_i32 : i32 to index
    %c0_123 = arith.constant 0 : index
    %c0_124 = arith.constant 0 : index
    %207 = vector.load %arg11[%206, %c0_123, %c0_124] : memref<8x8x512xf32, #tpu.memory_space<vmem>>, vector<1x8x512xf32>
    %208 = vector.shape_cast %207 : vector<1x8x512xf32> to vector<8x512xf32>
    %c0_125 = arith.constant 0 : index
    %c0_126 = arith.constant 0 : index
    %209 = vector.load %arg6[%c0_125, %c0_126] : memref<128x512xf32, #tpu.memory_space<vmem>>, vector<128x512xf32>
    %cst_127 = arith.constant dense<0.000000e+00> : vector<8x512xf32>
    %210 = tpu.matmul %204, %209, %cst_127 {dimension_numbers = #tpu.dot_dimension_numbers<[1], [0], [0], [1], [0, 0, 1, 1], [], []>} : vector<8x128xf32>, vector<128x512xf32>, vector<8x512xf32> -> vector<8x512xf32>
    %211 = arith.addf %208, %210 : vector<8x512xf32>
    %212 = vector.extract_strided_slice %211 {offsets = [0, 0], sizes = [8, 384], strides = [1, 1]} : vector<8x512xf32> to vector<8x384xf32>
    %cst_128 = arith.constant 5.000000e-01 : f32
    %213 = vector.broadcast %cst_128 : f32 to vector<8x384xf32>
    %214 = arith.mulf %213, %212 : vector<8x384xf32>
    %215 = math.tanh %214 : vector<8x384xf32>
    %cst_129 = arith.constant 5.000000e-01 : f32
    %216 = vector.broadcast %cst_129 : f32 to vector<8x384xf32>
    %217 = arith.mulf %216, %215 : vector<8x384xf32>
    %cst_130 = arith.constant 5.000000e-01 : f32
    %218 = vector.broadcast %cst_130 : f32 to vector<8x384xf32>
    %219 = arith.addf %217, %218 : vector<8x384xf32>
    %220 = vector.extract_strided_slice %211 {offsets = [0, 384], sizes = [8, 128], strides = [1, 1]} : vector<8x512xf32> to vector<8x128xf32>
    %221 = math.tanh %220 : vector<8x128xf32>
    %222 = vector.extract_strided_slice %219 {offsets = [0, 0], sizes = [8, 128], strides = [1, 1]} : vector<8x384xf32> to vector<8x128xf32>
    %223 = vector.extract_strided_slice %219 {offsets = [0, 128], sizes = [8, 128], strides = [1, 1]} : vector<8x384xf32> to vector<8x128xf32>
    %224 = vector.extract_strided_slice %219 {offsets = [0, 256], sizes = [8, 128], strides = [1, 1]} : vector<8x384xf32> to vector<8x128xf32>
    %225 = arith.mulf %223, %205 : vector<8x128xf32>
    %226 = arith.mulf %222, %221 : vector<8x128xf32>
    %227 = arith.addf %225, %226 : vector<8x128xf32>
    %228 = math.tanh %227 : vector<8x128xf32>
    %229 = arith.mulf %224, %228 : vector<8x128xf32>
    %c0_131 = arith.constant 0 : index
    %c0_132 = arith.constant 0 : index
    %230 = vector.load %arg12[%c0_131, %c0_132] : memref<8x128xf32, #tpu.memory_space<vmem>>, vector<8x128xf32>
    tpu.vector_store %arg12[%c0_131, %c0_132], %229 {strides = array<i32>} : memref<8x128xf32, #tpu.memory_space<vmem>>, vector<8x128xf32>,
    %c0_133 = arith.constant 0 : index
    %c0_134 = arith.constant 0 : index
    %231 = vector.load %arg13[%c0_133, %c0_134] : memref<8x128xf32, #tpu.memory_space<vmem>>, vector<8x128xf32>
    tpu.vector_store %arg13[%c0_133, %c0_134], %227 {strides = array<i32>} : memref<8x128xf32, #tpu.memory_space<vmem>>, vector<8x128xf32>,
    %232 = arith.index_cast %c6_i32 : i32 to index
    %c0_135 = arith.constant 0 : index
    %c0_136 = arith.constant 0 : index
    %233 = vector.load %arg8[%232, %c0_135, %c0_136] : memref<8x8x128xf32, #tpu.memory_space<vmem>>, vector<1x8x128xf32>
    %234 = vector.shape_cast %233 : vector<1x8x128xf32> to vector<8x128xf32>
    %235 = vector.shape_cast %229 : vector<8x128xf32> to vector<1x8x128xf32>
    tpu.vector_store %arg8[%232, %c0_135, %c0_136], %235 {strides = array<i32>} : memref<8x8x128xf32, #tpu.memory_space<vmem>>, vector<1x8x128xf32>,
    %c7_i32 = arith.constant 7 : i32
    %c0_137 = arith.constant 0 : index
    %c0_138 = arith.constant 0 : index
    %236 = vector.load %arg12[%c0_137, %c0_138] : memref<8x128xf32, #tpu.memory_space<vmem>>, vector<8x128xf32>
    %c0_139 = arith.constant 0 : index
    %c0_140 = arith.constant 0 : index
    %237 = vector.load %arg13[%c0_139, %c0_140] : memref<8x128xf32, #tpu.memory_space<vmem>>, vector<8x128xf32>
    %238 = arith.index_cast %c7_i32 : i32 to index
    %c0_141 = arith.constant 0 : index
    %c0_142 = arith.constant 0 : index
    %239 = vector.load %arg11[%238, %c0_141, %c0_142] : memref<8x8x512xf32, #tpu.memory_space<vmem>>, vector<1x8x512xf32>
    %240 = vector.shape_cast %239 : vector<1x8x512xf32> to vector<8x512xf32>
    %c0_143 = arith.constant 0 : index
    %c0_144 = arith.constant 0 : index
    %241 = vector.load %arg6[%c0_143, %c0_144] : memref<128x512xf32, #tpu.memory_space<vmem>>, vector<128x512xf32>
    %cst_145 = arith.constant dense<0.000000e+00> : vector<8x512xf32>
    %242 = tpu.matmul %236, %241, %cst_145 {dimension_numbers = #tpu.dot_dimension_numbers<[1], [0], [0], [1], [0, 0, 1, 1], [], []>} : vector<8x128xf32>, vector<128x512xf32>, vector<8x512xf32> -> vector<8x512xf32>
    %243 = arith.addf %240, %242 : vector<8x512xf32>
    %244 = vector.extract_strided_slice %243 {offsets = [0, 0], sizes = [8, 384], strides = [1, 1]} : vector<8x512xf32> to vector<8x384xf32>
    %cst_146 = arith.constant 5.000000e-01 : f32
    %245 = vector.broadcast %cst_146 : f32 to vector<8x384xf32>
    %246 = arith.mulf %245, %244 : vector<8x384xf32>
    %247 = math.tanh %246 : vector<8x384xf32>
    %cst_147 = arith.constant 5.000000e-01 : f32
    %248 = vector.broadcast %cst_147 : f32 to vector<8x384xf32>
    %249 = arith.mulf %248, %247 : vector<8x384xf32>
    %cst_148 = arith.constant 5.000000e-01 : f32
    %250 = vector.broadcast %cst_148 : f32 to vector<8x384xf32>
    %251 = arith.addf %249, %250 : vector<8x384xf32>
    %252 = vector.extract_strided_slice %243 {offsets = [0, 384], sizes = [8, 128], strides = [1, 1]} : vector<8x512xf32> to vector<8x128xf32>
    %253 = math.tanh %252 : vector<8x128xf32>
    %254 = vector.extract_strided_slice %251 {offsets = [0, 0], sizes = [8, 128], strides = [1, 1]} : vector<8x384xf32> to vector<8x128xf32>
    %255 = vector.extract_strided_slice %251 {offsets = [0, 128], sizes = [8, 128], strides = [1, 1]} : vector<8x384xf32> to vector<8x128xf32>
    %256 = vector.extract_strided_slice %251 {offsets = [0, 256], sizes = [8, 128], strides = [1, 1]} : vector<8x384xf32> to vector<8x128xf32>
    %257 = arith.mulf %255, %237 : vector<8x128xf32>
    %258 = arith.mulf %254, %253 : vector<8x128xf32>
    %259 = arith.addf %257, %258 : vector<8x128xf32>
    %260 = math.tanh %259 : vector<8x128xf32>
    %261 = arith.mulf %256, %260 : vector<8x128xf32>
    %c0_149 = arith.constant 0 : index
    %c0_150 = arith.constant 0 : index
    %262 = vector.load %arg12[%c0_149, %c0_150] : memref<8x128xf32, #tpu.memory_space<vmem>>, vector<8x128xf32>
    tpu.vector_store %arg12[%c0_149, %c0_150], %261 {strides = array<i32>} : memref<8x128xf32, #tpu.memory_space<vmem>>, vector<8x128xf32>,
    %c0_151 = arith.constant 0 : index
    %c0_152 = arith.constant 0 : index
    %263 = vector.load %arg13[%c0_151, %c0_152] : memref<8x128xf32, #tpu.memory_space<vmem>>, vector<8x128xf32>
    tpu.vector_store %arg13[%c0_151, %c0_152], %259 {strides = array<i32>} : memref<8x128xf32, #tpu.memory_space<vmem>>, vector<8x128xf32>,
    %264 = arith.index_cast %c7_i32 : i32 to index
    %c0_153 = arith.constant 0 : index
    %c0_154 = arith.constant 0 : index
    %265 = vector.load %arg8[%264, %c0_153, %c0_154] : memref<8x8x128xf32, #tpu.memory_space<vmem>>, vector<1x8x128xf32>
    %266 = vector.shape_cast %265 : vector<1x8x128xf32> to vector<8x128xf32>
    %267 = vector.shape_cast %261 : vector<8x128xf32> to vector<1x8x128xf32>
    tpu.vector_store %arg8[%264, %c0_153, %c0_154], %267 {strides = array<i32>} : memref<8x8x128xf32, #tpu.memory_space<vmem>>, vector<1x8x128xf32>,
    %c8_i32 = arith.constant 8 : i32
    %c0_155 = arith.constant 0 : index
    %c0_156 = arith.constant 0 : index
    %268 = vector.load %arg12[%c0_155, %c0_156] : memref<8x128xf32, #tpu.memory_space<vmem>>, vector<8x128xf32>
    %c0_157 = arith.constant 0 : index
    %c0_158 = arith.constant 0 : index
    %269 = vector.load %arg9[%c0_157, %c0_158] : memref<8x128xf32, #tpu.memory_space<vmem>>, vector<8x128xf32>
    tpu.vector_store %arg9[%c0_157, %c0_158], %268 {strides = array<i32>} : memref<8x128xf32, #tpu.memory_space<vmem>>, vector<8x128xf32>,
    %c0_159 = arith.constant 0 : index
    %c0_160 = arith.constant 0 : index
    %270 = vector.load %arg13[%c0_159, %c0_160] : memref<8x128xf32, #tpu.memory_space<vmem>>, vector<8x128xf32>
    %c0_161 = arith.constant 0 : index
    %c0_162 = arith.constant 0 : index
    %271 = vector.load %arg10[%c0_161, %c0_162] : memref<8x128xf32, #tpu.memory_space<vmem>>, vector<8x128xf32>
    tpu.vector_store %arg10[%c0_161, %c0_162], %270 {strides = array<i32>} : memref<8x128xf32, #tpu.memory_space<vmem>>, vector<8x128xf32>,
    return
  }
  func.func @transform_0(%arg0: i32, %arg1: i32) -> (i32, i32) {
    %c0_i32 = arith.constant 0 : i32
    %c0_i32_0 = arith.constant 0 : i32
    return %arg0, %c0_i32 : i32, i32
  }
  func.func @transform_1(%arg0: i32, %arg1: i32) -> (i32, i32) {
    %c0_i32 = arith.constant 0 : i32
    %c0_i32_0 = arith.constant 0 : i32
    return %arg0, %c0_i32 : i32, i32
  }
  func.func @transform_2(%arg0: i32, %arg1: i32) -> (i32, i32, i32) {
    %c0_i32 = arith.constant 0 : i32
    %c0_i32_0 = arith.constant 0 : i32
    return %arg1, %arg0, %c0_i32 : i32, i32, i32
  }
  func.func @transform_3(%arg0: i32, %arg1: i32) -> (i32, i32) {
    %c0_i32 = arith.constant 0 : i32
    %c0_i32_0 = arith.constant 0 : i32
    %c0_i32_1 = arith.constant 0 : i32
    return %c0_i32, %c0_i32_0 : i32, i32
  }
  func.func @transform_4(%arg0: i32, %arg1: i32) -> (i32, i32) {
    %c0_i32 = arith.constant 0 : i32
    %c0_i32_0 = arith.constant 0 : i32
    %c0_i32_1 = arith.constant 0 : i32
    return %c0_i32, %c0_i32_0 : i32, i32
  }
  func.func @transform_5(%arg0: i32, %arg1: i32) -> (i32, i32) {
    %c0_i32 = arith.constant 0 : i32
    %c0_i32_0 = arith.constant 0 : i32
    %c0_i32_1 = arith.constant 0 : i32
    return %c0_i32, %c0_i32_0 : i32, i32
  }
  func.func @transform_6(%arg0: i32, %arg1: i32) -> (i32, i32, i32) {
    %c0_i32 = arith.constant 0 : i32
    %c0_i32_0 = arith.constant 0 : i32
    return %arg1, %arg0, %c0_i32 : i32, i32, i32
  }
  func.func @transform_7(%arg0: i32, %arg1: i32) -> (i32, i32) {
    %c0_i32 = arith.constant 0 : i32
    %c0_i32_0 = arith.constant 0 : i32
    return %arg0, %c0_i32 : i32, i32
  }
  func.func @transform_8(%arg0: i32, %arg1: i32) -> (i32, i32) {
    %c0_i32 = arith.constant 0 : i32
    %c0_i32_0 = arith.constant 0 : i32
    return %arg0, %c0_i32 : i32, i32
  }
}

</mosaic_0001>

<bundles_post_ra>
// kernel: _lambda_.5
= control target key start
LH: loop header
LB: loop body
LE: loop exit
PB: predicated region body
PF: predicated region fallthrough
CT: control target
= control target key end

     0   :  { %s406_s1 = inlined_call_operand.vmem [shape: f32[128,128], index: 1, kind: input, shape index: {}]   ;;  %s407_s0 = inlined_call_operand.vmem [shape: f32[64,128], index: 0, kind: input, shape index: {}]   ;;  %s408_s2 = inlined_call_operand.vmem [shape: f32[1,128], index: 2, kind: input, shape index: {}]   ;;  %s409_s3 = inlined_call_operand.vmem [shape: f32[64,128], index: 3, kind: output, shape index: {}]  }
   0x1   :  { %v22_v0 = vld [vmem:[%s406_s1] sm:$0xff]  ;;  %v23_v1 = vld [vmem:[%s406_s1 + $0x8] sm:$0xff]  ;;  %v24_v2 = vld [vmem:[%s406_s1 + $0x10] sm:$0xff] }
   0x2   :  { %v239_v3 = vpack.c.bf16 %v23_v1, %v22_v0  ;;  %v25_v4 = vld [vmem:[%s406_s1 + $0x18] sm:$0xff]  ;;  %v26_v6 = vld [vmem:[%s406_s1 + $0x20] sm:$0xff]  ;;  %v27_v7 = vld [vmem:[%s406_s1 + $0x28] sm:$0xff] }
   0x3   :  { %v243_v5 = vpack.c.bf16 %v25_v4, %v24_v2  ;;  %v247_v8 = vpack.c.bf16 %v27_v7, %v26_v6  ;;  %v14_v9 = vld [vmem:[%s407_s0] sm:$0xff]  ;;  %v28_v11 = vld [vmem:[%s406_s1 + $0x30] sm:$0xff]  ;;  %v29_v12 = vld [vmem:[%s406_s1 + $0x38] sm:$0xff] }
   0x4   :  { %240 = vmatprep.subr.bf16.mxu0 %v239_v3  ;;  %271 = vmatprep.subr.bf16.mxu1 %v239_v3  ;;  %v18_v10 = vld [vmem:[%s407_s0 + $0x20] sm:$0xff]  ;;  %v251_v13 = vpack.c.bf16 %v29_v12, %v28_v11  ;;  %v31_v15 = vld [vmem:[%s406_s1 + $0x48] sm:$0xff]  ;;  %v32_v17 = vld [vmem:[%s406_s1 + $0x50] sm:$0xff] }
   0x5   :  { %242 = vmatpush3.bf16.msra.mxu0 %v239_v3  ;;  %279 = vmatpush3.bf16.msra.mxu1 %v239_v3  ;;  %v30_v14 = vld [vmem:[%s406_s1 + $0x40] sm:$0xff]  ;;  %v33_v18 = vld [vmem:[%s406_s1 + $0x58] sm:$0xff]  ;;  %v35_v21 = vld [vmem:[%s406_s1 + $0x68] sm:$0xff] }
   0x6   :  { %244 = vmatprep.subr.bf16.mxu0 %v243_v5  ;;  %272 = vmatprep.subr.bf16.mxu1 %v243_v5  ;;  %v255_v16 = vpack.c.bf16 %v31_v15, %v30_v14  ;;  %v259_v19 = vpack.c.bf16 %v33_v18, %v32_v17  ;;  %v34_v20 = vld [vmem:[%s406_s1 + $0x60] sm:$0xff]  ;;  %v36_v23 = vld [vmem:[%s406_s1 + $0x70] sm:$0xff]  ;;  %v37_v24 = vld [vmem:[%s406_s1 + $0x78] sm:$0xff] }
   0x7   :  { %227 = vmatprep.mubr.f32.mxu0 %v14_v9  ;;  %233 = vmatprep.mubr.f32.mxu1 %v18_v10  ;;  %v263_v22 = vpack.c.bf16 %v35_v21, %v34_v20  ;;  %v267_v25 = vpack.c.bf16 %v37_v24, %v36_v23  ;;  %v15_v26 = vld [vmem:[%s407_s0 + $0x8] sm:$0xff]  ;;  %v16_v28 = vld [vmem:[%s407_s0 + $0x10] sm:$0xff]  ;;  %v17_v30 = vld [vmem:[%s407_s0 + $0x18] sm:$0xff] }
   0x8   :  { %v19_v27 = vld [vmem:[%s407_s0 + $0x28] sm:$0xff]  ;;  %v20_v29 = vld [vmem:[%s407_s0 + $0x30] sm:$0xff]  ;;  %v21_v31 = vld [vmem:[%s407_s0 + $0x38] sm:$0xff] }
   0x9   :  { %246 = vmatpush3.bf16.msra.mxu0 %v243_v5  ;;  %280 = vmatpush3.bf16.msra.mxu1 %v243_v5  ;;  %v170_v32 = vld [vmem:[%s408_s2] ss:$0 sm:$0xff] }
   0xa   :  { %248 = vmatprep.subr.bf16.mxu0 %v247_v8  ;;  %273 = vmatprep.subr.bf16.mxu1 %v247_v8 }
   0xd   :  { %250 = vmatpush3.bf16.msra.mxu0 %v247_v8  ;;  %281 = vmatpush3.bf16.msra.mxu1 %v247_v8 }
   0xe   :  { %252 = vmatprep.subr.bf16.mxu0 %v251_v13  ;;  %274 = vmatprep.subr.bf16.mxu1 %v251_v13 }
  0x11   :  { %254 = vmatpush3.bf16.msra.mxu0 %v251_v13  ;;  %282 = vmatpush3.bf16.msra.mxu1 %v251_v13 }
  0x12   :  { %256 = vmatprep.subr.bf16.mxu0 %v255_v16  ;;  %275 = vmatprep.subr.bf16.mxu1 %v255_v16 }
  0x15   :  { %258 = vmatpush3.bf16.msra.mxu0 %v255_v16  ;;  %283 = vmatpush3.bf16.msra.mxu1 %v255_v16 }
  0x16   :  { %260 = vmatprep.subr.bf16.mxu0 %v259_v19  ;;  %276 = vmatprep.subr.bf16.mxu1 %v259_v19 }
  0x19   :  { %262 = vmatpush3.bf16.msra.mxu0 %v259_v19  ;;  %284 = vmatpush3.bf16.msra.mxu1 %v259_v19 }
  0x1a   :  { %264 = vmatprep.subr.bf16.mxu0 %v263_v22  ;;  %277 = vmatprep.subr.bf16.mxu1 %v263_v22 }
  0x1d   :  { %266 = vmatpush3.bf16.msra.mxu0 %v263_v22  ;;  %285 = vmatpush3.bf16.msra.mxu1 %v263_v22 }
  0x1e   :  { %268 = vmatprep.subr.bf16.mxu0 %v267_v25  ;;  %278 = vmatprep.subr.bf16.mxu1 %v267_v25 }
  0x21   :  { %270 = vmatpush3.bf16.msra.mxu0 %v267_v25  ;;  %286 = vmatpush3.bf16.msra.mxu1 %v267_v25 }
  0x24   :  { %228 = vmatmul.mubr.f32.vlgmr.msra.gmra.mrb[0].mxu0 %v15_v26  ;;  %234 = vmatmul.mubr.f32.vlgmr.msra.gmra.mrb[0].mxu1 %v19_v27 }
  0x25   :  { %230 = vmatprep.mubr.f32.mxu0 %v16_v28  ;;  %236 = vmatprep.mubr.f32.mxu1 %v20_v29 }
  0x28   :  { %231 = vmatmul.mubr.f32.gmra.mrb[2].mxu0 %v17_v30  ;;  %237 = vmatmul.mubr.f32.gmra.mrb[2].mxu1 %v21_v31 }
  0xf7   :  { %v229_v33 = vpop.f32.mrb[0].mxu0  ;;  %v235_v34 = vpop.f32.mrb[0].mxu1 }
  0xf8   :  { %v117_v35 = vadd.f32 %v229_v33, %v170_v32  ;;  %v137_v36 = vadd.f32 %v235_v34, %v170_v32  ;;  %v111_v37 = vpop.f32.mrb[1].mxu0  ;;  %v131_v38 = vpop.f32.mrb[1].mxu1 }
  0xf9   :  { %v112_v39 = vadd.f32 %v170_v32, %v111_v37  ;;  %v132_v40 = vadd.f32 %v170_v32, %v131_v38 }
  0xfa   :  { %v151_v41 = vmax.f32 %v117_v35, 0.0  ;;  %v155_v42 = vmax.f32 %v137_v36, 0.0 }
  0xfb   :  { %v150_v43 = vmax.f32 %v112_v39, 0.0  ;;  %v154_v44 = vmax.f32 %v132_v40, 0.0  ;;  %v232_v45 = vpop.f32.mrb[2].mxu0  ;;  %v238_v46 = vpop.f32.mrb[2].mxu1 }
  0xfc   :  { %159 = vst [vmem:[%s409_s3 + $0x8] sm:$0xff] %v151_v41  ;;  %163 = vst [vmem:[%s409_s3 + $0x28] sm:$0xff] %v155_v42  ;;  %v127_v47 = vadd.f32 %v232_v45, %v170_v32  ;;  %v147_v48 = vadd.f32 %v238_v46, %v170_v32  ;;  %v121_v49 = vpop.f32.mrb[3].mxu0  ;;  %v141_v50 = vpop.f32.mrb[3].mxu1 }
  0xfd   :  { %158 = vst [vmem:[%s409_s3] sm:$0xff] %v150_v43  ;;  %162 = vst [vmem:[%s409_s3 + $0x20] sm:$0xff] %v154_v44  ;;  %v122_v51 = vadd.f32 %v170_v32, %v121_v49  ;;  %v142_v52 = vadd.f32 %v170_v32, %v141_v50 }
  0xfe   :  { %v153_v53 = vmax.f32 %v127_v47, 0.0  ;;  %v157_v54 = vmax.f32 %v147_v48, 0.0 }
  0xff   :  { %v152_v55 = vmax.f32 %v122_v51, 0.0  ;;  %v156_v56 = vmax.f32 %v142_v52, 0.0 }
 0x100   :  { %161 = vst [vmem:[%s409_s3 + $0x18] sm:$0xff] %v153_v53  ;;  %165 = vst [vmem:[%s409_s3 + $0x38] sm:$0xff] %v157_v54 }
 0x101   :  { %160 = vst [vmem:[%s409_s3 + $0x10] sm:$0xff] %v152_v55  ;;  %164 = vst [vmem:[%s409_s3 + $0x30] sm:$0xff] %v156_v56 }

// kernel: _lambda_.4
= control target key start
LH: loop header
LB: loop body
LE: loop exit
PB: predicated region body
PF: predicated region fallthrough
CT: control target
= control target key end

     0   :  { %v3040_v3 = vmov 0.0   ;;  %s4265_s3 = inlined_call_operand.vmem [shape: f32[128,512], index: 3, kind: input, shape index: {}]   ;;  %s4266_s4 = inlined_call_operand.vmem [shape: f32[128,512], index: 4, kind: input, shape index: {}]   ;;  %s4267_s2 = inlined_call_operand.vmem [shape: f32[8,8,128], index: 2, kind: input, shape index: {}]   ;;  %s4268_s0 = inlined_call_operand.vmem [shape: f32[8,128], index: 0, kind: input, shape index: {}]   ;;  %s4269_s5 = inlined_call_operand.vmem [shape: f32[1,512], index: 5, kind: input, shape index: {}]   ;;  %s4270_s1 = inlined_call_operand.vmem [shape: f32[8,128], index: 1, kind: input, shape index: {}]   ;;  %s4271_s6 = inlined_call_operand.vmem [shape: f32[8,8,128], index: 6, kind: output, shape index: {0}]   ;;  %s4272_s8 = inlined_call_operand.vmem [shape: f32[8,128], index: 8, kind: output, shape index: {2}]   ;;  %s4273_s7 = inlined_call_operand.vmem [shape: f32[8,128], index: 7, kind: output, shape index: {1}]  }
   0x1   :  { %v43_v0 = vld [vmem:[%s4265_s3 + $0x8] sm:$0xff]  ;;  %v45_v2 = vld [vmem:[%s4265_s3 + $0x18] sm:$0xff]  ;;  %192 = vmatprep.mubr.f32.mxu0 %v3040_v3  ;;  %305 = vmatprep.mubr.f32.mxu1 %v3040_v3  ;;  %v42_v6 = vld [vmem:[%s4265_s3] sm:$0xff] }
   0x2   :  { %v47_v1 = vld [vmem:[%s4265_s3 + $0x28] sm:$0xff]  ;;  %v49_v5 = vld [vmem:[%s4265_s3 + $0x38] sm:$0xff]  ;;  %v46_v7 = vld [vmem:[%s4265_s3 + $0x20] sm:$0xff] }
   0x3   :  { %v2319_v4 = vpack.c.bf16 %v47_v1, %v43_v0  ;;  %v2351_v8 = vpack.c.bf16 %v49_v5, %v45_v2  ;;  %v2321_v9 = vpack.c.bf16 %v46_v7, %v42_v6  ;;  %v44_v10 = vld [vmem:[%s4265_s3 + $0x10] sm:$0xff]  ;;  %v51_v12 = vld [vmem:[%s4265_s3 + $0x48] sm:$0xff]  ;;  %v53_v15 = vld [vmem:[%s4265_s3 + $0x58] sm:$0xff] }
   0x4   :  { %v48_v11 = vld [vmem:[%s4265_s3 + $0x30] sm:$0xff]  ;;  %v55_v14 = vld [vmem:[%s4265_s3 + $0x68] sm:$0xff]  ;;  %v57_v16 = vld [vmem:[%s4265_s3 + $0x78] sm:$0xff] }
   0x5   :  { %2320 = vmatprep.subr.bf16.mxu0 %v2319_v4  ;;  %v2353_v13 = vpack.c.bf16 %v48_v11, %v44_v10  ;;  %2352 = vmatprep.subr.bf16.mxu1 %v2351_v8  ;;  %v2323_v17 = vpack.c.bf16 %v55_v14, %v51_v12  ;;  %v2355_v18 = vpack.c.bf16 %v57_v16, %v53_v15  ;;  %v50_v19 = vld [vmem:[%s4265_s3 + $0x40] sm:$0xff]  ;;  %v52_v21 = vld [vmem:[%s4265_s3 + $0x50] sm:$0xff]  ;;  %v59_v24 = vld [vmem:[%s4265_s3 + $0x88] sm:$0xff] }
   0x6   :  { %2322 = vmatpush1.bf16.msra.mxu0 %v2321_v9  ;;  %v54_v20 = vld [vmem:[%s4265_s3 + $0x60] sm:$0xff]  ;;  %v56_v23 = vld [vmem:[%s4265_s3 + $0x70] sm:$0xff]  ;;  %v63_v25 = vld [vmem:[%s4265_s3 + $0xa8] sm:$0xff] }
   0x7   :  { %2354 = vmatpush1.bf16.msra.mxu1 %v2353_v13  ;;  %v2325_v22 = vpack.c.bf16 %v54_v20, %v50_v19  ;;  %2324 = vmatprep.subr.bf16.mxu0 %v2323_v17  ;;  %v2357_v26 = vpack.c.bf16 %v56_v23, %v52_v21  ;;  %v2327_v27 = vpack.c.bf16 %v63_v25, %v59_v24  ;;  %v61_v28 = vld [vmem:[%s4265_s3 + $0x98] sm:$0xff]  ;;  %v58_v30 = vld [vmem:[%s4265_s3 + $0x80] sm:$0xff]  ;;  %v60_v33 = vld [vmem:[%s4265_s3 + $0x90] sm:$0xff] }
   0x8   :  { %2356 = vmatprep.subr.bf16.mxu1 %v2355_v18  ;;  %v65_v29 = vld [vmem:[%s4265_s3 + $0xb8] sm:$0xff]  ;;  %v62_v32 = vld [vmem:[%s4265_s3 + $0xa0] sm:$0xff]  ;;  %v64_v34 = vld [vmem:[%s4265_s3 + $0xb0] sm:$0xff] }
   0x9   :  { %v2359_v31 = vpack.c.bf16 %v65_v29, %v61_v28  ;;  %v2329_v35 = vpack.c.bf16 %v62_v32, %v58_v30  ;;  %v67_v36 = vld [vmem:[%s4265_s3 + $0xc8] sm:$0xff]  ;;  %v69_v38 = vld [vmem:[%s4265_s3 + $0xd8] sm:$0xff]  ;;  %v2361_v39 = vpack.c.bf16 %v64_v34, %v60_v33  ;;  %v66_v42 = vld [vmem:[%s4265_s3 + $0xc0] sm:$0xff] }
   0xa   :  { %2326 = vmatpush1.bf16.msra.mxu0 %v2325_v22  ;;  %v71_v37 = vld [vmem:[%s4265_s3 + $0xe8] sm:$0xff]  ;;  %v73_v41 = vld [vmem:[%s4265_s3 + $0xf8] sm:$0xff]  ;;  %v70_v43 = vld [vmem:[%s4265_s3 + $0xe0] sm:$0xff] }
   0xb   :  { %2358 = vmatpush1.bf16.msra.mxu1 %v2357_v26  ;;  %2328 = vmatprep.subr.bf16.mxu0 %v2327_v27  ;;  %v2331_v40 = vpack.c.bf16 %v71_v37, %v67_v36  ;;  %v2363_v44 = vpack.c.bf16 %v73_v41, %v69_v38  ;;  %v68_v45 = vld [vmem:[%s4265_s3 + $0xd0] sm:$0xff]  ;;  %v75_v47 = vld [vmem:[%s4265_s3 + $0x108] sm:$0xff]  ;;  %v77_v49 = vld [vmem:[%s4265_s3 + $0x118] sm:$0xff]  ;;  %v2333_v51 = vpack.c.bf16 %v70_v43, %v66_v42 }
   0xc   :  { %2360 = vmatprep.subr.bf16.mxu1 %v2359_v31  ;;  %v72_v46 = vld [vmem:[%s4265_s3 + $0xf0] sm:$0xff]  ;;  %v79_v48 = vld [vmem:[%s4265_s3 + $0x128] sm:$0xff]  ;;  %v81_v50 = vld [vmem:[%s4265_s3 + $0x138] sm:$0xff] }
   0xd   :  { %v2365_v52 = vpack.c.bf16 %v72_v46, %v68_v45  ;;  %v2335_v53 = vpack.c.bf16 %v79_v48, %v75_v47  ;;  %v74_v54 = vld [vmem:[%s4265_s3 + $0x100] sm:$0xff]  ;;  %v76_v56 = vld [vmem:[%s4265_s3 + $0x110] sm:$0xff]  ;;  %v2367_v57 = vpack.c.bf16 %v81_v50, %v77_v49  ;;  %v83_v59 = vld [vmem:[%s4265_s3 + $0x148] sm:$0xff] }
   0xe   :  { %2330 = vmatpush1.bf16.msra.mxu0 %v2329_v35  ;;  %v78_v55 = vld [vmem:[%s4265_s3 + $0x120] sm:$0xff]  ;;  %v80_v58 = vld [vmem:[%s4265_s3 + $0x130] sm:$0xff]  ;;  %v87_v60 = vld [vmem:[%s4265_s3 + $0x168] sm:$0xff] }
   0xf   :  { %2362 = vmatpush1.bf16.msra.mxu1 %v2361_v39  ;;  %2332 = vmatprep.subr.bf16.mxu0 %v2331_v40  ;;  %v85_v61 = vld [vmem:[%s4265_s3 + $0x158] sm:$0xff]  ;;  %v2337_v63 = vpack.c.bf16 %v78_v55, %v74_v54  ;;  %v2369_v0 = vpack.c.bf16 %v80_v58, %v76_v56  ;;  %v2339_v1 = vpack.c.bf16 %v87_v60, %v83_v59  ;;  %v82_v2 = vld [vmem:[%s4265_s3 + $0x140] sm:$0xff]  ;;  %v84_v5 = vld [vmem:[%s4265_s3 + $0x150] sm:$0xff] }
  0x10   :  { %2364 = vmatprep.subr.bf16.mxu1 %v2363_v44  ;;  %v89_v62 = vld [vmem:[%s4265_s3 + $0x178] sm:$0xff]  ;;  %v86_v4 = vld [vmem:[%s4265_s3 + $0x160] sm:$0xff]  ;;  %v88_v7 = vld [vmem:[%s4265_s3 + $0x170] sm:$0xff] }
  0x11   :  { %v2371_v6 = vpack.c.bf16 %v89_v62, %v85_v61  ;;  %v91_v8 = vld [vmem:[%s4265_s3 + $0x188] sm:$0xff]  ;;  %v93_v10 = vld [vmem:[%s4265_s3 + $0x198] sm:$0xff]  ;;  %v2341_v12 = vpack.c.bf16 %v86_v4, %v82_v2  ;;  %v2373_v13 = vpack.c.bf16 %v88_v7, %v84_v5  ;;  %v90_v15 = vld [vmem:[%s4265_s3 + $0x180] sm:$0xff] }
  0x12   :  { %2334 = vmatpush1.bf16.msra.mxu0 %v2333_v51  ;;  %v95_v9 = vld [vmem:[%s4265_s3 + $0x1a8] sm:$0xff]  ;;  %v97_v11 = vld [vmem:[%s4265_s3 + $0x1b8] sm:$0xff]  ;;  %v94_v16 = vld [vmem:[%s4265_s3 + $0x1a0] sm:$0xff] }
  0x13   :  { %2366 = vmatpush1.bf16.msra.mxu1 %v2365_v52  ;;  %2336 = vmatprep.subr.bf16.mxu0 %v2335_v53  ;;  %v2343_v14 = vpack.c.bf16 %v95_v9, %v91_v8  ;;  %v92_v17 = vld [vmem:[%s4265_s3 + $0x190] sm:$0xff]  ;;  %v2375_v18 = vpack.c.bf16 %v97_v11, %v93_v10  ;;  %v99_v20 = vld [vmem:[%s4265_s3 + $0x1c8] sm:$0xff]  ;;  %v101_v22 = vld [vmem:[%s4265_s3 + $0x1d8] sm:$0xff]  ;;  %v2345_v24 = vpack.c.bf16 %v94_v16, %v90_v15 }
  0x14   :  { %2368 = vmatprep.subr.bf16.mxu1 %v2367_v57  ;;  %v96_v19 = vld [vmem:[%s4265_s3 + $0x1b0] sm:$0xff]  ;;  %v103_v21 = vld [vmem:[%s4265_s3 + $0x1e8] sm:$0xff]  ;;  %v105_v23 = vld [vmem:[%s4265_s3 + $0x1f8] sm:$0xff] }
  0x15   :  { %v2377_v25 = vpack.c.bf16 %v96_v19, %v92_v17  ;;  %v2347_v26 = vpack.c.bf16 %v103_v21, %v99_v20  ;;  %v98_v27 = vld [vmem:[%s4265_s3 + $0x1c0] sm:$0xff]  ;;  %v100_v29 = vld [vmem:[%s4265_s3 + $0x1d0] sm:$0xff]  ;;  %v2379_v30 = vpack.c.bf16 %v105_v23, %v101_v22  ;;  %v393_v32 = vld [vmem:[%s4266_s4 + $0x8] sm:$0xff] }
  0x16   :  { %2338 = vmatpush1.bf16.msra.mxu0 %v2337_v63  ;;  %v102_v28 = vld [vmem:[%s4265_s3 + $0x1e0] sm:$0xff]  ;;  %v104_v31 = vld [vmem:[%s4265_s3 + $0x1f0] sm:$0xff]  ;;  %v397_v33 = vld [vmem:[%s4266_s4 + $0x28] sm:$0xff] }
  0x17   :  { %2370 = vmatpush1.bf16.msra.mxu1 %v2369_v0  ;;  %2340 = vmatprep.subr.bf16.mxu0 %v2339_v1  ;;  %v395_v34 = vld [vmem:[%s4266_s4 + $0x18] sm:$0xff]  ;;  %v2349_v36 = vpack.c.bf16 %v102_v28, %v98_v27  ;;  %v2381_v37 = vpack.c.bf16 %v104_v31, %v100_v29  ;;  %v3292_v38 = vpack.c.bf16 %v397_v33, %v393_v32  ;;  %v392_v39 = vld [vmem:[%s4266_s4] sm:$0xff]  ;;  %v394_v42 = vld [vmem:[%s4266_s4 + $0x10] sm:$0xff] }
  0x18   :  { %2372 = vmatprep.subr.bf16.mxu1 %v2371_v6  ;;  %v399_v35 = vld [vmem:[%s4266_s4 + $0x38] sm:$0xff]  ;;  %v396_v40 = vld [vmem:[%s4266_s4 + $0x20] sm:$0xff]  ;;  %v398_v43 = vld [vmem:[%s4266_s4 + $0x30] sm:$0xff] }
  0x19   :  { %v3300_v41 = vpack.c.bf16 %v399_v35, %v395_v34  ;;  %v401_v44 = vld [vmem:[%s4266_s4 + $0x48] sm:$0xff]  ;;  %v34_v46 = vld [vmem:[%s4267_s2] sm:$0xff]  ;;  %v3317_v47 = vpack.c.bf16 %v396_v40, %v392_v39  ;;  %v403_v48 = vld [vmem:[%s4266_s4 + $0x58] sm:$0xff]  ;;  %v3326_v50 = vpack.c.bf16 %v398_v43, %v394_v42 }
  0x1a   :  { %2342 = vmatpush1.bf16.msra.mxu0 %v2341_v12  ;;  %v405_v45 = vld [vmem:[%s4266_s4 + $0x68] sm:$0xff]  ;;  %v407_v49 = vld [vmem:[%s4266_s4 + $0x78] sm:$0xff]  ;;  %v400_v51 = vld [vmem:[%s4266_s4 + $0x40] sm:$0xff] }
  0x1b   :  { %2374 = vmatpush1.bf16.msra.mxu1 %v2373_v13  ;;  %2344 = vmatprep.subr.bf16.mxu0 %v2343_v14  ;;  %v404_v52 = vld [vmem:[%s4266_s4 + $0x60] sm:$0xff]  ;;  %v3335_v53 = vpack.c.bf16 %v405_v45, %v401_v44  ;;  %v402_v54 = vld [vmem:[%s4266_s4 + $0x50] sm:$0xff]  ;;  %v3343_v56 = vpack.c.bf16 %v407_v49, %v403_v48  ;;  %v409_v57 = vld [vmem:[%s4266_s4 + $0x88] sm:$0xff] }
  0x1c   :  { %2376 = vmatprep.subr.bf16.mxu1 %v2375_v18  ;;  %v406_v55 = vld [vmem:[%s4266_s4 + $0x70] sm:$0xff]  ;;  %v413_v58 = vld [vmem:[%s4266_s4 + $0xa8] sm:$0xff]  ;;  %v3355_v60 = vpack.c.bf16 %v404_v52, %v400_v51  ;;  %v411_v61 = vld [vmem:[%s4266_s4 + $0x98] sm:$0xff] }
  0x1d   :  { %v35_v59 = vld [vmem:[%s4267_s2 + $0x8] sm:$0xff]  ;;  %v415_v62 = vld [vmem:[%s4266_s4 + $0xb8] sm:$0xff]  ;;  %v3365_v63 = vpack.c.bf16 %v406_v55, %v402_v54  ;;  %v408_v0 = vld [vmem:[%s4266_s4 + $0x80] sm:$0xff]  ;;  %v3375_v2 = vpack.c.bf16 %v413_v58, %v409_v57 }
  0x1e   :  { %2346 = vmatpush1.bf16.msra.mxu0 %v2345_v24  ;;  %v412_v1 = vld [vmem:[%s4266_s4 + $0xa0] sm:$0xff]  ;;  %v410_v4 = vld [vmem:[%s4266_s4 + $0x90] sm:$0xff]  ;;  %v3384_v6 = vpack.c.bf16 %v415_v62, %v411_v61  ;;  %v417_v7 = vld [vmem:[%s4266_s4 + $0xc8] sm:$0xff] }
  0x1f   :  { %2378 = vmatpush1.bf16.msra.mxu1 %v2377_v25  ;;  %2348 = vmatprep.subr.bf16.mxu0 %v2347_v26  ;;  %v414_v5 = vld [vmem:[%s4266_s4 + $0xb0] sm:$0xff]  ;;  %v421_v8 = vld [vmem:[%s4266_s4 + $0xe8] sm:$0xff]  ;;  %v3396_v10 = vpack.c.bf16 %v412_v1, %v408_v0  ;;  %v419_v11 = vld [vmem:[%s4266_s4 + $0xd8] sm:$0xff] }
  0x20   :  { %2380 = vmatprep.subr.bf16.mxu1 %v2379_v30  ;;  %v36_v9 = vld [vmem:[%s4267_s2 + $0x10] sm:$0xff]  ;;  %v423_v12 = vld [vmem:[%s4266_s4 + $0xf8] sm:$0xff]  ;;  %v3406_v13 = vpack.c.bf16 %v414_v5, %v410_v4  ;;  %v416_v14 = vld [vmem:[%s4266_s4 + $0xc0] sm:$0xff]  ;;  %v3416_v16 = vpack.c.bf16 %v421_v8, %v417_v7 }
  0x21   :  { %v420_v15 = vld [vmem:[%s4266_s4 + $0xe0] sm:$0xff]  ;;  %v418_v17 = vld [vmem:[%s4266_s4 + $0xd0] sm:$0xff]  ;;  %v3425_v19 = vpack.c.bf16 %v423_v12, %v419_v11  ;;  %v425_v20 = vld [vmem:[%s4266_s4 + $0x108] sm:$0xff] }
  0x22   :  { %2350 = vmatpush1.bf16.msra.mxu0 %v2349_v36  ;;  %v422_v18 = vld [vmem:[%s4266_s4 + $0xf0] sm:$0xff]  ;;  %v429_v21 = vld [vmem:[%s4266_s4 + $0x128] sm:$0xff]  ;;  %v37_v22 = vld [vmem:[%s4267_s2 + $0x18] sm:$0xff]  ;;  %v3437_v23 = vpack.c.bf16 %v420_v15, %v416_v14 }
  0x23   :  { %2382 = vmatpush1.bf16.msra.mxu1 %v2381_v37  ;;  %2384 = vmatprep.subr.bf16.mxu0 %v3292_v38  ;;  %v427_v24 = vld [vmem:[%s4266_s4 + $0x118] sm:$0xff]  ;;  %v3447_v26 = vpack.c.bf16 %v422_v18, %v418_v17  ;;  %v424_v27 = vld [vmem:[%s4266_s4 + $0x100] sm:$0xff]  ;;  %v3457_v29 = vpack.c.bf16 %v429_v21, %v425_v20  ;;  %v426_v30 = vld [vmem:[%s4266_s4 + $0x110] sm:$0xff] }
  0x24   :  { %2416 = vmatprep.subr.bf16.mxu1 %v3300_v41  ;;  %v431_v25 = vld [vmem:[%s4266_s4 + $0x138] sm:$0xff]  ;;  %v428_v28 = vld [vmem:[%s4266_s4 + $0x120] sm:$0xff]  ;;  %v430_v31 = vld [vmem:[%s4266_s4 + $0x130] sm:$0xff] }
  0x25   :  { %193 = vmatmul.mubr.f32.vlgmr.msra.gmra.mrb[0].mxu0 %v34_v46  ;;  %v3466_v32 = vpack.c.bf16 %v431_v25, %v427_v24  ;;  %v433_v33 = vld [vmem:[%s4266_s4 + $0x148] sm:$0xff]  ;;  %v38_v35 = vld [vmem:[%s4267_s2 + $0x20] sm:$0xff]  ;;  %v3478_v36 = vpack.c.bf16 %v428_v28, %v424_v27  ;;  %v435_v37 = vld [vmem:[%s4266_s4 + $0x158] sm:$0xff]  ;;  %v3488_v40 = vpack.c.bf16 %v430_v31, %v426_v30  ;;  %v108_v30 = vlaneseq }
  0x26   :  { %306 = vmatmul.mubr.f32.vlgmr.msra.gmra.mrb[0].mxu1 %v34_v46  ;;  %2386 = vmatpush1.bf16.msra.mxu0 %v3317_v47  ;;  %v437_v34 = vld [vmem:[%s4266_s4 + $0x168] sm:$0xff]  ;;  %v439_v39 = vld [vmem:[%s4266_s4 + $0x178] sm:$0xff]  ;;  %v432_v42 = vld [vmem:[%s4266_s4 + $0x140] sm:$0xff] }
  0x27   :  { %2418 = vmatpush1.bf16.msra.mxu1 %v3326_v50  ;;  %198 = vmatprep.mubr.f32.mxu0 %v3040_v3  ;;  %v436_v43 = vld [vmem:[%s4266_s4 + $0x160] sm:$0xff]  ;;  %v3498_v44 = vpack.c.bf16 %v437_v34, %v433_v33  ;;  %v434_v45 = vld [vmem:[%s4266_s4 + $0x150] sm:$0xff]  ;;  %v3507_v48 = vpack.c.bf16 %v439_v39, %v435_v37  ;;  %v441_v49 = vld [vmem:[%s4266_s4 + $0x188] sm:$0xff]  ;;  %v109_v31 = vshrl.u32 %v108_v30, 7 }
  0x28   :  { %311 = vmatprep.mubr.f32.mxu1 %v3040_v3  ;;  %2388 = vmatprep.subr.bf16.mxu0 %v3335_v53  ;;  %v438_v46 = vld [vmem:[%s4266_s4 + $0x170] sm:$0xff]  ;;  %v445_v51 = vld [vmem:[%s4266_s4 + $0x1a8] sm:$0xff]  ;;  %v3519_v54 = vpack.c.bf16 %v436_v43, %v432_v42  ;;  %v443_v55 = vld [vmem:[%s4266_s4 + $0x198] sm:$0xff] }
  0x29   :  { %199 = vmatmul.mubr.f32.gmra.mrb[2].mxu0 %v35_v59  ;;  %2420 = vmatprep.subr.bf16.mxu1 %v3343_v56  ;;  %v39_v52 = vld [vmem:[%s4267_s2 + $0x28] sm:$0xff]  ;;  %v447_v57 = vld [vmem:[%s4266_s4 + $0x1b8] sm:$0xff]  ;;  %v3529_v58 = vpack.c.bf16 %v438_v46, %v434_v45  ;;  %v444_v61 = vld [vmem:[%s4266_s4 + $0x1a0] sm:$0xff]  ;;  %v3539_v62 = vpack.c.bf16 %v445_v51, %v441_v49  ;;  %v110_v33 = vsub.s32 0, %v109_v31  ;;  %v122_v39 = vsub.s32 3, %v109_v31 }
  0x2a   :  { %312 = vmatmul.mubr.f32.gmra.mrb[2].mxu1 %v35_v59  ;;  %2390 = vmatpush1.bf16.msra.mxu0 %v3355_v60  ;;  %v440_v59 = vld [vmem:[%s4266_s4 + $0x180] sm:$0xff]  ;;  %v442_v0 = vld [vmem:[%s4266_s4 + $0x190] sm:$0xff]  ;;  %v3548_v4 = vpack.c.bf16 %v447_v57, %v443_v55  ;;  %v449_v5 = vld [vmem:[%s4266_s4 + $0x1c8] sm:$0xff] }
  0x2b   :  { %2422 = vmatpush1.bf16.msra.mxu1 %v3365_v63  ;;  %204 = vmatprep.mubr.f32.mxu0 %v3040_v3  ;;  %v446_v1 = vld [vmem:[%s4266_s4 + $0x1b0] sm:$0xff]  ;;  %v453_v7 = vld [vmem:[%s4266_s4 + $0x1e8] sm:$0xff]  ;;  %v451_v11 = vld [vmem:[%s4266_s4 + $0x1d8] sm:$0xff] }
  0x2c   :  { %317 = vmatprep.mubr.f32.mxu1 %v3040_v3  ;;  %2392 = vmatprep.subr.bf16.mxu0 %v3375_v2  ;;  %v40_v8 = vld [vmem:[%s4267_s2 + $0x30] sm:$0xff]  ;;  %v455_v12 = vld [vmem:[%s4266_s4 + $0x1f8] sm:$0xff]  ;;  %v3570_v14 = vpack.c.bf16 %v446_v1, %v442_v0  ;;  %v448_v15 = vld [vmem:[%s4266_s4 + $0x1c0] sm:$0xff]  ;;  %v3580_v18 = vpack.c.bf16 %v453_v7, %v449_v5 }
  0x2d   :  { %205 = vmatmul.mubr.f32.gmra.mrb[4].mxu0 %v36_v9  ;;  %2424 = vmatprep.subr.bf16.mxu1 %v3384_v6  ;;  %v452_v17 = vld [vmem:[%s4266_s4 + $0x1e0] sm:$0xff]  ;;  %v450_v20 = vld [vmem:[%s4266_s4 + $0x1d0] sm:$0xff]  ;;  %v41_v24 = vld [vmem:[%s4267_s2 + $0x38] sm:$0xff] }
  0x2e   :  { %318 = vmatmul.mubr.f32.gmra.mrb[4].mxu1 %v36_v9  ;;  %2394 = vmatpush1.bf16.msra.mxu0 %v3396_v10  ;;  %v3560_v9 = vpack.c.bf16 %v444_v61, %v440_v59  ;;  %v454_v21 = vld [vmem:[%s4266_s4 + $0x1f0] sm:$0xff]  ;;  %v3595_v25 = vpack.c.bf16 %v452_v17, %v448_v15  ;;  %v30_v28 = vld [vmem:[%s4268_s0] sm:$0xff] }
  0x2f   :  { %2426 = vmatpush1.bf16.msra.mxu1 %v3406_v13  ;;  %210 = vmatprep.mubr.f32.mxu0 %v3040_v3  ;;  %v3599_v27 = vpack.c.bf16 %v454_v21, %v450_v20  ;;  %v106_v34 = vld [vmem:[%s4269_s5] sm:$0xf] }
  0x30   :  { %323 = vmatprep.mubr.f32.mxu1 %v3040_v3  ;;  %2396 = vmatprep.subr.bf16.mxu0 %v3416_v16  ;;  %v3650_v37 = vrot.slane %v106_v34, %v110_v33  ;;  %v3655_v49 = vrot.slane %v106_v34, %v122_v39  ;;  %v32_v17 = vld [vmem:[%s4270_s1] sm:$0xff] }
  0x31   :  { %211 = vmatmul.mubr.f32.gmra.mrb[6].mxu0 %v37_v22  ;;  %2428 = vmatprep.subr.bf16.mxu1 %v3425_v19 }
  0x32   :  { %324 = vmatmul.mubr.f32.gmra.mrb[6].mxu1 %v37_v22  ;;  %2398 = vmatpush1.bf16.msra.mxu0 %v3437_v23  ;;  %v3589_v22 = vpack.c.bf16 %v455_v12, %v451_v11 }
  0x33   :  { %2430 = vmatpush1.bf16.msra.mxu1 %v3447_v26  ;;  %216 = vmatprep.mubr.f32.mxu0 %v3040_v3 }
  0x34   :  { %329 = vmatprep.mubr.f32.mxu1 %v3040_v3  ;;  %2400 = vmatprep.subr.bf16.mxu0 %v3457_v29 }
  0x35   :  { %217 = vmatmul.mubr.f32.gmra.mrb[8].mxu0 %v38_v35  ;;  %2432 = vmatprep.subr.bf16.mxu1 %v3466_v32 }
  0x36   :  { %330 = vmatmul.mubr.f32.gmra.mrb[8].mxu1 %v38_v35  ;;  %2402 = vmatpush1.bf16.msra.mxu0 %v3478_v36  ;;  %v114_v35 = vsub.s32 1, %v109_v31 }
  0x37   :  { %2434 = vmatpush1.bf16.msra.mxu1 %v3488_v40  ;;  %222 = vmatprep.mubr.f32.mxu0 %v3040_v3 }
  0x38   :  { %335 = vmatprep.mubr.f32.mxu1 %v3040_v3  ;;  %2404 = vmatprep.subr.bf16.mxu0 %v3498_v44  ;;  %v3652_v42 = vrot.slane %v106_v34, %v114_v35 }
  0x39   :  { %223 = vmatmul.mubr.f32.gmra.mrb[10].mxu0 %v39_v52  ;;  %2436 = vmatprep.subr.bf16.mxu1 %v3507_v48 }
  0x3a   :  { %336 = vmatmul.mubr.f32.gmra.mrb[10].mxu1 %v39_v52  ;;  %2406 = vmatpush1.bf16.msra.mxu0 %v3519_v54 }
  0x3b   :  { %2438 = vmatpush1.bf16.msra.mxu1 %v3529_v58  ;;  %228 = vmatprep.mubr.f32.mxu0 %v3040_v3 }
  0x3c   :  { %341 = vmatprep.mubr.f32.mxu1 %v3040_v3  ;;  %2408 = vmatprep.subr.bf16.mxu0 %v3539_v62 }
  0x3d   :  { %229 = vmatmul.mubr.f32.gmra.mrb[12].mxu0 %v40_v8  ;;  %2440 = vmatprep.subr.bf16.mxu1 %v3548_v4 }
  0x3e   :  { %342 = vmatmul.mubr.f32.gmra.mrb[12].mxu1 %v40_v8  ;;  %2410 = vmatpush1.bf16.msra.mxu0 %v3560_v9 }
  0x3f   :  { %2442 = vmatpush1.bf16.msra.mxu1 %v3570_v14  ;;  %234 = vmatprep.mubr.f32.mxu0 %v3040_v3 }
  0x40   :  { %347 = vmatprep.mubr.f32.mxu1 %v3040_v3  ;;  %2412 = vmatprep.subr.bf16.mxu0 %v3580_v18 }
  0x41   :  { %235 = vmatmul.mubr.f32.gmra.mrb[14].mxu0 %v41_v24  ;;  %2444 = vmatprep.subr.bf16.mxu1 %v3589_v22 }
  0x42   :  { %348 = vmatmul.mubr.f32.gmra.mrb[14].mxu1 %v41_v24  ;;  %2414 = vmatpush1.bf16.msra.mxu0 %v3595_v25 }
  0x43   :  { %2446 = vmatpush1.bf16.msra.mxu1 %v3599_v27  ;;  %520 = vmatprep.mubr.f32.mxu0 %v3040_v3 }
  0x44   :  { %591 = vmatprep.mubr.f32.mxu1 %v3040_v3  ;;  %2448 = vmatprep.subr.bf16.mxu0 %v3292_v38 }
  0x45   :  { %521 = vmatmul.mubr.f32.vlgmr.msra.gmra.mrb[0].mxu0 %v30_v28  ;;  %2480 = vmatprep.subr.bf16.mxu1 %v3300_v41 }
  0x46   :  { %592 = vmatmul.mubr.f32.vlgmr.msra.gmra.mrb[0].mxu1 %v30_v28  ;;  %2450 = vmatpush1.bf16.msra.mxu0 %v3317_v47 }
  0x47   :  { %2482 = vmatpush1.bf16.msra.mxu1 %v3326_v50  ;;  %2452 = vmatprep.subr.bf16.mxu0 %v3335_v53 }
  0x48   :  { %2484 = vmatprep.subr.bf16.mxu1 %v3343_v56  ;;  %758 = vmatprep.mubr.f32.mxu0 %v3040_v3 }
  0x49   :  { %829 = vmatprep.mubr.f32.mxu1 %v3040_v3 }
  0x4a   :  { %2454 = vmatpush1.bf16.msra.mxu0 %v3355_v60 }
  0x4b   :  { %2486 = vmatpush1.bf16.msra.mxu1 %v3365_v63  ;;  %2456 = vmatprep.subr.bf16.mxu0 %v3375_v2 }
  0x4c   :  { %2488 = vmatprep.subr.bf16.mxu1 %v3384_v6 }
  0x4e   :  { %2458 = vmatpush1.bf16.msra.mxu0 %v3396_v10 }
  0x4f   :  { %2490 = vmatpush1.bf16.msra.mxu1 %v3406_v13  ;;  %2460 = vmatprep.subr.bf16.mxu0 %v3416_v16 }
  0x50   :  { %2492 = vmatprep.subr.bf16.mxu1 %v3425_v19 }
  0x52   :  { %2462 = vmatpush1.bf16.msra.mxu0 %v3437_v23 }
  0x53   :  { %2494 = vmatpush1.bf16.msra.mxu1 %v3447_v26  ;;  %2464 = vmatprep.subr.bf16.mxu0 %v3457_v29 }
  0x54   :  { %2496 = vmatprep.subr.bf16.mxu1 %v3466_v32 }
  0x56   :  { %2466 = vmatpush1.bf16.msra.mxu0 %v3478_v36 }
  0x57   :  { %2498 = vmatpush1.bf16.msra.mxu1 %v3488_v40  ;;  %2468 = vmatprep.subr.bf16.mxu0 %v3498_v44 }
  0x58   :  { %2500 = vmatprep.subr.bf16.mxu1 %v3507_v48 }
  0x5a   :  { %2470 = vmatpush1.bf16.msra.mxu0 %v3519_v54 }
  0x5b   :  { %2502 = vmatpush1.bf16.msra.mxu1 %v3529_v58  ;;  %2472 = vmatprep.subr.bf16.mxu0 %v3539_v62 }
  0x5c   :  { %2504 = vmatprep.subr.bf16.mxu1 %v3548_v4 }
  0x5e   :  { %2474 = vmatpush1.bf16.msra.mxu0 %v3560_v9 }
  0x5f   :  { %2506 = vmatpush1.bf16.msra.mxu1 %v3570_v14  ;;  %2476 = vmatprep.subr.bf16.mxu0 %v3580_v18 }
  0x60   :  { %2508 = vmatprep.subr.bf16.mxu1 %v3589_v22 }
  0x62   :  { %2478 = vmatpush1.bf16.msra.mxu0 %v3595_v25 }
  0x63   :  { %2510 = vmatpush1.bf16.msra.mxu1 %v3599_v27  ;;  %2512 = vmatprep.subr.bf16.mxu0 %v3292_v38 }
  0x64   :  { %2544 = vmatprep.subr.bf16.mxu1 %v3300_v41  ;;  %v118_v41 = vsub.s32 2, %v109_v31 }
  0x66   :  { %v3659_v61 = vrot.slane %v106_v34, %v118_v41 }
 0x118   :  { %v522_v43 = vpop.f32.mrb[0].mxu0 }
 0x119   :  { %v2895_v45 = vadd.f32 %v522_v43, %v3650_v37  ;;  %v593_v46 = vpop.f32.mrb[0].mxu1  ;;  %v524_v38 = vpop.f32.mrb[1].mxu0 }
 0x11a   :  { %v2896_v51 = vadd.f32 %v524_v38, %v3652_v42  ;;  %v595_v52 = vpop.f32.mrb[1].mxu1  ;;  %v2911_v0 = vadd.f32 %v593_v46, %v3659_v61 }
 0x11b   :  { %v602_v55 = vmul.f32 0.5, %v2895_v45  ;;  %v2912_v59 = vadd.f32 %v595_v52, %v3655_v49 }
 0x11c   :  { %v603_v57 = vmul.f32 0.5, %v2896_v51  ;;  %v604_v1 = vmul.f32 0.5, %v2911_v0 }
 0x11d   :  { %2960 = vtanh.f32 %v602_v55 }
 0x11e   :  { %2962 = vtanh.f32 %v603_v57 }
 0x11f   :  { %2964 = vtanh.f32 %v2912_v59 }
 0x120   :  { %2966 = vtanh.f32 %v604_v1 }
 0x127   :  { %v2961_v5 = vpop.eup %2960 }
 0x128   :  { %v608_v7 = vmul.f32 0.5, %v2961_v5  ;;  %v2963_v8 = vpop.eup %2962 }
 0x129   :  { %v609_v12 = vmul.f32 0.5, %v2963_v8  ;;  %v2965_v15 = vpop.eup %2964 }
 0x12a   :  { %v611_v11 = vadd.f32 0.5, %v608_v7  ;;  %v2967_v30 = vpop.eup %2966 }
 0x12b   :  { %v612_v20 = vadd.f32 0.5, %v609_v12  ;;  %v610_v31 = vmul.f32 0.5, %v2967_v30  ;;  %v1113_v12 = vld [vmem:[%s4266_s4 + $0x28] sm:$0xff] }
 0x12c   :  { %v616_v21 = vmul.f32 %v2965_v15, %v611_v11  ;;  %v1109_v11 = vld [vmem:[%s4266_s4 + $0x8] sm:$0xff]  ;;  %v1111_v15 = vld [vmem:[%s4266_s4 + $0x18] sm:$0xff] }
 0x12d   :  { %v615_v24 = vmul.f32 %v612_v20, %v32_v17  ;;  %v613_v33 = vadd.f32 0.5, %v610_v31  ;;  %v3725_v17 = vpack.c.bf16 %v1113_v12, %v1109_v11  ;;  %v1115_v20 = vld [vmem:[%s4266_s4 + $0x38] sm:$0xff]  ;;  %v1110_v31 = vld [vmem:[%s4266_s4 + $0x10] sm:$0xff] }
 0x12f   :  { %v3665_v28 = vadd.f32 %v616_v21, %v615_v24  ;;  %v1108_v21 = vld [vmem:[%s4266_s4] sm:$0xff] }
 0x130   :  { %v1112_v24 = vld [vmem:[%s4266_s4 + $0x20] sm:$0xff] }
 0x131   :  { %2968 = vtanh.f32 %v3665_v28  ;;  %v3738_v30 = vpack.c.bf16 %v1112_v24, %v1108_v21  ;;  %v1376_v21 = vld [vmem:[%s4266_s4 + $0xe8] sm:$0xff]  ;;  %v1374_v24 = vld [vmem:[%s4266_s4 + $0xd8] sm:$0xff] }
 0x13b   :  { %v2969_v34 = vpop.eup %2968 }
 0x13c   :  { %v619_v35 = vmul.f32 %v2969_v34, %v613_v33  ;;  %v1114_v33 = vld [vmem:[%s4266_s4 + $0x30] sm:$0xff] }
 0x13d   :  { %v3747_v34 = vpack.c.bf16 %v1114_v33, %v1110_v31  ;;  %v1378_v33 = vld [vmem:[%s4266_s4 + $0xf8] sm:$0xff] }
 0x13e   :  { %622 = vst [vmem:[%s4271_s6] sm:$0xff] %v619_v35  ;;  %759 = vmatmul.mubr.f32.vlgmr.msra.gmra.mrb[2].mxu0 %v619_v35  ;;  %830 = vmatmul.mubr.f32.vlgmr.msra.gmra.mrb[2].mxu1 %v619_v35  ;;  %v1117_v35 = vld [vmem:[%s4266_s4 + $0x48] sm:$0xff] }
 0x13f   :  { %2514 = vmatpush1.bf16.msra.mxu0 %v3317_v47  ;;  %2546 = vmatpush1.bf16.msra.mxu1 %v3326_v50 }
 0x140   :  { %2516 = vmatprep.subr.bf16.mxu0 %v3335_v53  ;;  %2548 = vmatprep.subr.bf16.mxu1 %v3343_v56 }
 0x141   :  { %997 = vmatprep.mubr.f32.mxu0 %v3040_v3  ;;  %1068 = vmatprep.mubr.f32.mxu1 %v3040_v3 }
 0x143   :  { %2518 = vmatpush1.bf16.msra.mxu0 %v3355_v60  ;;  %2550 = vmatpush1.bf16.msra.mxu1 %v3365_v63 }
 0x144   :  { %2520 = vmatprep.subr.bf16.mxu0 %v3375_v2  ;;  %2552 = vmatprep.subr.bf16.mxu1 %v3384_v6 }
 0x147   :  { %2522 = vmatpush1.bf16.msra.mxu0 %v3396_v10  ;;  %2554 = vmatpush1.bf16.msra.mxu1 %v3406_v13 }
 0x148   :  { %2524 = vmatprep.subr.bf16.mxu0 %v3416_v16  ;;  %2556 = vmatprep.subr.bf16.mxu1 %v3425_v19 }
 0x14b   :  { %2526 = vmatpush1.bf16.msra.mxu0 %v3437_v23  ;;  %2558 = vmatpush1.bf16.msra.mxu1 %v3447_v26 }
 0x14c   :  { %2528 = vmatprep.subr.bf16.mxu0 %v3457_v29  ;;  %2560 = vmatprep.subr.bf16.mxu1 %v3466_v32 }
 0x14f   :  { %2530 = vmatpush1.bf16.msra.mxu0 %v3478_v36  ;;  %2562 = vmatpush1.bf16.msra.mxu1 %v3488_v40 }
 0x150   :  { %2532 = vmatprep.subr.bf16.mxu0 %v3498_v44  ;;  %2564 = vmatprep.subr.bf16.mxu1 %v3507_v48 }
 0x153   :  { %2534 = vmatpush1.bf16.msra.mxu0 %v3519_v54  ;;  %2566 = vmatpush1.bf16.msra.mxu1 %v3529_v58 }
 0x154   :  { %2536 = vmatprep.subr.bf16.mxu0 %v3539_v62  ;;  %2568 = vmatprep.subr.bf16.mxu1 %v3548_v4 }
 0x157   :  { %2538 = vmatpush1.bf16.msra.mxu0 %v3560_v9  ;;  %2570 = vmatpush1.bf16.msra.mxu1 %v3570_v14 }
 0x158   :  { %2540 = vmatprep.subr.bf16.mxu0 %v3580_v18  ;;  %2572 = vmatprep.subr.bf16.mxu1 %v3589_v22 }
 0x15b   :  { %2542 = vmatpush1.bf16.msra.mxu0 %v3595_v25  ;;  %2574 = vmatpush1.bf16.msra.mxu1 %v3599_v27 }
 0x15c   :  { %2576 = vmatprep.subr.bf16.mxu0 %v3725_v17 }
 0x211   :  { %v760_v47 = vpop.f32.mrb[2].mxu0  ;;  %v831_v50 = vpop.f32.mrb[2].mxu1 }
 0x212   :  { %v2897_v53 = vadd.f32 %v760_v47, %v3650_v37  ;;  %v762_v56 = vpop.f32.mrb[3].mxu0  ;;  %v833_v60 = vpop.f32.mrb[3].mxu1  ;;  %v2913_v13 = vadd.f32 %v831_v50, %v3659_v61  ;;  %v1121_v47 = vld [vmem:[%s4266_s4 + $0x68] sm:$0xff]  ;;  %v1119_v50 = vld [vmem:[%s4266_s4 + $0x58] sm:$0xff] }
 0x213   :  { %v2898_v63 = vadd.f32 %v762_v56, %v3652_v42  ;;  %v2914_v10 = vadd.f32 %v833_v60, %v3655_v49  ;;  %v1123_v56 = vld [vmem:[%s4266_s4 + $0x78] sm:$0xff]  ;;  %v1116_v60 = vld [vmem:[%s4266_s4 + $0x40] sm:$0xff] }
 0x214   :  { %v840_v2 = vmul.f32 0.5, %v2897_v53  ;;  %v842_v39 = vmul.f32 0.5, %v2913_v13  ;;  %v3761_v53 = vpack.c.bf16 %v1121_v47, %v1117_v35  ;;  %v1122_v13 = vld [vmem:[%s4266_s4 + $0x70] sm:$0xff]  ;;  %v1371_v35 = vld [vmem:[%s4266_s4 + $0xc0] sm:$0xff] }
 0x215   :  { %v841_v6 = vmul.f32 0.5, %v2898_v63  ;;  %v1120_v63 = vld [vmem:[%s4266_s4 + $0x60] sm:$0xff] }
 0x216   :  { %2970 = vtanh.f32 %v840_v2  ;;  %v3772_v2 = vpack.c.bf16 %v1123_v56, %v1119_v50  ;;  %v1375_v47 = vld [vmem:[%s4266_s4 + $0xe0] sm:$0xff]  ;;  %v3889_v50 = vpack.c.bf16 %v1378_v33, %v1374_v24  ;;  %v1408_v24 = vld [vmem:[%s4266_s4 + $0x1e8] sm:$0xff] }
 0x217   :  { %2972 = vtanh.f32 %v841_v6  ;;  %v3774_v6 = vpack.c.bf16 %v1120_v63, %v1116_v60  ;;  %v3891_v56 = vpack.c.bf16 %v1375_v47, %v1371_v35  ;;  %v1373_v60 = vld [vmem:[%s4266_s4 + $0xd0] sm:$0xff]  ;;  %v1406_v47 = vld [vmem:[%s4266_s4 + $0x1d8] sm:$0xff] }
 0x218   :  { %2974 = vtanh.f32 %v2914_v10  ;;  %v1118_v10 = vld [vmem:[%s4266_s4 + $0x50] sm:$0xff] }
 0x219   :  { %2976 = vtanh.f32 %v842_v39  ;;  %v3783_v39 = vpack.c.bf16 %v1122_v13, %v1118_v10  ;;  %v1377_v63 = vld [vmem:[%s4266_s4 + $0xf0] sm:$0xff]  ;;  %v1380_v13 = vld [vmem:[%s4266_s4 + $0x108] sm:$0xff] }
 0x21a   :  { %v3900_v10 = vpack.c.bf16 %v1377_v63, %v1373_v60  ;;  %v1410_v60 = vld [vmem:[%s4266_s4 + $0x1f8] sm:$0xff]  ;;  %v1403_v63 = vld [vmem:[%s4266_s4 + $0x1c0] sm:$0xff] }
 0x220   :  { %v2971_v43 = vpop.eup %2970 }
 0x221   :  { %v846_v45 = vmul.f32 0.5, %v2971_v43  ;;  %v2973_v46 = vpop.eup %2972  ;;  %v1125_v43 = vld [vmem:[%s4266_s4 + $0x88] sm:$0xff] }
 0x222   :  { %v847_v41 = vmul.f32 0.5, %v2973_v46  ;;  %v2975_v51 = vpop.eup %2974  ;;  %v1127_v46 = vld [vmem:[%s4266_s4 + $0x98] sm:$0xff] }
 0x223   :  { %v849_v38 = vadd.f32 0.5, %v846_v45  ;;  %v2977_v0 = vpop.eup %2976  ;;  %v1129_v45 = vld [vmem:[%s4266_s4 + $0xa8] sm:$0xff] }
 0x224   :  { %v850_v52 = vadd.f32 0.5, %v847_v41  ;;  %v848_v1 = vmul.f32 0.5, %v2977_v0  ;;  %v1131_v41 = vld [vmem:[%s4266_s4 + $0xb8] sm:$0xff]  ;;  %v1126_v0 = vld [vmem:[%s4266_s4 + $0x90] sm:$0xff] }
 0x225   :  { %v854_v55 = vmul.f32 %v2975_v51, %v849_v38  ;;  %v3797_v38 = vpack.c.bf16 %v1129_v45, %v1125_v43  ;;  %v1124_v51 = vld [vmem:[%s4266_s4 + $0x80] sm:$0xff]  ;;  %v1384_v43 = vld [vmem:[%s4266_s4 + $0x128] sm:$0xff]  ;;  %v1382_v45 = vld [vmem:[%s4266_s4 + $0x118] sm:$0xff] }
 0x226   :  { %v853_v57 = vmul.f32 %v850_v52, %v3665_v28  ;;  %v851_v5 = vadd.f32 0.5, %v848_v1  ;;  %v3736_v28 = vpack.c.bf16 %v1115_v20, %v1111_v15  ;;  %v1128_v52 = vld [vmem:[%s4266_s4 + $0xa0] sm:$0xff]  ;;  %v1130_v1 = vld [vmem:[%s4266_s4 + $0xb0] sm:$0xff] }
 0x228   :  { %v3708_v59 = vadd.f32 %v854_v55, %v853_v57  ;;  %2608 = vmatprep.subr.bf16.mxu1 %v3736_v28  ;;  %v3808_v55 = vpack.c.bf16 %v1131_v41, %v1127_v46  ;;  %v3810_v57 = vpack.c.bf16 %v1128_v52, %v1124_v51  ;;  %v3914_v46 = vpack.c.bf16 %v1384_v43, %v1380_v13  ;;  %v1386_v41 = vld [vmem:[%s4266_s4 + $0x138] sm:$0xff]  ;;  %v1379_v51 = vld [vmem:[%s4266_s4 + $0x100] sm:$0xff] }
 0x229   :  { %v1383_v52 = vld [vmem:[%s4266_s4 + $0x120] sm:$0xff]  ;;  %v4028_v13 = vpack.c.bf16 %v1410_v60, %v1406_v47 }
 0x22a   :  { %2978 = vtanh.f32 %v3708_v59  ;;  %v1407_v43 = vld [vmem:[%s4266_s4 + $0x1e0] sm:$0xff] }
 0x234   :  { %v2979_v7 = vpop.eup %2978 }
 0x235   :  { %v857_v8 = vmul.f32 %v2979_v7, %v851_v5  ;;  %v3819_v5 = vpack.c.bf16 %v1130_v1, %v1126_v0  ;;  %v3925_v0 = vpack.c.bf16 %v1386_v41, %v1382_v45  ;;  %v3927_v1 = vpack.c.bf16 %v1383_v52, %v1379_v51  ;;  %v1405_v45 = vld [vmem:[%s4266_s4 + $0x1d0] sm:$0xff] }
 0x236   :  { %v1409_v41 = vld [vmem:[%s4266_s4 + $0x1f0] sm:$0xff]  ;;  %v4040_v51 = vpack.c.bf16 %v1407_v43, %v1403_v63 }
 0x237   :  { %2312 = vst [vmem:[%s4271_s6 + $0x8] sm:$0xff] %v857_v8  ;;  %998 = vmatmul.mubr.f32.vlgmr.msra.gmra.mrb[4].mxu0 %v857_v8  ;;  %1069 = vmatmul.mubr.f32.vlgmr.msra.gmra.mrb[4].mxu1 %v857_v8  ;;  %v4044_v52 = vpack.c.bf16 %v1409_v41, %v1405_v45 }
 0x238   :  { %1236 = vmatprep.mubr.f32.mxu0 %v3040_v3  ;;  %1307 = vmatprep.mubr.f32.mxu1 %v3040_v3 }
 0x239   :  { %2578 = vmatpush1.bf16.msra.mxu0 %v3738_v30  ;;  %2610 = vmatpush1.bf16.msra.mxu1 %v3747_v34 }
 0x23a   :  { %2580 = vmatprep.subr.bf16.mxu0 %v3761_v53  ;;  %2612 = vmatprep.subr.bf16.mxu1 %v3772_v2 }
 0x23d   :  { %2582 = vmatpush1.bf16.msra.mxu0 %v3774_v6  ;;  %2614 = vmatpush1.bf16.msra.mxu1 %v3783_v39 }
 0x23e   :  { %2584 = vmatprep.subr.bf16.mxu0 %v3797_v38  ;;  %2616 = vmatprep.subr.bf16.mxu1 %v3808_v55 }
 0x241   :  { %2586 = vmatpush1.bf16.msra.mxu0 %v3810_v57  ;;  %2618 = vmatpush1.bf16.msra.mxu1 %v3819_v5 }
 0x242   :  { %2588 = vmatprep.subr.bf16.mxu0 %v3416_v16  ;;  %2620 = vmatprep.subr.bf16.mxu1 %v3425_v19 }
 0x245   :  { %2590 = vmatpush1.bf16.msra.mxu0 %v3437_v23  ;;  %2622 = vmatpush1.bf16.msra.mxu1 %v3447_v26 }
 0x246   :  { %2592 = vmatprep.subr.bf16.mxu0 %v3457_v29  ;;  %2624 = vmatprep.subr.bf16.mxu1 %v3466_v32 }
 0x249   :  { %2594 = vmatpush1.bf16.msra.mxu0 %v3478_v36  ;;  %2626 = vmatpush1.bf16.msra.mxu1 %v3488_v40 }
 0x24a   :  { %2596 = vmatprep.subr.bf16.mxu0 %v3498_v44  ;;  %2628 = vmatprep.subr.bf16.mxu1 %v3507_v48 }
 0x24d   :  { %2598 = vmatpush1.bf16.msra.mxu0 %v3519_v54  ;;  %2630 = vmatpush1.bf16.msra.mxu1 %v3529_v58 }
 0x24e   :  { %2600 = vmatprep.subr.bf16.mxu0 %v3539_v62  ;;  %2632 = vmatprep.subr.bf16.mxu1 %v3548_v4 }
 0x251   :  { %2602 = vmatpush1.bf16.msra.mxu0 %v3560_v9  ;;  %2634 = vmatpush1.bf16.msra.mxu1 %v3570_v14 }
 0x252   :  { %2604 = vmatprep.subr.bf16.mxu0 %v3580_v18  ;;  %2636 = vmatprep.subr.bf16.mxu1 %v3589_v22 }
 0x255   :  { %2606 = vmatpush1.bf16.msra.mxu0 %v3595_v25  ;;  %2638 = vmatpush1.bf16.msra.mxu1 %v3599_v27 }
 0x256   :  { %2640 = vmatprep.subr.bf16.mxu0 %v3725_v17  ;;  %2672 = vmatprep.subr.bf16.mxu1 %v3736_v28 }
 0x30a   :  { %v999_v16 = vpop.f32.mrb[4].mxu0  ;;  %v1070_v19 = vpop.f32.mrb[4].mxu1 }
 0x30b   :  { %v2899_v23 = vadd.f32 %v999_v16, %v3650_v37  ;;  %v1001_v26 = vpop.f32.mrb[5].mxu0  ;;  %v1072_v29 = vpop.f32.mrb[5].mxu1  ;;  %v2915_v48 = vadd.f32 %v1070_v19, %v3659_v61  ;;  %v1381_v16 = vld [vmem:[%s4266_s4 + $0x110] sm:$0xff] }
 0x30c   :  { %v2900_v32 = vadd.f32 %v1001_v26, %v3652_v42  ;;  %v2916_v44 = vadd.f32 %v1072_v29, %v3655_v49  ;;  %v1385_v19 = vld [vmem:[%s4266_s4 + $0x130] sm:$0xff]  ;;  %v1388_v26 = vld [vmem:[%s4266_s4 + $0x148] sm:$0xff] }
 0x30d   :  { %v1079_v36 = vmul.f32 0.5, %v2899_v23  ;;  %v1081_v54 = vmul.f32 0.5, %v2915_v48  ;;  %v3936_v23 = vpack.c.bf16 %v1385_v19, %v1381_v16  ;;  %v1392_v29 = vld [vmem:[%s4266_s4 + $0x168] sm:$0xff]  ;;  %v1391_v48 = vld [vmem:[%s4266_s4 + $0x160] sm:$0xff] }
 0x30e   :  { %v1080_v40 = vmul.f32 0.5, %v2900_v32  ;;  %v1390_v32 = vld [vmem:[%s4266_s4 + $0x158] sm:$0xff] }
 0x30f   :  { %2980 = vtanh.f32 %v1079_v36  ;;  %v3950_v36 = vpack.c.bf16 %v1392_v29, %v1388_v26 }
 0x310   :  { %2982 = vtanh.f32 %v1080_v40  ;;  %v1394_v40 = vld [vmem:[%s4266_s4 + $0x178] sm:$0xff] }
 0x311   :  { %2984 = vtanh.f32 %v2916_v44  ;;  %v1387_v44 = vld [vmem:[%s4266_s4 + $0x140] sm:$0xff] }
 0x312   :  { %2986 = vtanh.f32 %v1081_v54  ;;  %v3961_v54 = vpack.c.bf16 %v1394_v40, %v1390_v32 }
 0x319   :  { %v2981_v58 = vpop.eup %2980 }
 0x31a   :  { %v1085_v62 = vmul.f32 0.5, %v2981_v58  ;;  %v2983_v4 = vpop.eup %2982  ;;  %v3963_v58 = vpack.c.bf16 %v1391_v48, %v1387_v44 }
 0x31b   :  { %v1086_v14 = vmul.f32 0.5, %v2983_v4  ;;  %v2985_v18 = vpop.eup %2984  ;;  %v1393_v4 = vld [vmem:[%s4266_s4 + $0x170] sm:$0xff] }
 0x31c   :  { %v1088_v9 = vadd.f32 0.5, %v1085_v62  ;;  %v2987_v8 = vpop.eup %2986  ;;  %v1389_v62 = vld [vmem:[%s4266_s4 + $0x150] sm:$0xff] }
 0x31d   :  { %v1089_v22 = vadd.f32 0.5, %v1086_v14  ;;  %v1087_v11 = vmul.f32 0.5, %v2987_v8  ;;  %v3975_v14 = vpack.c.bf16 %v1393_v4, %v1389_v62 }
 0x31e   :  { %v1093_v25 = vmul.f32 %v2985_v18, %v1088_v9  ;;  %v1396_v9 = vld [vmem:[%s4266_s4 + $0x188] sm:$0xff] }
 0x31f   :  { %v1092_v27 = vmul.f32 %v1089_v22, %v3708_v59  ;;  %v1090_v12 = vadd.f32 0.5, %v1087_v11  ;;  %v1372_v59 = vld [vmem:[%s4266_s4 + $0xc8] sm:$0xff]  ;;  %v1398_v22 = vld [vmem:[%s4266_s4 + $0x198] sm:$0xff]  ;;  %v1395_v11 = vld [vmem:[%s4266_s4 + $0x180] sm:$0xff] }
 0x320   :  { %v3878_v31 = vpack.c.bf16 %v1376_v21, %v1372_v59  ;;  %v1400_v18 = vld [vmem:[%s4266_s4 + $0x1a8] sm:$0xff]  ;;  %v1401_v59 = vld [vmem:[%s4266_s4 + $0x1b0] sm:$0xff] }
 0x321   :  { %v3851_v7 = vadd.f32 %v1093_v25, %v1092_v27  ;;  %v1402_v25 = vld [vmem:[%s4266_s4 + $0x1b8] sm:$0xff]  ;;  %v3988_v27 = vpack.c.bf16 %v1400_v18, %v1396_v9  ;;  %v1404_v21 = vld [vmem:[%s4266_s4 + $0x1c8] sm:$0xff] }
 0x322   :  { %v3990_v8 = vpack.c.bf16 %v1402_v25, %v1398_v22  ;;  %v4017_v35 = vpack.c.bf16 %v1408_v24, %v1404_v21 }
 0x323   :  { %2988 = vtanh.f32 %v3851_v7 }
 0x32d   :  { %v2989_v15 = vpop.eup %2988 }
 0x32e   :  { %v1096_v20 = vmul.f32 %v2989_v15, %v1090_v12  ;;  %v1399_v12 = vld [vmem:[%s4266_s4 + $0x1a0] sm:$0xff]  ;;  %v1397_v15 = vld [vmem:[%s4266_s4 + $0x190] sm:$0xff] }
 0x32f   :  { %v4015_v33 = vpack.c.bf16 %v1401_v59, %v1397_v15 }
 0x330   :  { %2313 = vst [vmem:[%s4271_s6 + $0x10] sm:$0xff] %v1096_v20  ;;  %1237 = vmatmul.mubr.f32.vlgmr.msra.gmra.mrb[6].mxu0 %v1096_v20  ;;  %1308 = vmatmul.mubr.f32.vlgmr.msra.gmra.mrb[6].mxu1 %v1096_v20  ;;  %v4002_v20 = vpack.c.bf16 %v1399_v12, %v1395_v11 }
 0x331   :  { %2642 = vmatpush1.bf16.msra.mxu0 %v3738_v30  ;;  %2674 = vmatpush1.bf16.msra.mxu1 %v3747_v34 }
 0x332   :  { %2644 = vmatprep.subr.bf16.mxu0 %v3761_v53  ;;  %2676 = vmatprep.subr.bf16.mxu1 %v3772_v2 }
 0x333   :  { %1475 = vmatprep.mubr.f32.mxu0 %v3040_v3  ;;  %1546 = vmatprep.mubr.f32.mxu1 %v3040_v3 }
 0x335   :  { %2646 = vmatpush1.bf16.msra.mxu0 %v3774_v6  ;;  %2678 = vmatpush1.bf16.msra.mxu1 %v3783_v39 }
 0x336   :  { %2648 = vmatprep.subr.bf16.mxu0 %v3797_v38  ;;  %2680 = vmatprep.subr.bf16.mxu1 %v3808_v55 }
 0x339   :  { %2650 = vmatpush1.bf16.msra.mxu0 %v3810_v57  ;;  %2682 = vmatpush1.bf16.msra.mxu1 %v3819_v5 }
 0x33a   :  { %2652 = vmatprep.subr.bf16.mxu0 %v3878_v31  ;;  %2684 = vmatprep.subr.bf16.mxu1 %v3889_v50 }
 0x33d   :  { %2654 = vmatpush1.bf16.msra.mxu0 %v3891_v56  ;;  %2686 = vmatpush1.bf16.msra.mxu1 %v3900_v10 }
 0x33e   :  { %2656 = vmatprep.subr.bf16.mxu0 %v3914_v46  ;;  %2688 = vmatprep.subr.bf16.mxu1 %v3925_v0 }
 0x341   :  { %2658 = vmatpush1.bf16.msra.mxu0 %v3927_v1  ;;  %2690 = vmatpush1.bf16.msra.mxu1 %v3936_v23 }
 0x342   :  { %2660 = vmatprep.subr.bf16.mxu0 %v3950_v36  ;;  %2692 = vmatprep.subr.bf16.mxu1 %v3961_v54 }
 0x345   :  { %2662 = vmatpush1.bf16.msra.mxu0 %v3963_v58  ;;  %2694 = vmatpush1.bf16.msra.mxu1 %v3975_v14 }
 0x346   :  { %2664 = vmatprep.subr.bf16.mxu0 %v3988_v27  ;;  %2696 = vmatprep.subr.bf16.mxu1 %v3990_v8 }
 0x349   :  { %2666 = vmatpush1.bf16.msra.mxu0 %v4002_v20  ;;  %2698 = vmatpush1.bf16.msra.mxu1 %v4015_v33 }
 0x34a   :  { %2668 = vmatprep.subr.bf16.mxu0 %v4017_v35  ;;  %2700 = vmatprep.subr.bf16.mxu1 %v4028_v13 }
 0x34d   :  { %2670 = vmatpush1.bf16.msra.mxu0 %v4040_v51  ;;  %2702 = vmatpush1.bf16.msra.mxu1 %v4044_v52 }
 0x34e   :  { %2704 = vmatprep.subr.bf16.mxu0 %v3725_v17  ;;  %2736 = vmatprep.subr.bf16.mxu1 %v3736_v28 }
 0x403   :  { %v1238_v16 = vpop.f32.mrb[6].mxu0  ;;  %v1309_v19 = vpop.f32.mrb[6].mxu1 }
 0x404   :  { %v2901_v26 = vadd.f32 %v1238_v16, %v3650_v37  ;;  %v1240_v29 = vpop.f32.mrb[7].mxu0  ;;  %v1311_v32 = vpop.f32.mrb[7].mxu1  ;;  %v2917_v4 = vadd.f32 %v1309_v19, %v3659_v61 }
 0x405   :  { %v2902_v40 = vadd.f32 %v1240_v29, %v3652_v42  ;;  %v2918_v62 = vadd.f32 %v1311_v32, %v3655_v49 }
 0x406   :  { %v1318_v44 = vmul.f32 0.5, %v2901_v26  ;;  %v1320_v9 = vmul.f32 0.5, %v2917_v4 }
 0x407   :  { %v1319_v48 = vmul.f32 0.5, %v2902_v40 }
 0x408   :  { %2990 = vtanh.f32 %v1318_v44 }
 0x409   :  { %2992 = vtanh.f32 %v1319_v48 }
 0x40a   :  { %2994 = vtanh.f32 %v2918_v62 }
 0x40b   :  { %2996 = vtanh.f32 %v1320_v9 }
 0x412   :  { %v2991_v18 = vpop.eup %2990 }
 0x413   :  { %v1324_v22 = vmul.f32 0.5, %v2991_v18  ;;  %v2993_v25 = vpop.eup %2992 }
 0x414   :  { %v1325_v12 = vmul.f32 0.5, %v2993_v25  ;;  %v2995_v15 = vpop.eup %2994 }
 0x415   :  { %v1327_v11 = vadd.f32 0.5, %v1324_v22  ;;  %v2997_v60 = vpop.eup %2996 }
 0x416   :  { %v1328_v59 = vadd.f32 0.5, %v1325_v12  ;;  %v1326_v63 = vmul.f32 0.5, %v2997_v60 }
 0x417   :  { %v1332_v21 = vmul.f32 %v2995_v15, %v1327_v11 }
 0x418   :  { %v1331_v24 = vmul.f32 %v1328_v59, %v3851_v7  ;;  %v1329_v43 = vadd.f32 0.5, %v1326_v63 }
 0x41a   :  { %v4056_v47 = vadd.f32 %v1332_v21, %v1331_v24 }
 0x41c   :  { %2998 = vtanh.f32 %v4056_v47 }
 0x426   :  { %v2999_v45 = vpop.eup %2998 }
 0x427   :  { %v1335_v41 = vmul.f32 %v2999_v45, %v1329_v43 }
 0x429   :  { %2314 = vst [vmem:[%s4271_s6 + $0x18] sm:$0xff] %v1335_v41  ;;  %1476 = vmatmul.mubr.f32.vlgmr.msra.gmra.mrb[8].mxu0 %v1335_v41  ;;  %1547 = vmatmul.mubr.f32.vlgmr.msra.gmra.mrb[8].mxu1 %v1335_v41 }
 0x42a   :  { %2706 = vmatpush1.bf16.msra.mxu0 %v3738_v30  ;;  %2738 = vmatpush1.bf16.msra.mxu1 %v3747_v34 }
 0x42b   :  { %2708 = vmatprep.subr.bf16.mxu0 %v3761_v53  ;;  %2740 = vmatprep.subr.bf16.mxu1 %v3772_v2 }
 0x42c   :  { %1714 = vmatprep.mubr.f32.mxu0 %v3040_v3  ;;  %1785 = vmatprep.mubr.f32.mxu1 %v3040_v3 }
 0x42e   :  { %2710 = vmatpush1.bf16.msra.mxu0 %v3774_v6  ;;  %2742 = vmatpush1.bf16.msra.mxu1 %v3783_v39 }
 0x42f   :  { %2712 = vmatprep.subr.bf16.mxu0 %v3797_v38  ;;  %2744 = vmatprep.subr.bf16.mxu1 %v3808_v55 }
 0x432   :  { %2714 = vmatpush1.bf16.msra.mxu0 %v3810_v57  ;;  %2746 = vmatpush1.bf16.msra.mxu1 %v3819_v5 }
 0x433   :  { %2716 = vmatprep.subr.bf16.mxu0 %v3878_v31  ;;  %2748 = vmatprep.subr.bf16.mxu1 %v3889_v50 }
 0x436   :  { %2718 = vmatpush1.bf16.msra.mxu0 %v3891_v56  ;;  %2750 = vmatpush1.bf16.msra.mxu1 %v3900_v10 }
 0x437   :  { %2720 = vmatprep.subr.bf16.mxu0 %v3914_v46  ;;  %2752 = vmatprep.subr.bf16.mxu1 %v3925_v0 }
 0x43a   :  { %2722 = vmatpush1.bf16.msra.mxu0 %v3927_v1  ;;  %2754 = vmatpush1.bf16.msra.mxu1 %v3936_v23 }
 0x43b   :  { %2724 = vmatprep.subr.bf16.mxu0 %v3950_v36  ;;  %2756 = vmatprep.subr.bf16.mxu1 %v3961_v54 }
 0x43e   :  { %2726 = vmatpush1.bf16.msra.mxu0 %v3963_v58  ;;  %2758 = vmatpush1.bf16.msra.mxu1 %v3975_v14 }
 0x43f   :  { %2728 = vmatprep.subr.bf16.mxu0 %v3988_v27  ;;  %2760 = vmatprep.subr.bf16.mxu1 %v3990_v8 }
 0x442   :  { %2730 = vmatpush1.bf16.msra.mxu0 %v4002_v20  ;;  %2762 = vmatpush1.bf16.msra.mxu1 %v4015_v33 }
 0x443   :  { %2732 = vmatprep.subr.bf16.mxu0 %v4017_v35  ;;  %2764 = vmatprep.subr.bf16.mxu1 %v4028_v13 }
 0x446   :  { %2734 = vmatpush1.bf16.msra.mxu0 %v4040_v51  ;;  %2766 = vmatpush1.bf16.msra.mxu1 %v4044_v52 }
 0x447   :  { %2768 = vmatprep.subr.bf16.mxu0 %v3725_v17  ;;  %2800 = vmatprep.subr.bf16.mxu1 %v3736_v28 }
 0x4fc   :  { %v1477_v7 = vpop.f32.mrb[8].mxu0  ;;  %v1548_v16 = vpop.f32.mrb[8].mxu1 }
 0x4fd   :  { %v2903_v19 = vadd.f32 %v1477_v7, %v3650_v37  ;;  %v1479_v26 = vpop.f32.mrb[9].mxu0  ;;  %v1550_v29 = vpop.f32.mrb[9].mxu1  ;;  %v2919_v62 = vadd.f32 %v1548_v16, %v3659_v61 }
 0x4fe   :  { %v2904_v32 = vadd.f32 %v1479_v26, %v3652_v42  ;;  %v2920_v48 = vadd.f32 %v1550_v29, %v3655_v49 }
 0x4ff   :  { %v1557_v40 = vmul.f32 0.5, %v2903_v19  ;;  %v1559_v17 = vmul.f32 0.5, %v2919_v62 }
 0x500   :  { %v1558_v44 = vmul.f32 0.5, %v2904_v32 }
 0x501   :  { %3000 = vtanh.f32 %v1557_v40 }
 0x502   :  { %3002 = vtanh.f32 %v1558_v44 }
 0x503   :  { %3004 = vtanh.f32 %v2920_v48 }
 0x504   :  { %3006 = vtanh.f32 %v1559_v17 }
 0x50b   :  { %v3001_v4 = vpop.eup %3000 }
 0x50c   :  { %v1563_v28 = vmul.f32 0.5, %v3001_v4  ;;  %v3003_v9 = vpop.eup %3002 }
 0x50d   :  { %v1564_v22 = vmul.f32 0.5, %v3003_v9  ;;  %v3005_v25 = vpop.eup %3004  ;;  %v2065_v9 = vld [vmem:[%s4266_s4 + $0x8] sm:$0xff] }
 0x50e   :  { %v1566_v18 = vadd.f32 0.5, %v1563_v28  ;;  %v3007_v21 = vpop.eup %3006 }
 0x50f   :  { %v1567_v11 = vadd.f32 0.5, %v1564_v22  ;;  %v1565_v24 = vmul.f32 0.5, %v3007_v21  ;;  %v2067_v22 = vld [vmem:[%s4266_s4 + $0x18] sm:$0xff]  ;;  %v2066_v21 = vld [vmem:[%s4266_s4 + $0x10] sm:$0xff] }
 0x510   :  { %v1571_v12 = vmul.f32 %v3005_v25, %v1566_v18  ;;  %v2069_v18 = vld [vmem:[%s4266_s4 + $0x28] sm:$0xff] }
 0x511   :  { %v1570_v15 = vmul.f32 %v1567_v11, %v4056_v47  ;;  %v1568_v60 = vadd.f32 0.5, %v1565_v24  ;;  %v2831_v25 = vpack.c.bf16 %v2069_v18, %v2065_v9  ;;  %v2071_v11 = vld [vmem:[%s4266_s4 + $0x38] sm:$0xff]  ;;  %v2070_v24 = vld [vmem:[%s4266_s4 + $0x30] sm:$0xff] }
 0x513   :  { %v4101_v59 = vadd.f32 %v1571_v12, %v1570_v15  ;;  %v2068_v12 = vld [vmem:[%s4266_s4 + $0x20] sm:$0xff]  ;;  %v2863_v15 = vpack.c.bf16 %v2071_v11, %v2067_v22 }
 0x515   :  { %3008 = vtanh.f32 %v4101_v59 }
 0x51f   :  { %v3009_v63 = vpop.eup %3008 }
 0x520   :  { %v1574_v43 = vmul.f32 %v3009_v63, %v1568_v60  ;;  %v2865_v60 = vpack.c.bf16 %v2070_v24, %v2066_v21  ;;  %v2073_v63 = vld [vmem:[%s4266_s4 + $0x48] sm:$0xff] }
 0x522   :  { %2315 = vst [vmem:[%s4271_s6 + $0x20] sm:$0xff] %v1574_v43  ;;  %1715 = vmatmul.mubr.f32.vlgmr.msra.gmra.mrb[10].mxu0 %v1574_v43  ;;  %1786 = vmatmul.mubr.f32.vlgmr.msra.gmra.mrb[10].mxu1 %v1574_v43  ;;  %v2077_v43 = vld [vmem:[%s4266_s4 + $0x68] sm:$0xff] }
 0x523   :  { %2770 = vmatpush1.bf16.msra.mxu0 %v3738_v30  ;;  %2802 = vmatpush1.bf16.msra.mxu1 %v3747_v34 }
 0x524   :  { %2772 = vmatprep.subr.bf16.mxu0 %v3761_v53  ;;  %2804 = vmatprep.subr.bf16.mxu1 %v3772_v2 }
 0x525   :  { %1953 = vmatprep.mubr.f32.mxu0 %v3040_v3  ;;  %2024 = vmatprep.mubr.f32.mxu1 %v3040_v3 }
 0x527   :  { %2774 = vmatpush1.bf16.msra.mxu0 %v3774_v6  ;;  %2806 = vmatpush1.bf16.msra.mxu1 %v3783_v39 }
 0x528   :  { %2776 = vmatprep.subr.bf16.mxu0 %v3797_v38  ;;  %2808 = vmatprep.subr.bf16.mxu1 %v3808_v55 }
 0x52b   :  { %2778 = vmatpush1.bf16.msra.mxu0 %v3810_v57  ;;  %2810 = vmatpush1.bf16.msra.mxu1 %v3819_v5 }
 0x52c   :  { %2780 = vmatprep.subr.bf16.mxu0 %v3878_v31  ;;  %2812 = vmatprep.subr.bf16.mxu1 %v3889_v50 }
 0x52f   :  { %2782 = vmatpush1.bf16.msra.mxu0 %v3891_v56  ;;  %2814 = vmatpush1.bf16.msra.mxu1 %v3900_v10 }
 0x530   :  { %2784 = vmatprep.subr.bf16.mxu0 %v3914_v46  ;;  %2816 = vmatprep.subr.bf16.mxu1 %v3925_v0 }
 0x533   :  { %2786 = vmatpush1.bf16.msra.mxu0 %v3927_v1  ;;  %2818 = vmatpush1.bf16.msra.mxu1 %v3936_v23 }
 0x534   :  { %2788 = vmatprep.subr.bf16.mxu0 %v3950_v36  ;;  %2820 = vmatprep.subr.bf16.mxu1 %v3961_v54 }
 0x537   :  { %2790 = vmatpush1.bf16.msra.mxu0 %v3963_v58  ;;  %2822 = vmatpush1.bf16.msra.mxu1 %v3975_v14 }
 0x538   :  { %2792 = vmatprep.subr.bf16.mxu0 %v3988_v27  ;;  %2824 = vmatprep.subr.bf16.mxu1 %v3990_v8 }
 0x53b   :  { %2794 = vmatpush1.bf16.msra.mxu0 %v4002_v20  ;;  %2826 = vmatpush1.bf16.msra.mxu1 %v4015_v33 }
 0x53c   :  { %2796 = vmatprep.subr.bf16.mxu0 %v4017_v35  ;;  %2828 = vmatprep.subr.bf16.mxu1 %v4028_v13 }
 0x53f   :  { %2798 = vmatpush1.bf16.msra.mxu0 %v4040_v51  ;;  %2830 = vmatpush1.bf16.msra.mxu1 %v4044_v52 }
 0x540   :  { %2832 = vmatprep.subr.bf16.mxu0 %v2831_v25  ;;  %2864 = vmatprep.subr.bf16.mxu1 %v2863_v15 }
 0x5f5   :  { %v1716_v30 = vpop.f32.mrb[10].mxu0  ;;  %v1787_v34 = vpop.f32.mrb[10].mxu1 }
 0x5f6   :  { %v2905_v53 = vadd.f32 %v1716_v30, %v3650_v37  ;;  %v1718_v2 = vpop.f32.mrb[11].mxu0  ;;  %v1789_v6 = vpop.f32.mrb[11].mxu1  ;;  %v2921_v5 = vadd.f32 %v1787_v34, %v3659_v61  ;;  %v2075_v30 = vld [vmem:[%s4266_s4 + $0x58] sm:$0xff]  ;;  %v2835_v34 = vpack.c.bf16 %v2077_v43, %v2073_v63 }
 0x5f7   :  { %v2906_v39 = vadd.f32 %v1718_v2, %v3652_v42  ;;  %v2922_v57 = vadd.f32 %v1789_v6, %v3655_v49  ;;  %v2072_v2 = vld [vmem:[%s4266_s4 + $0x40] sm:$0xff] }
 0x5f8   :  { %v1796_v38 = vmul.f32 0.5, %v2905_v53  ;;  %v1798_v47 = vmul.f32 0.5, %v2921_v5  ;;  %v2079_v53 = vld [vmem:[%s4266_s4 + $0x78] sm:$0xff]  ;;  %v2076_v6 = vld [vmem:[%s4266_s4 + $0x60] sm:$0xff] }
 0x5f9   :  { %v1797_v55 = vmul.f32 0.5, %v2906_v39  ;;  %v2867_v39 = vpack.c.bf16 %v2079_v53, %v2075_v30 }
 0x5fa   :  { %3010 = vtanh.f32 %v1796_v38  ;;  %v2837_v38 = vpack.c.bf16 %v2076_v6, %v2072_v2 }
 0x5fb   :  { %3012 = vtanh.f32 %v1797_v55  ;;  %v2074_v55 = vld [vmem:[%s4266_s4 + $0x50] sm:$0xff] }
 0x5fc   :  { %3014 = vtanh.f32 %v2922_v57  ;;  %v2078_v57 = vld [vmem:[%s4266_s4 + $0x70] sm:$0xff] }
 0x5fd   :  { %3016 = vtanh.f32 %v1798_v47  ;;  %v2869_v5 = vpack.c.bf16 %v2078_v57, %v2074_v55  ;;  %v2081_v47 = vld [vmem:[%s4266_s4 + $0x88] sm:$0xff] }
 0x604   :  { %v3011_v45 = vpop.eup %3010 }
 0x605   :  { %v1802_v41 = vmul.f32 0.5, %v3011_v45  ;;  %v3013_v7 = vpop.eup %3012  ;;  %v2085_v45 = vld [vmem:[%s4266_s4 + $0xa8] sm:$0xff] }
 0x606   :  { %v1803_v19 = vmul.f32 0.5, %v3013_v7  ;;  %v3015_v26 = vpop.eup %3014  ;;  %v2839_v7 = vpack.c.bf16 %v2085_v45, %v2081_v47 }
 0x607   :  { %v1805_v16 = vadd.f32 0.5, %v1802_v41  ;;  %v3017_v48 = vpop.eup %3016  ;;  %v2083_v41 = vld [vmem:[%s4266_s4 + $0x98] sm:$0xff] }
 0x608   :  { %v1806_v29 = vadd.f32 0.5, %v1803_v19  ;;  %v1804_v62 = vmul.f32 0.5, %v3017_v48  ;;  %v2080_v19 = vld [vmem:[%s4266_s4 + $0x80] sm:$0xff]  ;;  %v2086_v48 = vld [vmem:[%s4266_s4 + $0xb0] sm:$0xff] }
 0x609   :  { %v1810_v32 = vmul.f32 %v3015_v26, %v1805_v16  ;;  %v2087_v16 = vld [vmem:[%s4266_s4 + $0xb8] sm:$0xff]  ;;  %v2084_v26 = vld [vmem:[%s4266_s4 + $0xa0] sm:$0xff] }
 0x60a   :  { %v1809_v40 = vmul.f32 %v1806_v29, %v4101_v59  ;;  %v1807_v17 = vadd.f32 0.5, %v1804_v62  ;;  %v2871_v29 = vpack.c.bf16 %v2087_v16, %v2083_v41 }
 0x60c   :  { %v4144_v44 = vadd.f32 %v1810_v32, %v1809_v40  ;;  %v2841_v32 = vpack.c.bf16 %v2084_v26, %v2080_v19  ;;  %v2082_v40 = vld [vmem:[%s4266_s4 + $0x90] sm:$0xff] }
 0x60d   :  { %v2873_v62 = vpack.c.bf16 %v2086_v48, %v2082_v40 }
 0x60e   :  { %3018 = vtanh.f32 %v4144_v44 }
 0x618   :  { %v3019_v4 = vpop.eup %3018 }
 0x619   :  { %v1813_v28 = vmul.f32 %v3019_v4, %v1807_v17 }
 0x61b   :  { %2316 = vst [vmem:[%s4271_s6 + $0x28] sm:$0xff] %v1813_v28  ;;  %1954 = vmatmul.mubr.f32.vlgmr.msra.gmra.mrb[12].mxu0 %v1813_v28  ;;  %2025 = vmatmul.mubr.f32.vlgmr.msra.gmra.mrb[12].mxu1 %v1813_v28 }
 0x61c   :  { %2192 = vmatprep.mubr.f32.mxu0 %v3040_v3  ;;  %2263 = vmatprep.mubr.f32.mxu1 %v3040_v3  ;;  %v2064_v3 = vld [vmem:[%s4266_s4] sm:$0xff] }
 0x61d   :  { %v2833_v59 = vpack.c.bf16 %v2068_v12, %v2064_v3  ;;  %2866 = vmatpush1.bf16.msra.mxu1 %v2865_v60 }
 0x61e   :  { %2868 = vmatprep.subr.bf16.mxu1 %v2867_v39 }
 0x61f   :  { %2834 = vmatpush1.bf16.msra.mxu0 %v2833_v59 }
 0x620   :  { %2836 = vmatprep.subr.bf16.mxu0 %v2835_v34 }
 0x621   :  { %2870 = vmatpush1.bf16.msra.mxu1 %v2869_v5 }
 0x622   :  { %2872 = vmatprep.subr.bf16.mxu1 %v2871_v29 }
 0x623   :  { %2838 = vmatpush1.bf16.msra.mxu0 %v2837_v38 }
 0x624   :  { %2840 = vmatprep.subr.bf16.mxu0 %v2839_v7 }
 0x625   :  { %2874 = vmatpush1.bf16.msra.mxu1 %v2873_v62 }
 0x626   :  { %2876 = vmatprep.subr.bf16.mxu1 %v3889_v50 }
 0x627   :  { %2842 = vmatpush1.bf16.msra.mxu0 %v2841_v32 }
 0x628   :  { %2844 = vmatprep.subr.bf16.mxu0 %v3878_v31 }
 0x629   :  { %2878 = vmatpush1.bf16.msra.mxu1 %v3900_v10 }
 0x62a   :  { %2880 = vmatprep.subr.bf16.mxu1 %v3925_v0 }
 0x62b   :  { %2846 = vmatpush1.bf16.msra.mxu0 %v3891_v56 }
 0x62c   :  { %2848 = vmatprep.subr.bf16.mxu0 %v3914_v46 }
 0x62d   :  { %2882 = vmatpush1.bf16.msra.mxu1 %v3936_v23 }
 0x62e   :  { %2884 = vmatprep.subr.bf16.mxu1 %v3961_v54 }
 0x62f   :  { %2850 = vmatpush1.bf16.msra.mxu0 %v3927_v1 }
 0x630   :  { %2852 = vmatprep.subr.bf16.mxu0 %v3950_v36 }
 0x631   :  { %2886 = vmatpush1.bf16.msra.mxu1 %v3975_v14 }
 0x632   :  { %2888 = vmatprep.subr.bf16.mxu1 %v3990_v8 }
 0x633   :  { %2854 = vmatpush1.bf16.msra.mxu0 %v3963_v58 }
 0x634   :  { %2856 = vmatprep.subr.bf16.mxu0 %v3988_v27 }
 0x635   :  { %2890 = vmatpush1.bf16.msra.mxu1 %v4015_v33 }
 0x636   :  { %2892 = vmatprep.subr.bf16.mxu1 %v4028_v13 }
 0x637   :  { %2858 = vmatpush1.bf16.msra.mxu0 %v4002_v20 }
 0x638   :  { %2860 = vmatprep.subr.bf16.mxu0 %v4017_v35 }
 0x639   :  { %2894 = vmatpush1.bf16.msra.mxu1 %v4044_v52 }
 0x63b   :  { %2862 = vmatpush1.bf16.msra.mxu0 %v4040_v51 }
 0x6ee   :  { %v1955_v31 = vpop.f32.mrb[12].mxu0  ;;  %v2026_v50 = vpop.f32.mrb[12].mxu1 }
 0x6ef   :  { %v2907_v56 = vadd.f32 %v1955_v31, %v3650_v37  ;;  %v1957_v10 = vpop.f32.mrb[13].mxu0  ;;  %v2028_v46 = vpop.f32.mrb[13].mxu1  ;;  %v2923_v54 = vadd.f32 %v2026_v50, %v3659_v61 }
 0x6f0   :  { %v2908_v0 = vadd.f32 %v1957_v10, %v3652_v42  ;;  %v2924_v36 = vadd.f32 %v2028_v46, %v3655_v49 }
 0x6f1   :  { %v2035_v1 = vmul.f32 0.5, %v2907_v56  ;;  %v2037_v58 = vmul.f32 0.5, %v2923_v54 }
 0x6f2   :  { %v2036_v23 = vmul.f32 0.5, %v2908_v0 }
 0x6f3   :  { %3020 = vtanh.f32 %v2035_v1 }
 0x6f4   :  { %3022 = vtanh.f32 %v2036_v23 }
 0x6f5   :  { %3024 = vtanh.f32 %v2924_v36 }
 0x6f6   :  { %3026 = vtanh.f32 %v2037_v58 }
 0x6fd   :  { %v3021_v14 = vpop.eup %3020 }
 0x6fe   :  { %v2041_v27 = vmul.f32 0.5, %v3021_v14  ;;  %v3023_v8 = vpop.eup %3022 }
 0x6ff   :  { %v2042_v33 = vmul.f32 0.5, %v3023_v8  ;;  %v3025_v35 = vpop.eup %3024 }
 0x700   :  { %v2044_v20 = vadd.f32 0.5, %v2041_v27  ;;  %v3027_v4 = vpop.eup %3026 }
 0x701   :  { %v2045_v13 = vadd.f32 0.5, %v2042_v33  ;;  %v2043_v28 = vmul.f32 0.5, %v3027_v4 }
 0x702   :  { %v2049_v51 = vmul.f32 %v3025_v35, %v2044_v20 }
 0x703   :  { %v2048_v52 = vmul.f32 %v2045_v13, %v4144_v44  ;;  %v2046_v9 = vadd.f32 0.5, %v2043_v28 }
 0x705   :  { %v2050_v17 = vadd.f32 %v2049_v51, %v2048_v52 }
 0x707   :  { %3028 = vtanh.f32 %v2050_v17 }
 0x711   :  { %v3029_v18 = vpop.eup %3028 }
 0x712   :  { %v2052_v22 = vmul.f32 %v3029_v18, %v2046_v9 }
 0x714   :  { %2317 = vst [vmem:[%s4271_s6 + $0x30] sm:$0xff] %v2052_v22  ;;  %2193 = vmatmul.mubr.f32.vlgmr.msra.gmra.mrb[14].mxu0 %v2052_v22  ;;  %2264 = vmatmul.mubr.f32.vlgmr.msra.gmra.mrb[14].mxu1 %v2052_v22 }
 0x7e7   :  { %v2194_v25 = vpop.f32.mrb[14].mxu0  ;;  %v2265_v11 = vpop.f32.mrb[14].mxu1 }
 0x7e8   :  { %v2909_v3 = vadd.f32 %v2194_v25, %v3650_v37  ;;  %v2196_v12 = vpop.f32.mrb[15].mxu0  ;;  %v2267_v15 = vpop.f32.mrb[15].mxu1  ;;  %v2925_v60 = vadd.f32 %v2265_v11, %v3659_v61 }
 0x7e9   :  { %v2910_v44 = vadd.f32 %v2196_v12, %v3652_v42  ;;  %v2926_v24 = vadd.f32 %v2267_v15, %v3655_v49 }
 0x7ea   :  { %v2274_v59 = vmul.f32 0.5, %v2909_v3  ;;  %v2276_v63 = vmul.f32 0.5, %v2925_v60 }
 0x7eb   :  { %v2275_v21 = vmul.f32 0.5, %v2910_v44 }
 0x7ec   :  { %3030 = vtanh.f32 %v2274_v59 }
 0x7ed   :  { %3032 = vtanh.f32 %v2275_v21 }
 0x7ee   :  { %3034 = vtanh.f32 %v2926_v24 }
 0x7ef   :  { %3036 = vtanh.f32 %v2276_v63 }
 0x7f6   :  { %v3031_v43 = vpop.eup %3030 }
 0x7f7   :  { %v2280_v30 = vmul.f32 0.5, %v3031_v43  ;;  %v3033_v34 = vpop.eup %3032 }
 0x7f8   :  { %v2281_v37 = vmul.f32 0.5, %v3033_v34  ;;  %v3035_v2 = vpop.eup %3034 }
 0x7f9   :  { %v2283_v53 = vadd.f32 0.5, %v2280_v30  ;;  %v3037_v49 = vpop.eup %3036 }
 0x7fa   :  { %v2284_v6 = vadd.f32 0.5, %v2281_v37  ;;  %v2282_v55 = vmul.f32 0.5, %v3037_v49 }
 0x7fb   :  { %v2288_v39 = vmul.f32 %v3035_v2, %v2283_v53 }
 0x7fc   :  { %v2287_v42 = vmul.f32 %v2284_v6, %v2050_v17  ;;  %v2285_v61 = vadd.f32 0.5, %v2282_v55 }
 0x7fe   :  { %v2289_v38 = vadd.f32 %v2288_v39, %v2287_v42 }
 0x800   :  { %3038 = vtanh.f32 %v2289_v38  ;;  %2299 = vst [vmem:[%s4272_s8] sm:$0xff] %v2289_v38 }
 0x80a   :  { %v3039_v57 = vpop.eup %3038 }
 0x80b   :  { %v2291_v5 = vmul.f32 %v3039_v57, %v2285_v61 }
 0x80d   :  { %2318 = vst [vmem:[%s4271_s6 + $0x38] sm:$0xff] %v2291_v5  ;;  %2297 = vst [vmem:[%s4273_s7] sm:$0xff] %v2291_v5 }

// kernel: _lambda_.3
= control target key start
LH: loop header
LB: loop body
LE: loop exit
PB: predicated region body
PF: predicated region fallthrough
CT: control target
= control target key end

     0   :  { %14 = vsyncpa [#allocation6], 0  ;;  %s3727_s0 = inlined_call_operand.vmem [shape: f32[8,128], index: 0, kind: input, shape index: {}]   ;;  %s3728_s1 = inlined_call_operand.vmem [shape: f32[8,128], index: 1, kind: input, shape index: {}]   ;;  %s3729_s2 = inlined_call_operand.vmem [shape: f32[8,8,128], index: 2, kind: input, shape index: {}]   ;;  %s3730_s3 = inlined_call_operand.hbm [shape: f32[128,512], index: 3, kind: input, shape index: {}]   ;;  %s3731_s4 = inlined_call_operand.hbm [shape: f32[128,512], index: 4, kind: input, shape index: {}]   ;;  %s3732_s5 = inlined_call_operand.vmem [shape: f32[1,512], index: 5, kind: input, shape index: {}]   ;;  %s3733_s6 = inlined_call_operand.vmem [shape: f32[8,8,128], index: 6, kind: output, shape index: {0}]   ;;  %s3734_s7 = inlined_call_operand.vmem [shape: f32[8,128], index: 7, kind: output, shape index: {1}]   ;;  %s3735_s8 = inlined_call_operand.vmem [shape: f32[8,128], index: 8, kind: output, shape index: {2}]  }
   0x1   :  { %15 = vsyncpa [#allocation8], 0  ;;  %s3122_s27 = smov [#allocation5]   ;;  %s3074_s9 = scalar_lea.hbm %s3730_s3, 8192 }
   0x2   :  { %s27_s28 = sshll.u32 %s3122_s27, 4  ;;  %p3075_p0 = scmp.ne.s32.totalorder %s3730_s3, %s3074_s9  ;;  %s28_s28 = int_to_ptr.vmem [resolvable:$true] %s27_s28 }
   0x3   :  { %p3078_p1 = scmp.lt.u32.totalorder %s3074_s9, %s3730_s3 }
   0x5   :  { %p3080_p2 = pnand %p3078_p1, %p3075_p0 }
   0x7   :  { %3083 = shalt.err (!%p3080_p2)
}
   0x8   :  { %s3084_s14 = scalar_lea.vmem %s28_s28, 8192  ;;  %p3089_p4 = scmp.lt.s32.totalorder %s28_s28, %s28_s28 }
   0x9   :  { %p3085_p3 = scmp.ne.s32.totalorder %s28_s28, %s3084_s14  ;;  %p3090_p5 = scmp.lt.s32.totalorder %s3084_s14, %s3084_s14 }
   0xb   :  { %p3091_p6 = por %p3090_p5, %p3089_p4 }
   0xd   :  { %p3092_p7 = pnand %p3091_p6, %p3085_p3 }
   0xf   :  { %3095 = shalt.err (!%p3092_p7)
}
  0x10   :  { %s3123_s15 = smov 512   ;;  %s3124_s16 = smov 32  }
  0x11   :  { %33 = dma.hbm_to_vmem [thread:$0]  %s3730_s3, 8192, %s28_s28, [#allocation6], %s3123_s15, %s3123_s15, %s3124_s16  }
  0x12   :  { %s3125_s19 = smov [#allocation7]   ;;  %s3096_s23 = scalar_lea.hbm %s3731_s4, 8192 }
  0x13   :  { %s39_s20 = sshll.u32 %s3125_s19, 4  ;;  %p3097_p8 = scmp.ne.s32.totalorder %s3731_s4, %s3096_s23  ;;  %s40_s20 = int_to_ptr.vmem [resolvable:$true] %s39_s20 }
  0x14   :  { %p3100_p9 = scmp.lt.u32.totalorder %s3096_s23, %s3731_s4 }
  0x16   :  { %p3102_p10 = pnand %p3100_p9, %p3097_p8 }
  0x18   :  { %3105 = shalt.err (!%p3102_p10)
}
  0x19   :  { %s3106_s29 = scalar_lea.vmem %s40_s20, 8192  ;;  %p3111_p12 = scmp.lt.s32.totalorder %s40_s20, %s40_s20 }
  0x1a   :  { %p3107_p11 = scmp.ne.s32.totalorder %s40_s20, %s3106_s29  ;;  %p3112_p13 = scmp.lt.s32.totalorder %s3106_s29, %s3106_s29 }
  0x1c   :  { %p3113_p0 = por %p3112_p13, %p3111_p12 }
  0x1e   :  { %p3114_p1 = pnand %p3113_p0, %p3107_p11 }
  0x20   :  { %3117 = shalt.err (!%p3114_p1)
}
  0x21   :  { %45 = dma.hbm_to_vmem [thread:$0]  %s3731_s4, 8192, %s40_s20, [#allocation8], %s3123_s15, %s3123_s15, %s3124_s16  }
  0x22   :  { %3118 = dma.done.wait [#allocation6], 8192  }
  0x23   :  { %3119 = vsyncadd [#allocation6], 4294959104 }
  0x24   :  { %3120 = dma.done.wait [#allocation8], 8192  }
  0x25   :  { %3121 = vsyncadd [#allocation8], 4294959104  ;;  %v3126_v0 = vmov 0.0   ;;  %v71_v1 = vld [vmem:[#allocation5 + $0x8] sm:$0xff]  ;;  %v73_v3 = vld [vmem:[#allocation5 + $0x18] sm:$0xff] }
  0x26   :  { %220 = vmatprep.mubr.f32.mxu0 %v3126_v0  ;;  %333 = vmatprep.mubr.f32.mxu1 %v3126_v0  ;;  %v75_v2 = vld [vmem:[#allocation5 + $0x28] sm:$0xff]  ;;  %v77_v5 = vld [vmem:[#allocation5 + $0x38] sm:$0xff]  ;;  %v70_v6 = vld [vmem:[#allocation5] sm:$0xff] }
  0x27   :  { %v2349_v4 = vpack.c.bf16 %v75_v2, %v71_v1  ;;  %v74_v7 = vld [vmem:[#allocation5 + $0x20] sm:$0xff]  ;;  %v2381_v8 = vpack.c.bf16 %v77_v5, %v73_v3  ;;  %v72_v10 = vld [vmem:[#allocation5 + $0x10] sm:$0xff]  ;;  %v79_v12 = vld [vmem:[#allocation5 + $0x48] sm:$0xff] }
  0x28   :  { %v2351_v9 = vpack.c.bf16 %v74_v7, %v70_v6  ;;  %v76_v11 = vld [vmem:[#allocation5 + $0x30] sm:$0xff]  ;;  %v83_v14 = vld [vmem:[#allocation5 + $0x68] sm:$0xff]  ;;  %v81_v15 = vld [vmem:[#allocation5 + $0x58] sm:$0xff] }
  0x29   :  { %2350 = vmatprep.subr.bf16.mxu0 %v2349_v4  ;;  %v2383_v13 = vpack.c.bf16 %v76_v11, %v72_v10  ;;  %v85_v16 = vld [vmem:[#allocation5 + $0x78] sm:$0xff]  ;;  %2382 = vmatprep.subr.bf16.mxu1 %v2381_v8  ;;  %v2353_v17 = vpack.c.bf16 %v83_v14, %v79_v12  ;;  %v78_v19 = vld [vmem:[#allocation5 + $0x40] sm:$0xff]  ;;  %v80_v21 = vld [vmem:[#allocation5 + $0x50] sm:$0xff] }
  0x2a   :  { %2352 = vmatpush1.bf16.msra.mxu0 %v2351_v9  ;;  %v2385_v18 = vpack.c.bf16 %v85_v16, %v81_v15  ;;  %v82_v20 = vld [vmem:[#allocation5 + $0x60] sm:$0xff]  ;;  %v84_v23 = vld [vmem:[#allocation5 + $0x70] sm:$0xff]  ;;  %v87_v24 = vld [vmem:[#allocation5 + $0x88] sm:$0xff] }
  0x2b   :  { %2384 = vmatpush1.bf16.msra.mxu1 %v2383_v13  ;;  %v2355_v22 = vpack.c.bf16 %v82_v20, %v78_v19  ;;  %v91_v25 = vld [vmem:[#allocation5 + $0xa8] sm:$0xff]  ;;  %2354 = vmatprep.subr.bf16.mxu0 %v2353_v17  ;;  %v2387_v26 = vpack.c.bf16 %v84_v23, %v80_v21  ;;  %v89_v28 = vld [vmem:[#allocation5 + $0x98] sm:$0xff]  ;;  %v86_v30 = vld [vmem:[#allocation5 + $0x80] sm:$0xff] }
  0x2c   :  { %2386 = vmatprep.subr.bf16.mxu1 %v2385_v18  ;;  %v2357_v27 = vpack.c.bf16 %v91_v25, %v87_v24  ;;  %v93_v29 = vld [vmem:[#allocation5 + $0xb8] sm:$0xff]  ;;  %v90_v32 = vld [vmem:[#allocation5 + $0xa0] sm:$0xff]  ;;  %v88_v33 = vld [vmem:[#allocation5 + $0x90] sm:$0xff] }
  0x2d   :  { %v2389_v31 = vpack.c.bf16 %v93_v29, %v89_v28  ;;  %v92_v34 = vld [vmem:[#allocation5 + $0xb0] sm:$0xff]  ;;  %v2359_v35 = vpack.c.bf16 %v90_v32, %v86_v30  ;;  %v95_v36 = vld [vmem:[#allocation5 + $0xc8] sm:$0xff]  ;;  %v97_v38 = vld [vmem:[#allocation5 + $0xd8] sm:$0xff] }
  0x2e   :  { %2356 = vmatpush1.bf16.msra.mxu0 %v2355_v22  ;;  %v99_v37 = vld [vmem:[#allocation5 + $0xe8] sm:$0xff]  ;;  %v2391_v39 = vpack.c.bf16 %v92_v34, %v88_v33  ;;  %v101_v41 = vld [vmem:[#allocation5 + $0xf8] sm:$0xff]  ;;  %v94_v42 = vld [vmem:[#allocation5 + $0xc0] sm:$0xff] }
  0x2f   :  { %2388 = vmatpush1.bf16.msra.mxu1 %v2387_v26  ;;  %2358 = vmatprep.subr.bf16.mxu0 %v2357_v27  ;;  %v2361_v40 = vpack.c.bf16 %v99_v37, %v95_v36  ;;  %v98_v43 = vld [vmem:[#allocation5 + $0xe0] sm:$0xff]  ;;  %v2393_v44 = vpack.c.bf16 %v101_v41, %v97_v38  ;;  %v96_v45 = vld [vmem:[#allocation5 + $0xd0] sm:$0xff]  ;;  %v103_v47 = vld [vmem:[#allocation5 + $0x108] sm:$0xff] }
  0x30   :  { %2390 = vmatprep.subr.bf16.mxu1 %v2389_v31  ;;  %v100_v46 = vld [vmem:[#allocation5 + $0xf0] sm:$0xff]  ;;  %v107_v48 = vld [vmem:[#allocation5 + $0x128] sm:$0xff]  ;;  %v105_v49 = vld [vmem:[#allocation5 + $0x118] sm:$0xff]  ;;  %v2363_v51 = vpack.c.bf16 %v98_v43, %v94_v42 }
  0x31   :  { %v109_v50 = vld [vmem:[#allocation5 + $0x138] sm:$0xff]  ;;  %v2395_v52 = vpack.c.bf16 %v100_v46, %v96_v45  ;;  %v2365_v53 = vpack.c.bf16 %v107_v48, %v103_v47  ;;  %v102_v54 = vld [vmem:[#allocation5 + $0x100] sm:$0xff]  ;;  %v104_v56 = vld [vmem:[#allocation5 + $0x110] sm:$0xff] }
  0x32   :  { %2360 = vmatpush1.bf16.msra.mxu0 %v2359_v35  ;;  %v106_v55 = vld [vmem:[#allocation5 + $0x120] sm:$0xff]  ;;  %v2397_v57 = vpack.c.bf16 %v109_v50, %v105_v49  ;;  %v108_v58 = vld [vmem:[#allocation5 + $0x130] sm:$0xff]  ;;  %v111_v59 = vld [vmem:[#allocation5 + $0x148] sm:$0xff] }
  0x33   :  { %2392 = vmatpush1.bf16.msra.mxu1 %v2391_v39  ;;  %2362 = vmatprep.subr.bf16.mxu0 %v2361_v40  ;;  %v115_v60 = vld [vmem:[#allocation5 + $0x168] sm:$0xff]  ;;  %v113_v61 = vld [vmem:[#allocation5 + $0x158] sm:$0xff]  ;;  %v2367_v63 = vpack.c.bf16 %v106_v55, %v102_v54  ;;  %v2399_v1 = vpack.c.bf16 %v108_v58, %v104_v56  ;;  %v110_v3 = vld [vmem:[#allocation5 + $0x140] sm:$0xff] }
  0x34   :  { %2394 = vmatprep.subr.bf16.mxu1 %v2393_v44  ;;  %v117_v62 = vld [vmem:[#allocation5 + $0x178] sm:$0xff]  ;;  %v2369_v2 = vpack.c.bf16 %v115_v60, %v111_v59  ;;  %v114_v4 = vld [vmem:[#allocation5 + $0x160] sm:$0xff]  ;;  %v112_v5 = vld [vmem:[#allocation5 + $0x150] sm:$0xff] }
  0x35   :  { %v2401_v6 = vpack.c.bf16 %v117_v62, %v113_v61  ;;  %v116_v7 = vld [vmem:[#allocation5 + $0x170] sm:$0xff]  ;;  %v119_v8 = vld [vmem:[#allocation5 + $0x188] sm:$0xff]  ;;  %v121_v10 = vld [vmem:[#allocation5 + $0x198] sm:$0xff]  ;;  %v2371_v12 = vpack.c.bf16 %v114_v4, %v110_v3 }
  0x36   :  { %2364 = vmatpush1.bf16.msra.mxu0 %v2363_v51  ;;  %v123_v9 = vld [vmem:[#allocation5 + $0x1a8] sm:$0xff]  ;;  %v125_v11 = vld [vmem:[#allocation5 + $0x1b8] sm:$0xff]  ;;  %v2403_v13 = vpack.c.bf16 %v116_v7, %v112_v5  ;;  %v118_v15 = vld [vmem:[#allocation5 + $0x180] sm:$0xff] }
  0x37   :  { %2396 = vmatpush1.bf16.msra.mxu1 %v2395_v52  ;;  %2366 = vmatprep.subr.bf16.mxu0 %v2365_v53  ;;  %v2373_v14 = vpack.c.bf16 %v123_v9, %v119_v8  ;;  %v122_v16 = vld [vmem:[#allocation5 + $0x1a0] sm:$0xff]  ;;  %v120_v17 = vld [vmem:[#allocation5 + $0x190] sm:$0xff]  ;;  %v2405_v18 = vpack.c.bf16 %v125_v11, %v121_v10  ;;  %v127_v20 = vld [vmem:[#allocation5 + $0x1c8] sm:$0xff] }
  0x38   :  { %2398 = vmatprep.subr.bf16.mxu1 %v2397_v57  ;;  %v124_v19 = vld [vmem:[#allocation5 + $0x1b0] sm:$0xff]  ;;  %v131_v21 = vld [vmem:[#allocation5 + $0x1e8] sm:$0xff]  ;;  %v129_v22 = vld [vmem:[#allocation5 + $0x1d8] sm:$0xff]  ;;  %v2375_v24 = vpack.c.bf16 %v122_v16, %v118_v15 }
  0x39   :  { %v133_v23 = vld [vmem:[#allocation5 + $0x1f8] sm:$0xff]  ;;  %v2407_v25 = vpack.c.bf16 %v124_v19, %v120_v17  ;;  %v2377_v26 = vpack.c.bf16 %v131_v21, %v127_v20  ;;  %v126_v27 = vld [vmem:[#allocation5 + $0x1c0] sm:$0xff]  ;;  %v128_v29 = vld [vmem:[#allocation5 + $0x1d0] sm:$0xff] }
  0x3a   :  { %2368 = vmatpush1.bf16.msra.mxu0 %v2367_v63  ;;  %v130_v28 = vld [vmem:[#allocation5 + $0x1e0] sm:$0xff]  ;;  %v2409_v30 = vpack.c.bf16 %v133_v23, %v129_v22  ;;  %v132_v31 = vld [vmem:[#allocation5 + $0x1f0] sm:$0xff]  ;;  %v421_v32 = vld [vmem:[#allocation7 + $0x8] sm:$0xff] }
  0x3b   :  { %2400 = vmatpush1.bf16.msra.mxu1 %v2399_v1  ;;  %2370 = vmatprep.subr.bf16.mxu0 %v2369_v2  ;;  %v425_v33 = vld [vmem:[#allocation7 + $0x28] sm:$0xff]  ;;  %v423_v34 = vld [vmem:[#allocation7 + $0x18] sm:$0xff]  ;;  %v2379_v36 = vpack.c.bf16 %v130_v28, %v126_v27  ;;  %v2411_v37 = vpack.c.bf16 %v132_v31, %v128_v29  ;;  %v420_v39 = vld [vmem:[#allocation7] sm:$0xff] }
  0x3c   :  { %2402 = vmatprep.subr.bf16.mxu1 %v2401_v6  ;;  %v427_v35 = vld [vmem:[#allocation7 + $0x38] sm:$0xff]  ;;  %v3198_v38 = vpack.c.bf16 %v425_v33, %v421_v32  ;;  %v424_v40 = vld [vmem:[#allocation7 + $0x20] sm:$0xff]  ;;  %v422_v42 = vld [vmem:[#allocation7 + $0x10] sm:$0xff] }
  0x3d   :  { %v3200_v41 = vpack.c.bf16 %v427_v35, %v423_v34  ;;  %v426_v43 = vld [vmem:[#allocation7 + $0x30] sm:$0xff]  ;;  %v429_v44 = vld [vmem:[#allocation7 + $0x48] sm:$0xff]  ;;  %v62_v46 = vld [vmem:[%s3729_s2] sm:$0xff]  ;;  %v3205_v47 = vpack.c.bf16 %v424_v40, %v420_v39 }
  0x3e   :  { %2372 = vmatpush1.bf16.msra.mxu0 %v2371_v12  ;;  %v433_v45 = vld [vmem:[#allocation7 + $0x68] sm:$0xff]  ;;  %v431_v48 = vld [vmem:[#allocation7 + $0x58] sm:$0xff]  ;;  %v3208_v50 = vpack.c.bf16 %v426_v43, %v422_v42  ;;  %v428_v51 = vld [vmem:[#allocation7 + $0x40] sm:$0xff] }
  0x3f   :  { %2404 = vmatpush1.bf16.msra.mxu1 %v2403_v13  ;;  %2374 = vmatprep.subr.bf16.mxu0 %v2373_v14  ;;  %v435_v49 = vld [vmem:[#allocation7 + $0x78] sm:$0xff]  ;;  %v432_v52 = vld [vmem:[#allocation7 + $0x60] sm:$0xff]  ;;  %v3211_v53 = vpack.c.bf16 %v433_v45, %v429_v44  ;;  %v430_v54 = vld [vmem:[#allocation7 + $0x50] sm:$0xff] }
  0x40   :  { %2406 = vmatprep.subr.bf16.mxu1 %v2405_v18  ;;  %v434_v55 = vld [vmem:[#allocation7 + $0x70] sm:$0xff]  ;;  %v3213_v56 = vpack.c.bf16 %v435_v49, %v431_v48  ;;  %v437_v57 = vld [vmem:[#allocation7 + $0x88] sm:$0xff]  ;;  %v3219_v60 = vpack.c.bf16 %v432_v52, %v428_v51  ;;  %v439_v61 = vld [vmem:[#allocation7 + $0x98] sm:$0xff] }
  0x41   :  { %v441_v58 = vld [vmem:[#allocation7 + $0xa8] sm:$0xff]  ;;  %v443_v62 = vld [vmem:[#allocation7 + $0xb8] sm:$0xff]  ;;  %v3223_v63 = vpack.c.bf16 %v434_v55, %v430_v54  ;;  %v436_v1 = vld [vmem:[#allocation7 + $0x80] sm:$0xff] }
  0x42   :  { %2376 = vmatpush1.bf16.msra.mxu0 %v2375_v24  ;;  %v63_v59 = vld [vmem:[%s3729_s2 + $0x8] sm:$0xff]  ;;  %v440_v2 = vld [vmem:[#allocation7 + $0xa0] sm:$0xff]  ;;  %v3227_v3 = vpack.c.bf16 %v441_v58, %v437_v57  ;;  %v438_v4 = vld [vmem:[#allocation7 + $0x90] sm:$0xff]  ;;  %v3230_v6 = vpack.c.bf16 %v443_v62, %v439_v61 }
  0x43   :  { %2408 = vmatpush1.bf16.msra.mxu1 %v2407_v25  ;;  %2378 = vmatprep.subr.bf16.mxu0 %v2377_v26  ;;  %v442_v5 = vld [vmem:[#allocation7 + $0xb0] sm:$0xff]  ;;  %v445_v7 = vld [vmem:[#allocation7 + $0xc8] sm:$0xff]  ;;  %v3236_v10 = vpack.c.bf16 %v440_v2, %v436_v1  ;;  %v447_v11 = vld [vmem:[#allocation7 + $0xd8] sm:$0xff] }
  0x44   :  { %2410 = vmatprep.subr.bf16.mxu1 %v2409_v30  ;;  %v449_v8 = vld [vmem:[#allocation7 + $0xe8] sm:$0xff]  ;;  %v64_v9 = vld [vmem:[%s3729_s2 + $0x10] sm:$0xff]  ;;  %v451_v12 = vld [vmem:[#allocation7 + $0xf8] sm:$0xff]  ;;  %v3240_v13 = vpack.c.bf16 %v442_v5, %v438_v4 }
  0x45   :  { %v444_v14 = vld [vmem:[#allocation7 + $0xc0] sm:$0xff]  ;;  %v3244_v16 = vpack.c.bf16 %v449_v8, %v445_v7  ;;  %v446_v17 = vld [vmem:[#allocation7 + $0xd0] sm:$0xff]  ;;  %v3247_v19 = vpack.c.bf16 %v451_v12, %v447_v11  ;;  %v453_v20 = vld [vmem:[#allocation7 + $0x108] sm:$0xff] }
  0x46   :  { %2380 = vmatpush1.bf16.msra.mxu0 %v2379_v36  ;;  %v448_v15 = vld [vmem:[#allocation7 + $0xe0] sm:$0xff]  ;;  %v450_v18 = vld [vmem:[#allocation7 + $0xf0] sm:$0xff]  ;;  %v457_v21 = vld [vmem:[#allocation7 + $0x128] sm:$0xff] }
  0x47   :  { %2412 = vmatpush1.bf16.msra.mxu1 %v2411_v37  ;;  %2414 = vmatprep.subr.bf16.mxu0 %v3198_v38  ;;  %v65_v22 = vld [vmem:[%s3729_s2 + $0x18] sm:$0xff]  ;;  %v3253_v23 = vpack.c.bf16 %v448_v15, %v444_v14  ;;  %v3257_v26 = vpack.c.bf16 %v450_v18, %v446_v17  ;;  %v452_v27 = vld [vmem:[#allocation7 + $0x100] sm:$0xff]  ;;  %v3261_v29 = vpack.c.bf16 %v457_v21, %v453_v20  ;;  %v454_v30 = vld [vmem:[#allocation7 + $0x110] sm:$0xff] }
  0x48   :  { %2446 = vmatprep.subr.bf16.mxu1 %v3200_v41  ;;  %v455_v24 = vld [vmem:[#allocation7 + $0x118] sm:$0xff]  ;;  %v456_v28 = vld [vmem:[#allocation7 + $0x120] sm:$0xff]  ;;  %v458_v31 = vld [vmem:[#allocation7 + $0x130] sm:$0xff] }
  0x49   :  { %221 = vmatmul.mubr.f32.vlgmr.msra.gmra.mrb[0].mxu0 %v62_v46  ;;  %v459_v25 = vld [vmem:[#allocation7 + $0x138] sm:$0xff]  ;;  %v461_v33 = vld [vmem:[#allocation7 + $0x148] sm:$0xff]  ;;  %v66_v35 = vld [vmem:[%s3729_s2 + $0x20] sm:$0xff]  ;;  %v3270_v36 = vpack.c.bf16 %v456_v28, %v452_v27  ;;  %v3274_v40 = vpack.c.bf16 %v458_v31, %v454_v30  ;;  %v136_v30 = vlaneseq }
  0x4a   :  { %334 = vmatmul.mubr.f32.vlgmr.msra.gmra.mrb[0].mxu1 %v62_v46  ;;  %2416 = vmatpush1.bf16.msra.mxu0 %v3205_v47  ;;  %v3264_v32 = vpack.c.bf16 %v459_v25, %v455_v24  ;;  %v465_v34 = vld [vmem:[#allocation7 + $0x168] sm:$0xff]  ;;  %v463_v37 = vld [vmem:[#allocation7 + $0x158] sm:$0xff]  ;;  %v460_v42 = vld [vmem:[#allocation7 + $0x140] sm:$0xff] }
  0x4b   :  { %2448 = vmatpush1.bf16.msra.mxu1 %v3208_v50  ;;  %226 = vmatprep.mubr.f32.mxu0 %v3126_v0  ;;  %v467_v39 = vld [vmem:[#allocation7 + $0x178] sm:$0xff]  ;;  %v464_v43 = vld [vmem:[#allocation7 + $0x160] sm:$0xff]  ;;  %v3278_v44 = vpack.c.bf16 %v465_v34, %v461_v33  ;;  %v462_v45 = vld [vmem:[#allocation7 + $0x150] sm:$0xff]  ;;  %v137_v31 = vshrl.u32 %v136_v30, 7 }
  0x4c   :  { %339 = vmatprep.mubr.f32.mxu1 %v3126_v0  ;;  %2418 = vmatprep.subr.bf16.mxu0 %v3211_v53  ;;  %v466_v46 = vld [vmem:[#allocation7 + $0x170] sm:$0xff]  ;;  %v3281_v48 = vpack.c.bf16 %v467_v39, %v463_v37  ;;  %v469_v49 = vld [vmem:[#allocation7 + $0x188] sm:$0xff]  ;;  %v3287_v54 = vpack.c.bf16 %v464_v43, %v460_v42  ;;  %v471_v55 = vld [vmem:[#allocation7 + $0x198] sm:$0xff] }
  0x4d   :  { %227 = vmatmul.mubr.f32.gmra.mrb[2].mxu0 %v63_v59  ;;  %2450 = vmatprep.subr.bf16.mxu1 %v3213_v56  ;;  %v473_v51 = vld [vmem:[#allocation7 + $0x1a8] sm:$0xff]  ;;  %v475_v57 = vld [vmem:[#allocation7 + $0x1b8] sm:$0xff]  ;;  %v3291_v58 = vpack.c.bf16 %v466_v46, %v462_v45  ;;  %v472_v61 = vld [vmem:[#allocation7 + $0x1a0] sm:$0xff]  ;;  %v138_v33 = vsub.s32 0, %v137_v31  ;;  %v150_v39 = vsub.s32 3, %v137_v31 }
  0x4e   :  { %340 = vmatmul.mubr.f32.gmra.mrb[2].mxu1 %v63_v59  ;;  %2420 = vmatpush1.bf16.msra.mxu0 %v3219_v60  ;;  %v67_v52 = vld [vmem:[%s3729_s2 + $0x28] sm:$0xff]  ;;  %v468_v59 = vld [vmem:[#allocation7 + $0x180] sm:$0xff]  ;;  %v3295_v62 = vpack.c.bf16 %v473_v51, %v469_v49  ;;  %v470_v1 = vld [vmem:[#allocation7 + $0x190] sm:$0xff]  ;;  %v3298_v4 = vpack.c.bf16 %v475_v57, %v471_v55 }
  0x4f   :  { %2452 = vmatpush1.bf16.msra.mxu1 %v3223_v63  ;;  %232 = vmatprep.mubr.f32.mxu0 %v3126_v0  ;;  %v474_v2 = vld [vmem:[#allocation7 + $0x1b0] sm:$0xff]  ;;  %v477_v5 = vld [vmem:[#allocation7 + $0x1c8] sm:$0xff]  ;;  %v479_v11 = vld [vmem:[#allocation7 + $0x1d8] sm:$0xff] }
  0x50   :  { %345 = vmatprep.mubr.f32.mxu1 %v3126_v0  ;;  %2422 = vmatprep.subr.bf16.mxu0 %v3227_v3  ;;  %v481_v7 = vld [vmem:[#allocation7 + $0x1e8] sm:$0xff]  ;;  %v68_v8 = vld [vmem:[%s3729_s2 + $0x30] sm:$0xff]  ;;  %v483_v12 = vld [vmem:[#allocation7 + $0x1f8] sm:$0xff]  ;;  %v3308_v14 = vpack.c.bf16 %v474_v2, %v470_v1 }
  0x51   :  { %233 = vmatmul.mubr.f32.gmra.mrb[4].mxu0 %v64_v9  ;;  %2454 = vmatprep.subr.bf16.mxu1 %v3230_v6  ;;  %v476_v15 = vld [vmem:[#allocation7 + $0x1c0] sm:$0xff]  ;;  %v3312_v18 = vpack.c.bf16 %v481_v7, %v477_v5  ;;  %v478_v20 = vld [vmem:[#allocation7 + $0x1d0] sm:$0xff]  ;;  %v69_v24 = vld [vmem:[%s3729_s2 + $0x38] sm:$0xff] }
  0x52   :  { %346 = vmatmul.mubr.f32.gmra.mrb[4].mxu1 %v64_v9  ;;  %2424 = vmatpush1.bf16.msra.mxu0 %v3236_v10  ;;  %v3304_v9 = vpack.c.bf16 %v472_v61, %v468_v59  ;;  %v480_v17 = vld [vmem:[#allocation7 + $0x1e0] sm:$0xff]  ;;  %v482_v21 = vld [vmem:[#allocation7 + $0x1f0] sm:$0xff] }
  0x53   :  { %2456 = vmatpush1.bf16.msra.mxu1 %v3240_v13  ;;  %238 = vmatprep.mubr.f32.mxu0 %v3126_v0  ;;  %v3321_v25 = vpack.c.bf16 %v480_v17, %v476_v15  ;;  %v3325_v27 = vpack.c.bf16 %v482_v21, %v478_v20  ;;  %v58_v28 = vld [vmem:[%s3727_s0] sm:$0xff] }
  0x54   :  { %351 = vmatprep.mubr.f32.mxu1 %v3126_v0  ;;  %2426 = vmatprep.subr.bf16.mxu0 %v3244_v16  ;;  %v134_v34 = vld [vmem:[%s3732_s5] sm:$0xf] }
  0x55   :  { %239 = vmatmul.mubr.f32.gmra.mrb[6].mxu0 %v65_v22  ;;  %2458 = vmatprep.subr.bf16.mxu1 %v3247_v19  ;;  %v3376_v37 = vrot.slane %v134_v34, %v138_v33  ;;  %v3381_v49 = vrot.slane %v134_v34, %v150_v39  ;;  %v60_v17 = vld [vmem:[%s3728_s1] sm:$0xff] }
  0x56   :  { %352 = vmatmul.mubr.f32.gmra.mrb[6].mxu1 %v65_v22  ;;  %2428 = vmatpush1.bf16.msra.mxu0 %v3253_v23  ;;  %v3315_v22 = vpack.c.bf16 %v483_v12, %v479_v11 }
  0x57   :  { %2460 = vmatpush1.bf16.msra.mxu1 %v3257_v26  ;;  %244 = vmatprep.mubr.f32.mxu0 %v3126_v0 }
  0x58   :  { %357 = vmatprep.mubr.f32.mxu1 %v3126_v0  ;;  %2430 = vmatprep.subr.bf16.mxu0 %v3261_v29 }
  0x59   :  { %245 = vmatmul.mubr.f32.gmra.mrb[8].mxu0 %v66_v35  ;;  %2462 = vmatprep.subr.bf16.mxu1 %v3264_v32 }
  0x5a   :  { %358 = vmatmul.mubr.f32.gmra.mrb[8].mxu1 %v66_v35  ;;  %2432 = vmatpush1.bf16.msra.mxu0 %v3270_v36  ;;  %v142_v35 = vsub.s32 1, %v137_v31 }
  0x5b   :  { %2464 = vmatpush1.bf16.msra.mxu1 %v3274_v40  ;;  %250 = vmatprep.mubr.f32.mxu0 %v3126_v0 }
  0x5c   :  { %363 = vmatprep.mubr.f32.mxu1 %v3126_v0  ;;  %2434 = vmatprep.subr.bf16.mxu0 %v3278_v44  ;;  %v3378_v42 = vrot.slane %v134_v34, %v142_v35 }
  0x5d   :  { %251 = vmatmul.mubr.f32.gmra.mrb[10].mxu0 %v67_v52  ;;  %2466 = vmatprep.subr.bf16.mxu1 %v3281_v48 }
  0x5e   :  { %364 = vmatmul.mubr.f32.gmra.mrb[10].mxu1 %v67_v52  ;;  %2436 = vmatpush1.bf16.msra.mxu0 %v3287_v54 }
  0x5f   :  { %2468 = vmatpush1.bf16.msra.mxu1 %v3291_v58  ;;  %256 = vmatprep.mubr.f32.mxu0 %v3126_v0 }
  0x60   :  { %369 = vmatprep.mubr.f32.mxu1 %v3126_v0  ;;  %2438 = vmatprep.subr.bf16.mxu0 %v3295_v62 }
  0x61   :  { %257 = vmatmul.mubr.f32.gmra.mrb[12].mxu0 %v68_v8  ;;  %2470 = vmatprep.subr.bf16.mxu1 %v3298_v4 }
  0x62   :  { %370 = vmatmul.mubr.f32.gmra.mrb[12].mxu1 %v68_v8  ;;  %2440 = vmatpush1.bf16.msra.mxu0 %v3304_v9 }
  0x63   :  { %2472 = vmatpush1.bf16.msra.mxu1 %v3308_v14  ;;  %262 = vmatprep.mubr.f32.mxu0 %v3126_v0 }
  0x64   :  { %375 = vmatprep.mubr.f32.mxu1 %v3126_v0  ;;  %2442 = vmatprep.subr.bf16.mxu0 %v3312_v18 }
  0x65   :  { %263 = vmatmul.mubr.f32.gmra.mrb[14].mxu0 %v69_v24  ;;  %2474 = vmatprep.subr.bf16.mxu1 %v3315_v22 }
  0x66   :  { %376 = vmatmul.mubr.f32.gmra.mrb[14].mxu1 %v69_v24  ;;  %2444 = vmatpush1.bf16.msra.mxu0 %v3321_v25 }
  0x67   :  { %2476 = vmatpush1.bf16.msra.mxu1 %v3325_v27  ;;  %548 = vmatprep.mubr.f32.mxu0 %v3126_v0 }
  0x68   :  { %619 = vmatprep.mubr.f32.mxu1 %v3126_v0  ;;  %2478 = vmatprep.subr.bf16.mxu0 %v3198_v38 }
  0x69   :  { %549 = vmatmul.mubr.f32.vlgmr.msra.gmra.mrb[0].mxu0 %v58_v28  ;;  %2510 = vmatprep.subr.bf16.mxu1 %v3200_v41 }
  0x6a   :  { %620 = vmatmul.mubr.f32.vlgmr.msra.gmra.mrb[0].mxu1 %v58_v28  ;;  %2480 = vmatpush1.bf16.msra.mxu0 %v3205_v47 }
  0x6b   :  { %2512 = vmatpush1.bf16.msra.mxu1 %v3208_v50  ;;  %2482 = vmatprep.subr.bf16.mxu0 %v3211_v53 }
  0x6c   :  { %2514 = vmatprep.subr.bf16.mxu1 %v3213_v56  ;;  %786 = vmatprep.mubr.f32.mxu0 %v3126_v0 }
  0x6d   :  { %857 = vmatprep.mubr.f32.mxu1 %v3126_v0 }
  0x6e   :  { %2484 = vmatpush1.bf16.msra.mxu0 %v3219_v60 }
  0x6f   :  { %2516 = vmatpush1.bf16.msra.mxu1 %v3223_v63  ;;  %2486 = vmatprep.subr.bf16.mxu0 %v3227_v3 }
  0x70   :  { %2518 = vmatprep.subr.bf16.mxu1 %v3230_v6 }
  0x72   :  { %2488 = vmatpush1.bf16.msra.mxu0 %v3236_v10 }
  0x73   :  { %2520 = vmatpush1.bf16.msra.mxu1 %v3240_v13  ;;  %2490 = vmatprep.subr.bf16.mxu0 %v3244_v16 }
  0x74   :  { %2522 = vmatprep.subr.bf16.mxu1 %v3247_v19 }
  0x76   :  { %2492 = vmatpush1.bf16.msra.mxu0 %v3253_v23 }
  0x77   :  { %2524 = vmatpush1.bf16.msra.mxu1 %v3257_v26  ;;  %2494 = vmatprep.subr.bf16.mxu0 %v3261_v29 }
  0x78   :  { %2526 = vmatprep.subr.bf16.mxu1 %v3264_v32 }
  0x7a   :  { %2496 = vmatpush1.bf16.msra.mxu0 %v3270_v36 }
  0x7b   :  { %2528 = vmatpush1.bf16.msra.mxu1 %v3274_v40  ;;  %2498 = vmatprep.subr.bf16.mxu0 %v3278_v44 }
  0x7c   :  { %2530 = vmatprep.subr.bf16.mxu1 %v3281_v48 }
  0x7e   :  { %2500 = vmatpush1.bf16.msra.mxu0 %v3287_v54 }
  0x7f   :  { %2532 = vmatpush1.bf16.msra.mxu1 %v3291_v58  ;;  %2502 = vmatprep.subr.bf16.mxu0 %v3295_v62 }
  0x80   :  { %2534 = vmatprep.subr.bf16.mxu1 %v3298_v4 }
  0x82   :  { %2504 = vmatpush1.bf16.msra.mxu0 %v3304_v9 }
  0x83   :  { %2536 = vmatpush1.bf16.msra.mxu1 %v3308_v14  ;;  %2506 = vmatprep.subr.bf16.mxu0 %v3312_v18 }
  0x84   :  { %2538 = vmatprep.subr.bf16.mxu1 %v3315_v22 }
  0x86   :  { %2508 = vmatpush1.bf16.msra.mxu0 %v3321_v25 }
  0x87   :  { %2540 = vmatpush1.bf16.msra.mxu1 %v3325_v27  ;;  %2542 = vmatprep.subr.bf16.mxu0 %v3198_v38 }
  0x88   :  { %2574 = vmatprep.subr.bf16.mxu1 %v3200_v41  ;;  %v146_v41 = vsub.s32 2, %v137_v31 }
  0x8a   :  { %v3385_v61 = vrot.slane %v134_v34, %v146_v41 }
 0x13c   :  { %v550_v43 = vpop.f32.mrb[0].mxu0 }
 0x13d   :  { %v2925_v45 = vadd.f32 %v550_v43, %v3376_v37  ;;  %v621_v46 = vpop.f32.mrb[0].mxu1  ;;  %v552_v38 = vpop.f32.mrb[1].mxu0 }
 0x13e   :  { %v2926_v51 = vadd.f32 %v552_v38, %v3378_v42  ;;  %v623_v52 = vpop.f32.mrb[1].mxu1  ;;  %v2941_v1 = vadd.f32 %v621_v46, %v3385_v61 }
 0x13f   :  { %v630_v55 = vmul.f32 0.5, %v2925_v45  ;;  %v2942_v59 = vadd.f32 %v623_v52, %v3381_v49 }
 0x140   :  { %v631_v57 = vmul.f32 0.5, %v2926_v51  ;;  %v632_v2 = vmul.f32 0.5, %v2941_v1 }
 0x141   :  { %2994 = vtanh.f32 %v630_v55 }
 0x142   :  { %2996 = vtanh.f32 %v631_v57 }
 0x143   :  { %2998 = vtanh.f32 %v2942_v59 }
 0x144   :  { %3000 = vtanh.f32 %v632_v2 }
 0x14b   :  { %v2995_v5 = vpop.eup %2994 }
 0x14c   :  { %v636_v7 = vmul.f32 0.5, %v2995_v5  ;;  %v2997_v8 = vpop.eup %2996 }
 0x14d   :  { %v637_v12 = vmul.f32 0.5, %v2997_v8  ;;  %v2999_v15 = vpop.eup %2998 }
 0x14e   :  { %v639_v11 = vadd.f32 0.5, %v636_v7  ;;  %v3001_v30 = vpop.eup %3000 }
 0x14f   :  { %v640_v20 = vadd.f32 0.5, %v637_v12  ;;  %v638_v31 = vmul.f32 0.5, %v3001_v30  ;;  %v1141_v12 = vld [vmem:[#allocation7 + $0x28] sm:$0xff] }
 0x150   :  { %v644_v21 = vmul.f32 %v2999_v15, %v639_v11  ;;  %v1137_v11 = vld [vmem:[#allocation7 + $0x8] sm:$0xff]  ;;  %v1139_v15 = vld [vmem:[#allocation7 + $0x18] sm:$0xff] }
 0x151   :  { %v643_v24 = vmul.f32 %v640_v20, %v60_v17  ;;  %v641_v33 = vadd.f32 0.5, %v638_v31  ;;  %v3442_v17 = vpack.c.bf16 %v1141_v12, %v1137_v11  ;;  %v1143_v20 = vld [vmem:[#allocation7 + $0x38] sm:$0xff]  ;;  %v1138_v31 = vld [vmem:[#allocation7 + $0x10] sm:$0xff] }
 0x153   :  { %v3391_v28 = vadd.f32 %v644_v21, %v643_v24  ;;  %v1136_v21 = vld [vmem:[#allocation7] sm:$0xff] }
 0x154   :  { %v1140_v24 = vld [vmem:[#allocation7 + $0x20] sm:$0xff] }
 0x155   :  { %3002 = vtanh.f32 %v3391_v28  ;;  %v3446_v30 = vpack.c.bf16 %v1140_v24, %v1136_v21  ;;  %v1404_v21 = vld [vmem:[#allocation7 + $0xe8] sm:$0xff]  ;;  %v1402_v24 = vld [vmem:[#allocation7 + $0xd8] sm:$0xff] }
 0x15f   :  { %v3003_v34 = vpop.eup %3002 }
 0x160   :  { %v647_v35 = vmul.f32 %v3003_v34, %v641_v33  ;;  %v1142_v33 = vld [vmem:[#allocation7 + $0x30] sm:$0xff] }
 0x161   :  { %v3449_v34 = vpack.c.bf16 %v1142_v33, %v1138_v31  ;;  %v1406_v33 = vld [vmem:[#allocation7 + $0xf8] sm:$0xff] }
 0x162   :  { %650 = vst [vmem:[%s3733_s6] sm:$0xff] %v647_v35  ;;  %787 = vmatmul.mubr.f32.vlgmr.msra.gmra.mrb[2].mxu0 %v647_v35  ;;  %858 = vmatmul.mubr.f32.vlgmr.msra.gmra.mrb[2].mxu1 %v647_v35  ;;  %v1145_v35 = vld [vmem:[#allocation7 + $0x48] sm:$0xff] }
 0x163   :  { %2544 = vmatpush1.bf16.msra.mxu0 %v3205_v47  ;;  %2576 = vmatpush1.bf16.msra.mxu1 %v3208_v50 }
 0x164   :  { %2546 = vmatprep.subr.bf16.mxu0 %v3211_v53  ;;  %2578 = vmatprep.subr.bf16.mxu1 %v3213_v56 }
 0x165   :  { %1025 = vmatprep.mubr.f32.mxu0 %v3126_v0  ;;  %1096 = vmatprep.mubr.f32.mxu1 %v3126_v0 }
 0x167   :  { %2548 = vmatpush1.bf16.msra.mxu0 %v3219_v60  ;;  %2580 = vmatpush1.bf16.msra.mxu1 %v3223_v63 }
 0x168   :  { %2550 = vmatprep.subr.bf16.mxu0 %v3227_v3  ;;  %2582 = vmatprep.subr.bf16.mxu1 %v3230_v6 }
 0x16b   :  { %2552 = vmatpush1.bf16.msra.mxu0 %v3236_v10  ;;  %2584 = vmatpush1.bf16.msra.mxu1 %v3240_v13 }
 0x16c   :  { %2554 = vmatprep.subr.bf16.mxu0 %v3244_v16  ;;  %2586 = vmatprep.subr.bf16.mxu1 %v3247_v19 }
 0x16f   :  { %2556 = vmatpush1.bf16.msra.mxu0 %v3253_v23  ;;  %2588 = vmatpush1.bf16.msra.mxu1 %v3257_v26 }
 0x170   :  { %2558 = vmatprep.subr.bf16.mxu0 %v3261_v29  ;;  %2590 = vmatprep.subr.bf16.mxu1 %v3264_v32 }
 0x173   :  { %2560 = vmatpush1.bf16.msra.mxu0 %v3270_v36  ;;  %2592 = vmatpush1.bf16.msra.mxu1 %v3274_v40 }
 0x174   :  { %2562 = vmatprep.subr.bf16.mxu0 %v3278_v44  ;;  %2594 = vmatprep.subr.bf16.mxu1 %v3281_v48 }
 0x177   :  { %2564 = vmatpush1.bf16.msra.mxu0 %v3287_v54  ;;  %2596 = vmatpush1.bf16.msra.mxu1 %v3291_v58 }
 0x178   :  { %2566 = vmatprep.subr.bf16.mxu0 %v3295_v62  ;;  %2598 = vmatprep.subr.bf16.mxu1 %v3298_v4 }
 0x17b   :  { %2568 = vmatpush1.bf16.msra.mxu0 %v3304_v9  ;;  %2600 = vmatpush1.bf16.msra.mxu1 %v3308_v14 }
 0x17c   :  { %2570 = vmatprep.subr.bf16.mxu0 %v3312_v18  ;;  %2602 = vmatprep.subr.bf16.mxu1 %v3315_v22 }
 0x17f   :  { %2572 = vmatpush1.bf16.msra.mxu0 %v3321_v25  ;;  %2604 = vmatpush1.bf16.msra.mxu1 %v3325_v27 }
 0x180   :  { %2606 = vmatprep.subr.bf16.mxu0 %v3442_v17 }
 0x235   :  { %v788_v47 = vpop.f32.mrb[2].mxu0  ;;  %v859_v50 = vpop.f32.mrb[2].mxu1 }
 0x236   :  { %v2927_v53 = vadd.f32 %v788_v47, %v3376_v37  ;;  %v790_v56 = vpop.f32.mrb[3].mxu0  ;;  %v861_v60 = vpop.f32.mrb[3].mxu1  ;;  %v2943_v13 = vadd.f32 %v859_v50, %v3385_v61  ;;  %v1149_v47 = vld [vmem:[#allocation7 + $0x68] sm:$0xff]  ;;  %v1147_v50 = vld [vmem:[#allocation7 + $0x58] sm:$0xff] }
 0x237   :  { %v2928_v63 = vadd.f32 %v790_v56, %v3378_v42  ;;  %v2944_v10 = vadd.f32 %v861_v60, %v3381_v49  ;;  %v1151_v56 = vld [vmem:[#allocation7 + $0x78] sm:$0xff]  ;;  %v1144_v60 = vld [vmem:[#allocation7 + $0x40] sm:$0xff] }
 0x238   :  { %v868_v3 = vmul.f32 0.5, %v2927_v53  ;;  %v870_v39 = vmul.f32 0.5, %v2943_v13  ;;  %v3454_v53 = vpack.c.bf16 %v1149_v47, %v1145_v35  ;;  %v1150_v13 = vld [vmem:[#allocation7 + $0x70] sm:$0xff]  ;;  %v1399_v35 = vld [vmem:[#allocation7 + $0xc0] sm:$0xff] }
 0x239   :  { %v869_v6 = vmul.f32 0.5, %v2928_v63  ;;  %v1148_v63 = vld [vmem:[#allocation7 + $0x60] sm:$0xff] }
 0x23a   :  { %3004 = vtanh.f32 %v868_v3  ;;  %v3456_v3 = vpack.c.bf16 %v1151_v56, %v1147_v50  ;;  %v1403_v47 = vld [vmem:[#allocation7 + $0xe0] sm:$0xff]  ;;  %v3525_v50 = vpack.c.bf16 %v1406_v33, %v1402_v24  ;;  %v1436_v24 = vld [vmem:[#allocation7 + $0x1e8] sm:$0xff] }
 0x23b   :  { %3006 = vtanh.f32 %v869_v6  ;;  %v3458_v6 = vpack.c.bf16 %v1148_v63, %v1144_v60  ;;  %v3527_v56 = vpack.c.bf16 %v1403_v47, %v1399_v35  ;;  %v1401_v60 = vld [vmem:[#allocation7 + $0xd0] sm:$0xff]  ;;  %v1434_v47 = vld [vmem:[#allocation7 + $0x1d8] sm:$0xff] }
 0x23c   :  { %3008 = vtanh.f32 %v2944_v10  ;;  %v1146_v10 = vld [vmem:[#allocation7 + $0x50] sm:$0xff] }
 0x23d   :  { %3010 = vtanh.f32 %v870_v39  ;;  %v3461_v39 = vpack.c.bf16 %v1150_v13, %v1146_v10  ;;  %v1405_v63 = vld [vmem:[#allocation7 + $0xf0] sm:$0xff]  ;;  %v1408_v13 = vld [vmem:[#allocation7 + $0x108] sm:$0xff] }
 0x23e   :  { %v3530_v10 = vpack.c.bf16 %v1405_v63, %v1401_v60  ;;  %v1438_v60 = vld [vmem:[#allocation7 + $0x1f8] sm:$0xff]  ;;  %v1431_v63 = vld [vmem:[#allocation7 + $0x1c0] sm:$0xff] }
 0x244   :  { %v3005_v43 = vpop.eup %3004 }
 0x245   :  { %v874_v45 = vmul.f32 0.5, %v3005_v43  ;;  %v3007_v46 = vpop.eup %3006  ;;  %v1153_v43 = vld [vmem:[#allocation7 + $0x88] sm:$0xff] }
 0x246   :  { %v875_v41 = vmul.f32 0.5, %v3007_v46  ;;  %v3009_v51 = vpop.eup %3008  ;;  %v1155_v46 = vld [vmem:[#allocation7 + $0x98] sm:$0xff] }
 0x247   :  { %v877_v38 = vadd.f32 0.5, %v874_v45  ;;  %v3011_v1 = vpop.eup %3010  ;;  %v1157_v45 = vld [vmem:[#allocation7 + $0xa8] sm:$0xff] }
 0x248   :  { %v878_v52 = vadd.f32 0.5, %v875_v41  ;;  %v876_v2 = vmul.f32 0.5, %v3011_v1  ;;  %v1159_v41 = vld [vmem:[#allocation7 + $0xb8] sm:$0xff]  ;;  %v1154_v1 = vld [vmem:[#allocation7 + $0x90] sm:$0xff] }
 0x249   :  { %v882_v55 = vmul.f32 %v3009_v51, %v877_v38  ;;  %v3466_v38 = vpack.c.bf16 %v1157_v45, %v1153_v43  ;;  %v1152_v51 = vld [vmem:[#allocation7 + $0x80] sm:$0xff]  ;;  %v1412_v43 = vld [vmem:[#allocation7 + $0x128] sm:$0xff]  ;;  %v1410_v45 = vld [vmem:[#allocation7 + $0x118] sm:$0xff] }
 0x24a   :  { %v881_v57 = vmul.f32 %v878_v52, %v3391_v28  ;;  %v879_v5 = vadd.f32 0.5, %v876_v2  ;;  %v3444_v28 = vpack.c.bf16 %v1143_v20, %v1139_v15  ;;  %v1156_v52 = vld [vmem:[#allocation7 + $0xa0] sm:$0xff]  ;;  %v1158_v2 = vld [vmem:[#allocation7 + $0xb0] sm:$0xff] }
 0x24c   :  { %v3434_v59 = vadd.f32 %v882_v55, %v881_v57  ;;  %2638 = vmatprep.subr.bf16.mxu1 %v3444_v28  ;;  %v3468_v55 = vpack.c.bf16 %v1159_v41, %v1155_v46  ;;  %v3470_v57 = vpack.c.bf16 %v1156_v52, %v1152_v51  ;;  %v3535_v46 = vpack.c.bf16 %v1412_v43, %v1408_v13  ;;  %v1414_v41 = vld [vmem:[#allocation7 + $0x138] sm:$0xff]  ;;  %v1407_v51 = vld [vmem:[#allocation7 + $0x100] sm:$0xff] }
 0x24d   :  { %v1411_v52 = vld [vmem:[#allocation7 + $0x120] sm:$0xff]  ;;  %v3571_v13 = vpack.c.bf16 %v1438_v60, %v1434_v47 }
 0x24e   :  { %3012 = vtanh.f32 %v3434_v59  ;;  %v1435_v43 = vld [vmem:[#allocation7 + $0x1e0] sm:$0xff] }
 0x258   :  { %v3013_v7 = vpop.eup %3012 }
 0x259   :  { %v885_v8 = vmul.f32 %v3013_v7, %v879_v5  ;;  %v3473_v5 = vpack.c.bf16 %v1158_v2, %v1154_v1  ;;  %v3537_v1 = vpack.c.bf16 %v1414_v41, %v1410_v45  ;;  %v3539_v2 = vpack.c.bf16 %v1411_v52, %v1407_v51  ;;  %v1433_v45 = vld [vmem:[#allocation7 + $0x1d0] sm:$0xff] }
 0x25a   :  { %v1437_v41 = vld [vmem:[#allocation7 + $0x1f0] sm:$0xff]  ;;  %v3574_v51 = vpack.c.bf16 %v1435_v43, %v1431_v63 }
 0x25b   :  { %2342 = vst [vmem:[%s3733_s6 + $0x8] sm:$0xff] %v885_v8  ;;  %1026 = vmatmul.mubr.f32.vlgmr.msra.gmra.mrb[4].mxu0 %v885_v8  ;;  %1097 = vmatmul.mubr.f32.vlgmr.msra.gmra.mrb[4].mxu1 %v885_v8  ;;  %v3578_v52 = vpack.c.bf16 %v1437_v41, %v1433_v45 }
 0x25c   :  { %1264 = vmatprep.mubr.f32.mxu0 %v3126_v0  ;;  %1335 = vmatprep.mubr.f32.mxu1 %v3126_v0 }
 0x25d   :  { %2608 = vmatpush1.bf16.msra.mxu0 %v3446_v30  ;;  %2640 = vmatpush1.bf16.msra.mxu1 %v3449_v34 }
 0x25e   :  { %2610 = vmatprep.subr.bf16.mxu0 %v3454_v53  ;;  %2642 = vmatprep.subr.bf16.mxu1 %v3456_v3 }
 0x261   :  { %2612 = vmatpush1.bf16.msra.mxu0 %v3458_v6  ;;  %2644 = vmatpush1.bf16.msra.mxu1 %v3461_v39 }
 0x262   :  { %2614 = vmatprep.subr.bf16.mxu0 %v3466_v38  ;;  %2646 = vmatprep.subr.bf16.mxu1 %v3468_v55 }
 0x265   :  { %2616 = vmatpush1.bf16.msra.mxu0 %v3470_v57  ;;  %2648 = vmatpush1.bf16.msra.mxu1 %v3473_v5 }
 0x266   :  { %2618 = vmatprep.subr.bf16.mxu0 %v3244_v16  ;;  %2650 = vmatprep.subr.bf16.mxu1 %v3247_v19 }
 0x269   :  { %2620 = vmatpush1.bf16.msra.mxu0 %v3253_v23  ;;  %2652 = vmatpush1.bf16.msra.mxu1 %v3257_v26 }
 0x26a   :  { %2622 = vmatprep.subr.bf16.mxu0 %v3261_v29  ;;  %2654 = vmatprep.subr.bf16.mxu1 %v3264_v32 }
 0x26d   :  { %2624 = vmatpush1.bf16.msra.mxu0 %v3270_v36  ;;  %2656 = vmatpush1.bf16.msra.mxu1 %v3274_v40 }
 0x26e   :  { %2626 = vmatprep.subr.bf16.mxu0 %v3278_v44  ;;  %2658 = vmatprep.subr.bf16.mxu1 %v3281_v48 }
 0x271   :  { %2628 = vmatpush1.bf16.msra.mxu0 %v3287_v54  ;;  %2660 = vmatpush1.bf16.msra.mxu1 %v3291_v58 }
 0x272   :  { %2630 = vmatprep.subr.bf16.mxu0 %v3295_v62  ;;  %2662 = vmatprep.subr.bf16.mxu1 %v3298_v4 }
 0x275   :  { %2632 = vmatpush1.bf16.msra.mxu0 %v3304_v9  ;;  %2664 = vmatpush1.bf16.msra.mxu1 %v3308_v14 }
 0x276   :  { %2634 = vmatprep.subr.bf16.mxu0 %v3312_v18  ;;  %2666 = vmatprep.subr.bf16.mxu1 %v3315_v22 }
 0x279   :  { %2636 = vmatpush1.bf16.msra.mxu0 %v3321_v25  ;;  %2668 = vmatpush1.bf16.msra.mxu1 %v3325_v27 }
 0x27a   :  { %2670 = vmatprep.subr.bf16.mxu0 %v3442_v17  ;;  %2702 = vmatprep.subr.bf16.mxu1 %v3444_v28 }
 0x32e   :  { %v1027_v16 = vpop.f32.mrb[4].mxu0  ;;  %v1098_v19 = vpop.f32.mrb[4].mxu1 }
 0x32f   :  { %v2929_v23 = vadd.f32 %v1027_v16, %v3376_v37  ;;  %v1029_v26 = vpop.f32.mrb[5].mxu0  ;;  %v1100_v29 = vpop.f32.mrb[5].mxu1  ;;  %v2945_v48 = vadd.f32 %v1098_v19, %v3385_v61  ;;  %v1409_v16 = vld [vmem:[#allocation7 + $0x110] sm:$0xff] }
 0x330   :  { %v2930_v32 = vadd.f32 %v1029_v26, %v3378_v42  ;;  %v2946_v44 = vadd.f32 %v1100_v29, %v3381_v49  ;;  %v1413_v19 = vld [vmem:[#allocation7 + $0x130] sm:$0xff]  ;;  %v1416_v26 = vld [vmem:[#allocation7 + $0x148] sm:$0xff] }
 0x331   :  { %v1107_v36 = vmul.f32 0.5, %v2929_v23  ;;  %v1109_v54 = vmul.f32 0.5, %v2945_v48  ;;  %v3542_v23 = vpack.c.bf16 %v1413_v19, %v1409_v16  ;;  %v1420_v29 = vld [vmem:[#allocation7 + $0x168] sm:$0xff]  ;;  %v1419_v48 = vld [vmem:[#allocation7 + $0x160] sm:$0xff] }
 0x332   :  { %v1108_v40 = vmul.f32 0.5, %v2930_v32  ;;  %v1418_v32 = vld [vmem:[#allocation7 + $0x158] sm:$0xff] }
 0x333   :  { %3014 = vtanh.f32 %v1107_v36  ;;  %v3547_v36 = vpack.c.bf16 %v1420_v29, %v1416_v26 }
 0x334   :  { %3016 = vtanh.f32 %v1108_v40  ;;  %v1422_v40 = vld [vmem:[#allocation7 + $0x178] sm:$0xff] }
 0x335   :  { %3018 = vtanh.f32 %v2946_v44  ;;  %v1415_v44 = vld [vmem:[#allocation7 + $0x140] sm:$0xff] }
 0x336   :  { %3020 = vtanh.f32 %v1109_v54  ;;  %v3549_v54 = vpack.c.bf16 %v1422_v40, %v1418_v32 }
 0x33d   :  { %v3015_v58 = vpop.eup %3014 }
 0x33e   :  { %v1113_v62 = vmul.f32 0.5, %v3015_v58  ;;  %v3017_v4 = vpop.eup %3016  ;;  %v3551_v58 = vpack.c.bf16 %v1419_v48, %v1415_v44 }
 0x33f   :  { %v1114_v14 = vmul.f32 0.5, %v3017_v4  ;;  %v3019_v18 = vpop.eup %3018  ;;  %v1421_v4 = vld [vmem:[#allocation7 + $0x170] sm:$0xff] }
 0x340   :  { %v1116_v9 = vadd.f32 0.5, %v1113_v62  ;;  %v3021_v8 = vpop.eup %3020  ;;  %v1417_v62 = vld [vmem:[#allocation7 + $0x150] sm:$0xff] }
 0x341   :  { %v1117_v22 = vadd.f32 0.5, %v1114_v14  ;;  %v1115_v11 = vmul.f32 0.5, %v3021_v8  ;;  %v3554_v14 = vpack.c.bf16 %v1421_v4, %v1417_v62 }
 0x342   :  { %v1121_v25 = vmul.f32 %v3019_v18, %v1116_v9  ;;  %v1424_v9 = vld [vmem:[#allocation7 + $0x188] sm:$0xff] }
 0x343   :  { %v1120_v27 = vmul.f32 %v1117_v22, %v3434_v59  ;;  %v1118_v12 = vadd.f32 0.5, %v1115_v11  ;;  %v1400_v59 = vld [vmem:[#allocation7 + $0xc8] sm:$0xff]  ;;  %v1426_v22 = vld [vmem:[#allocation7 + $0x198] sm:$0xff]  ;;  %v1423_v11 = vld [vmem:[#allocation7 + $0x180] sm:$0xff] }
 0x344   :  { %v3523_v31 = vpack.c.bf16 %v1404_v21, %v1400_v59  ;;  %v1428_v18 = vld [vmem:[#allocation7 + $0x1a8] sm:$0xff]  ;;  %v1429_v59 = vld [vmem:[#allocation7 + $0x1b0] sm:$0xff] }
 0x345   :  { %v3505_v7 = vadd.f32 %v1121_v25, %v1120_v27  ;;  %v1430_v25 = vld [vmem:[#allocation7 + $0x1b8] sm:$0xff]  ;;  %v3558_v27 = vpack.c.bf16 %v1428_v18, %v1424_v9  ;;  %v1432_v21 = vld [vmem:[#allocation7 + $0x1c8] sm:$0xff] }
 0x346   :  { %v3560_v8 = vpack.c.bf16 %v1430_v25, %v1426_v22  ;;  %v3569_v35 = vpack.c.bf16 %v1436_v24, %v1432_v21 }
 0x347   :  { %3022 = vtanh.f32 %v3505_v7 }
 0x351   :  { %v3023_v15 = vpop.eup %3022 }
 0x352   :  { %v1124_v20 = vmul.f32 %v3023_v15, %v1118_v12  ;;  %v1427_v12 = vld [vmem:[#allocation7 + $0x1a0] sm:$0xff]  ;;  %v1425_v15 = vld [vmem:[#allocation7 + $0x190] sm:$0xff] }
 0x353   :  { %v3567_v33 = vpack.c.bf16 %v1429_v59, %v1425_v15 }
 0x354   :  { %2343 = vst [vmem:[%s3733_s6 + $0x10] sm:$0xff] %v1124_v20  ;;  %1265 = vmatmul.mubr.f32.vlgmr.msra.gmra.mrb[6].mxu0 %v1124_v20  ;;  %1336 = vmatmul.mubr.f32.vlgmr.msra.gmra.mrb[6].mxu1 %v1124_v20  ;;  %v3563_v20 = vpack.c.bf16 %v1427_v12, %v1423_v11 }
 0x355   :  { %2672 = vmatpush1.bf16.msra.mxu0 %v3446_v30  ;;  %2704 = vmatpush1.bf16.msra.mxu1 %v3449_v34 }
 0x356   :  { %2674 = vmatprep.subr.bf16.mxu0 %v3454_v53  ;;  %2706 = vmatprep.subr.bf16.mxu1 %v3456_v3 }
 0x357   :  { %1503 = vmatprep.mubr.f32.mxu0 %v3126_v0  ;;  %1574 = vmatprep.mubr.f32.mxu1 %v3126_v0 }
 0x359   :  { %2676 = vmatpush1.bf16.msra.mxu0 %v3458_v6  ;;  %2708 = vmatpush1.bf16.msra.mxu1 %v3461_v39 }
 0x35a   :  { %2678 = vmatprep.subr.bf16.mxu0 %v3466_v38  ;;  %2710 = vmatprep.subr.bf16.mxu1 %v3468_v55 }
 0x35d   :  { %2680 = vmatpush1.bf16.msra.mxu0 %v3470_v57  ;;  %2712 = vmatpush1.bf16.msra.mxu1 %v3473_v5 }
 0x35e   :  { %2682 = vmatprep.subr.bf16.mxu0 %v3523_v31  ;;  %2714 = vmatprep.subr.bf16.mxu1 %v3525_v50 }
 0x361   :  { %2684 = vmatpush1.bf16.msra.mxu0 %v3527_v56  ;;  %2716 = vmatpush1.bf16.msra.mxu1 %v3530_v10 }
 0x362   :  { %2686 = vmatprep.subr.bf16.mxu0 %v3535_v46  ;;  %2718 = vmatprep.subr.bf16.mxu1 %v3537_v1 }
 0x365   :  { %2688 = vmatpush1.bf16.msra.mxu0 %v3539_v2  ;;  %2720 = vmatpush1.bf16.msra.mxu1 %v3542_v23 }
 0x366   :  { %2690 = vmatprep.subr.bf16.mxu0 %v3547_v36  ;;  %2722 = vmatprep.subr.bf16.mxu1 %v3549_v54 }
 0x369   :  { %2692 = vmatpush1.bf16.msra.mxu0 %v3551_v58  ;;  %2724 = vmatpush1.bf16.msra.mxu1 %v3554_v14 }
 0x36a   :  { %2694 = vmatprep.subr.bf16.mxu0 %v3558_v27  ;;  %2726 = vmatprep.subr.bf16.mxu1 %v3560_v8 }
 0x36d   :  { %2696 = vmatpush1.bf16.msra.mxu0 %v3563_v20  ;;  %2728 = vmatpush1.bf16.msra.mxu1 %v3567_v33 }
 0x36e   :  { %2698 = vmatprep.subr.bf16.mxu0 %v3569_v35  ;;  %2730 = vmatprep.subr.bf16.mxu1 %v3571_v13 }
 0x371   :  { %2700 = vmatpush1.bf16.msra.mxu0 %v3574_v51  ;;  %2732 = vmatpush1.bf16.msra.mxu1 %v3578_v52 }
 0x372   :  { %2734 = vmatprep.subr.bf16.mxu0 %v3442_v17  ;;  %2766 = vmatprep.subr.bf16.mxu1 %v3444_v28 }
 0x427   :  { %v1266_v16 = vpop.f32.mrb[6].mxu0  ;;  %v1337_v19 = vpop.f32.mrb[6].mxu1 }
 0x428   :  { %v2931_v26 = vadd.f32 %v1266_v16, %v3376_v37  ;;  %v1268_v29 = vpop.f32.mrb[7].mxu0  ;;  %v1339_v32 = vpop.f32.mrb[7].mxu1  ;;  %v2947_v4 = vadd.f32 %v1337_v19, %v3385_v61 }
 0x429   :  { %v2932_v40 = vadd.f32 %v1268_v29, %v3378_v42  ;;  %v2948_v62 = vadd.f32 %v1339_v32, %v3381_v49 }
 0x42a   :  { %v1346_v44 = vmul.f32 0.5, %v2931_v26  ;;  %v1348_v9 = vmul.f32 0.5, %v2947_v4 }
 0x42b   :  { %v1347_v48 = vmul.f32 0.5, %v2932_v40 }
 0x42c   :  { %3024 = vtanh.f32 %v1346_v44 }
 0x42d   :  { %3026 = vtanh.f32 %v1347_v48 }
 0x42e   :  { %3028 = vtanh.f32 %v2948_v62 }
 0x42f   :  { %3030 = vtanh.f32 %v1348_v9 }
 0x436   :  { %v3025_v18 = vpop.eup %3024 }
 0x437   :  { %v1352_v22 = vmul.f32 0.5, %v3025_v18  ;;  %v3027_v25 = vpop.eup %3026 }
 0x438   :  { %v1353_v12 = vmul.f32 0.5, %v3027_v25  ;;  %v3029_v15 = vpop.eup %3028 }
 0x439   :  { %v1355_v11 = vadd.f32 0.5, %v1352_v22  ;;  %v3031_v60 = vpop.eup %3030 }
 0x43a   :  { %v1356_v59 = vadd.f32 0.5, %v1353_v12  ;;  %v1354_v63 = vmul.f32 0.5, %v3031_v60 }
 0x43b   :  { %v1360_v21 = vmul.f32 %v3029_v15, %v1355_v11 }
 0x43c   :  { %v1359_v24 = vmul.f32 %v1356_v59, %v3505_v7  ;;  %v1357_v43 = vadd.f32 0.5, %v1354_v63 }
 0x43e   :  { %v3590_v47 = vadd.f32 %v1360_v21, %v1359_v24 }
 0x440   :  { %3032 = vtanh.f32 %v3590_v47 }
 0x44a   :  { %v3033_v45 = vpop.eup %3032 }
 0x44b   :  { %v1363_v41 = vmul.f32 %v3033_v45, %v1357_v43 }
 0x44d   :  { %2344 = vst [vmem:[%s3733_s6 + $0x18] sm:$0xff] %v1363_v41  ;;  %1504 = vmatmul.mubr.f32.vlgmr.msra.gmra.mrb[8].mxu0 %v1363_v41  ;;  %1575 = vmatmul.mubr.f32.vlgmr.msra.gmra.mrb[8].mxu1 %v1363_v41 }
 0x44e   :  { %2736 = vmatpush1.bf16.msra.mxu0 %v3446_v30  ;;  %2768 = vmatpush1.bf16.msra.mxu1 %v3449_v34 }
 0x44f   :  { %2738 = vmatprep.subr.bf16.mxu0 %v3454_v53  ;;  %2770 = vmatprep.subr.bf16.mxu1 %v3456_v3 }
 0x450   :  { %1742 = vmatprep.mubr.f32.mxu0 %v3126_v0  ;;  %1813 = vmatprep.mubr.f32.mxu1 %v3126_v0 }
 0x452   :  { %2740 = vmatpush1.bf16.msra.mxu0 %v3458_v6  ;;  %2772 = vmatpush1.bf16.msra.mxu1 %v3461_v39 }
 0x453   :  { %2742 = vmatprep.subr.bf16.mxu0 %v3466_v38  ;;  %2774 = vmatprep.subr.bf16.mxu1 %v3468_v55 }
 0x456   :  { %2744 = vmatpush1.bf16.msra.mxu0 %v3470_v57  ;;  %2776 = vmatpush1.bf16.msra.mxu1 %v3473_v5 }
 0x457   :  { %2746 = vmatprep.subr.bf16.mxu0 %v3523_v31  ;;  %2778 = vmatprep.subr.bf16.mxu1 %v3525_v50 }
 0x45a   :  { %2748 = vmatpush1.bf16.msra.mxu0 %v3527_v56  ;;  %2780 = vmatpush1.bf16.msra.mxu1 %v3530_v10 }
 0x45b   :  { %2750 = vmatprep.subr.bf16.mxu0 %v3535_v46  ;;  %2782 = vmatprep.subr.bf16.mxu1 %v3537_v1 }
 0x45e   :  { %2752 = vmatpush1.bf16.msra.mxu0 %v3539_v2  ;;  %2784 = vmatpush1.bf16.msra.mxu1 %v3542_v23 }
 0x45f   :  { %2754 = vmatprep.subr.bf16.mxu0 %v3547_v36  ;;  %2786 = vmatprep.subr.bf16.mxu1 %v3549_v54 }
 0x462   :  { %2756 = vmatpush1.bf16.msra.mxu0 %v3551_v58  ;;  %2788 = vmatpush1.bf16.msra.mxu1 %v3554_v14 }
 0x463   :  { %2758 = vmatprep.subr.bf16.mxu0 %v3558_v27  ;;  %2790 = vmatprep.subr.bf16.mxu1 %v3560_v8 }
 0x466   :  { %2760 = vmatpush1.bf16.msra.mxu0 %v3563_v20  ;;  %2792 = vmatpush1.bf16.msra.mxu1 %v3567_v33 }
 0x467   :  { %2762 = vmatprep.subr.bf16.mxu0 %v3569_v35  ;;  %2794 = vmatprep.subr.bf16.mxu1 %v3571_v13 }
 0x46a   :  { %2764 = vmatpush1.bf16.msra.mxu0 %v3574_v51  ;;  %2796 = vmatpush1.bf16.msra.mxu1 %v3578_v52 }
 0x46b   :  { %2798 = vmatprep.subr.bf16.mxu0 %v3442_v17  ;;  %2830 = vmatprep.subr.bf16.mxu1 %v3444_v28 }
 0x520   :  { %v1505_v7 = vpop.f32.mrb[8].mxu0  ;;  %v1576_v16 = vpop.f32.mrb[8].mxu1 }
 0x521   :  { %v2933_v19 = vadd.f32 %v1505_v7, %v3376_v37  ;;  %v1507_v26 = vpop.f32.mrb[9].mxu0  ;;  %v1578_v29 = vpop.f32.mrb[9].mxu1  ;;  %v2949_v62 = vadd.f32 %v1576_v16, %v3385_v61 }
 0x522   :  { %v2934_v32 = vadd.f32 %v1507_v26, %v3378_v42  ;;  %v2950_v48 = vadd.f32 %v1578_v29, %v3381_v49 }
 0x523   :  { %v1585_v40 = vmul.f32 0.5, %v2933_v19  ;;  %v1587_v17 = vmul.f32 0.5, %v2949_v62 }
 0x524   :  { %v1586_v44 = vmul.f32 0.5, %v2934_v32 }
 0x525   :  { %3034 = vtanh.f32 %v1585_v40 }
 0x526   :  { %3036 = vtanh.f32 %v1586_v44 }
 0x527   :  { %3038 = vtanh.f32 %v2950_v48 }
 0x528   :  { %3040 = vtanh.f32 %v1587_v17 }
 0x52f   :  { %v3035_v4 = vpop.eup %3034 }
 0x530   :  { %v1591_v28 = vmul.f32 0.5, %v3035_v4  ;;  %v3037_v9 = vpop.eup %3036 }
 0x531   :  { %v1592_v22 = vmul.f32 0.5, %v3037_v9  ;;  %v3039_v25 = vpop.eup %3038  ;;  %v2093_v9 = vld [vmem:[#allocation7 + $0x8] sm:$0xff] }
 0x532   :  { %v1594_v18 = vadd.f32 0.5, %v1591_v28  ;;  %v3041_v21 = vpop.eup %3040 }
 0x533   :  { %v1595_v11 = vadd.f32 0.5, %v1592_v22  ;;  %v1593_v24 = vmul.f32 0.5, %v3041_v21  ;;  %v2095_v22 = vld [vmem:[#allocation7 + $0x18] sm:$0xff] }
 0x534   :  { %v1599_v12 = vmul.f32 %v3039_v25, %v1594_v18  ;;  %v2097_v18 = vld [vmem:[#allocation7 + $0x28] sm:$0xff] }
 0x535   :  { %v1598_v15 = vmul.f32 %v1595_v11, %v3590_v47  ;;  %v1596_v60 = vadd.f32 0.5, %v1593_v24  ;;  %v2861_v25 = vpack.c.bf16 %v2097_v18, %v2093_v9  ;;  %v2099_v11 = vld [vmem:[#allocation7 + $0x38] sm:$0xff]  ;;  %v2094_v24 = vld [vmem:[#allocation7 + $0x10] sm:$0xff] }
 0x537   :  { %v3635_v59 = vadd.f32 %v1599_v12, %v1598_v15  ;;  %v2092_v12 = vld [vmem:[#allocation7] sm:$0xff] }
 0x538   :  { %v2096_v15 = vld [vmem:[#allocation7 + $0x20] sm:$0xff] }
 0x539   :  { %3042 = vtanh.f32 %v3635_v59  ;;  %v2863_v21 = vpack.c.bf16 %v2096_v15, %v2092_v12 }
 0x543   :  { %v3043_v63 = vpop.eup %3042 }
 0x544   :  { %v1602_v43 = vmul.f32 %v3043_v63, %v1596_v60  ;;  %v2098_v60 = vld [vmem:[#allocation7 + $0x30] sm:$0xff] }
 0x545   :  { %v2895_v63 = vpack.c.bf16 %v2098_v60, %v2094_v24 }
 0x546   :  { %2345 = vst [vmem:[%s3733_s6 + $0x20] sm:$0xff] %v1602_v43  ;;  %1743 = vmatmul.mubr.f32.vlgmr.msra.gmra.mrb[10].mxu0 %v1602_v43  ;;  %1814 = vmatmul.mubr.f32.vlgmr.msra.gmra.mrb[10].mxu1 %v1602_v43  ;;  %v2101_v43 = vld [vmem:[#allocation7 + $0x48] sm:$0xff] }
 0x547   :  { %2800 = vmatpush1.bf16.msra.mxu0 %v3446_v30  ;;  %2832 = vmatpush1.bf16.msra.mxu1 %v3449_v34 }
 0x548   :  { %2802 = vmatprep.subr.bf16.mxu0 %v3454_v53  ;;  %2834 = vmatprep.subr.bf16.mxu1 %v3456_v3 }
 0x549   :  { %1981 = vmatprep.mubr.f32.mxu0 %v3126_v0  ;;  %2052 = vmatprep.mubr.f32.mxu1 %v3126_v0 }
 0x54b   :  { %2804 = vmatpush1.bf16.msra.mxu0 %v3458_v6  ;;  %2836 = vmatpush1.bf16.msra.mxu1 %v3461_v39 }
 0x54c   :  { %2806 = vmatprep.subr.bf16.mxu0 %v3466_v38  ;;  %2838 = vmatprep.subr.bf16.mxu1 %v3468_v55 }
 0x54f   :  { %2808 = vmatpush1.bf16.msra.mxu0 %v3470_v57  ;;  %2840 = vmatpush1.bf16.msra.mxu1 %v3473_v5 }
 0x550   :  { %2810 = vmatprep.subr.bf16.mxu0 %v3523_v31  ;;  %2842 = vmatprep.subr.bf16.mxu1 %v3525_v50 }
 0x553   :  { %2812 = vmatpush1.bf16.msra.mxu0 %v3527_v56  ;;  %2844 = vmatpush1.bf16.msra.mxu1 %v3530_v10 }
 0x554   :  { %2814 = vmatprep.subr.bf16.mxu0 %v3535_v46  ;;  %2846 = vmatprep.subr.bf16.mxu1 %v3537_v1 }
 0x557   :  { %2816 = vmatpush1.bf16.msra.mxu0 %v3539_v2  ;;  %2848 = vmatpush1.bf16.msra.mxu1 %v3542_v23 }
 0x558   :  { %2818 = vmatprep.subr.bf16.mxu0 %v3547_v36  ;;  %2850 = vmatprep.subr.bf16.mxu1 %v3549_v54 }
 0x55b   :  { %2820 = vmatpush1.bf16.msra.mxu0 %v3551_v58  ;;  %2852 = vmatpush1.bf16.msra.mxu1 %v3554_v14 }
 0x55c   :  { %2822 = vmatprep.subr.bf16.mxu0 %v3558_v27  ;;  %2854 = vmatprep.subr.bf16.mxu1 %v3560_v8 }
 0x55f   :  { %2824 = vmatpush1.bf16.msra.mxu0 %v3563_v20  ;;  %2856 = vmatpush1.bf16.msra.mxu1 %v3567_v33 }
 0x560   :  { %2826 = vmatprep.subr.bf16.mxu0 %v3569_v35  ;;  %2858 = vmatprep.subr.bf16.mxu1 %v3571_v13 }
 0x563   :  { %2828 = vmatpush1.bf16.msra.mxu0 %v3574_v51  ;;  %2860 = vmatpush1.bf16.msra.mxu1 %v3578_v52 }
 0x564   :  { %2862 = vmatprep.subr.bf16.mxu0 %v2861_v25 }
 0x619   :  { %v1744_v30 = vpop.f32.mrb[10].mxu0  ;;  %v1815_v34 = vpop.f32.mrb[10].mxu1 }
 0x61a   :  { %v2935_v53 = vadd.f32 %v1744_v30, %v3376_v37  ;;  %v1746_v3 = vpop.f32.mrb[11].mxu0  ;;  %v1817_v6 = vpop.f32.mrb[11].mxu1  ;;  %v2951_v5 = vadd.f32 %v1815_v34, %v3385_v61  ;;  %v2105_v30 = vld [vmem:[#allocation7 + $0x68] sm:$0xff]  ;;  %v2103_v34 = vld [vmem:[#allocation7 + $0x58] sm:$0xff] }
 0x61b   :  { %v2936_v39 = vadd.f32 %v1746_v3, %v3378_v42  ;;  %v2952_v57 = vadd.f32 %v1817_v6, %v3381_v49  ;;  %v2100_v3 = vld [vmem:[#allocation7 + $0x40] sm:$0xff] }
 0x61c   :  { %v1824_v38 = vmul.f32 0.5, %v2935_v53  ;;  %v1826_v47 = vmul.f32 0.5, %v2951_v5  ;;  %v2107_v53 = vld [vmem:[#allocation7 + $0x78] sm:$0xff]  ;;  %v2104_v6 = vld [vmem:[#allocation7 + $0x60] sm:$0xff] }
 0x61d   :  { %v1825_v55 = vmul.f32 0.5, %v2936_v39  ;;  %v2897_v39 = vpack.c.bf16 %v2107_v53, %v2103_v34 }
 0x61e   :  { %3044 = vtanh.f32 %v1824_v38  ;;  %v2867_v38 = vpack.c.bf16 %v2104_v6, %v2100_v3 }
 0x61f   :  { %3046 = vtanh.f32 %v1825_v55  ;;  %v2102_v55 = vld [vmem:[#allocation7 + $0x50] sm:$0xff] }
 0x620   :  { %3048 = vtanh.f32 %v2952_v57  ;;  %v2106_v57 = vld [vmem:[#allocation7 + $0x70] sm:$0xff] }
 0x621   :  { %3050 = vtanh.f32 %v1826_v47  ;;  %v2899_v5 = vpack.c.bf16 %v2106_v57, %v2102_v55  ;;  %v2109_v47 = vld [vmem:[#allocation7 + $0x88] sm:$0xff] }
 0x628   :  { %v3045_v45 = vpop.eup %3044 }
 0x629   :  { %v1830_v41 = vmul.f32 0.5, %v3045_v45  ;;  %v3047_v7 = vpop.eup %3046  ;;  %v2113_v45 = vld [vmem:[#allocation7 + $0xa8] sm:$0xff] }
 0x62a   :  { %v1831_v19 = vmul.f32 0.5, %v3047_v7  ;;  %v3049_v26 = vpop.eup %3048  ;;  %v2869_v7 = vpack.c.bf16 %v2113_v45, %v2109_v47 }
 0x62b   :  { %v1833_v16 = vadd.f32 0.5, %v1830_v41  ;;  %v3051_v48 = vpop.eup %3050  ;;  %v2111_v41 = vld [vmem:[#allocation7 + $0x98] sm:$0xff] }
 0x62c   :  { %v1834_v29 = vadd.f32 0.5, %v1831_v19  ;;  %v1832_v62 = vmul.f32 0.5, %v3051_v48  ;;  %v2108_v19 = vld [vmem:[#allocation7 + $0x80] sm:$0xff]  ;;  %v2114_v48 = vld [vmem:[#allocation7 + $0xb0] sm:$0xff] }
 0x62d   :  { %v1838_v32 = vmul.f32 %v3049_v26, %v1833_v16  ;;  %v2115_v16 = vld [vmem:[#allocation7 + $0xb8] sm:$0xff]  ;;  %v2112_v26 = vld [vmem:[#allocation7 + $0xa0] sm:$0xff] }
 0x62e   :  { %v1837_v40 = vmul.f32 %v1834_v29, %v3635_v59  ;;  %v1835_v17 = vadd.f32 0.5, %v1832_v62  ;;  %v2893_v59 = vpack.c.bf16 %v2099_v11, %v2095_v22  ;;  %v2901_v29 = vpack.c.bf16 %v2115_v16, %v2111_v41 }
 0x630   :  { %v3678_v44 = vadd.f32 %v1838_v32, %v1837_v40  ;;  %2894 = vmatprep.subr.bf16.mxu1 %v2893_v59  ;;  %v2871_v32 = vpack.c.bf16 %v2112_v26, %v2108_v19  ;;  %v2110_v40 = vld [vmem:[#allocation7 + $0x90] sm:$0xff] }
 0x631   :  { %v2903_v62 = vpack.c.bf16 %v2114_v48, %v2110_v40 }
 0x632   :  { %3052 = vtanh.f32 %v3678_v44 }
 0x63c   :  { %v3053_v4 = vpop.eup %3052 }
 0x63d   :  { %v1841_v28 = vmul.f32 %v3053_v4, %v1835_v17 }
 0x63f   :  { %2346 = vst [vmem:[%s3733_s6 + $0x28] sm:$0xff] %v1841_v28  ;;  %1982 = vmatmul.mubr.f32.vlgmr.msra.gmra.mrb[12].mxu0 %v1841_v28  ;;  %2053 = vmatmul.mubr.f32.vlgmr.msra.gmra.mrb[12].mxu1 %v1841_v28 }
 0x640   :  { %2220 = vmatprep.mubr.f32.mxu0 %v3126_v0  ;;  %2291 = vmatprep.mubr.f32.mxu1 %v3126_v0  ;;  %v2865_v0 = vpack.c.bf16 %v2105_v30, %v2101_v43 }
 0x641   :  { %2864 = vmatpush1.bf16.msra.mxu0 %v2863_v21  ;;  %2896 = vmatpush1.bf16.msra.mxu1 %v2895_v63 }
 0x642   :  { %2866 = vmatprep.subr.bf16.mxu0 %v2865_v0  ;;  %2898 = vmatprep.subr.bf16.mxu1 %v2897_v39 }
 0x645   :  { %2868 = vmatpush1.bf16.msra.mxu0 %v2867_v38  ;;  %2900 = vmatpush1.bf16.msra.mxu1 %v2899_v5 }
 0x646   :  { %2870 = vmatprep.subr.bf16.mxu0 %v2869_v7  ;;  %2902 = vmatprep.subr.bf16.mxu1 %v2901_v29 }
 0x649   :  { %2872 = vmatpush1.bf16.msra.mxu0 %v2871_v32  ;;  %2904 = vmatpush1.bf16.msra.mxu1 %v2903_v62 }
 0x64a   :  { %2874 = vmatprep.subr.bf16.mxu0 %v3523_v31  ;;  %2906 = vmatprep.subr.bf16.mxu1 %v3525_v50 }
 0x64d   :  { %2876 = vmatpush1.bf16.msra.mxu0 %v3527_v56  ;;  %2908 = vmatpush1.bf16.msra.mxu1 %v3530_v10 }
 0x64e   :  { %2878 = vmatprep.subr.bf16.mxu0 %v3535_v46  ;;  %2910 = vmatprep.subr.bf16.mxu1 %v3537_v1 }
 0x651   :  { %2880 = vmatpush1.bf16.msra.mxu0 %v3539_v2  ;;  %2912 = vmatpush1.bf16.msra.mxu1 %v3542_v23 }
 0x652   :  { %2882 = vmatprep.subr.bf16.mxu0 %v3547_v36  ;;  %2914 = vmatprep.subr.bf16.mxu1 %v3549_v54 }
 0x655   :  { %2884 = vmatpush1.bf16.msra.mxu0 %v3551_v58  ;;  %2916 = vmatpush1.bf16.msra.mxu1 %v3554_v14 }
 0x656   :  { %2886 = vmatprep.subr.bf16.mxu0 %v3558_v27  ;;  %2918 = vmatprep.subr.bf16.mxu1 %v3560_v8 }
 0x659   :  { %2888 = vmatpush1.bf16.msra.mxu0 %v3563_v20  ;;  %2920 = vmatpush1.bf16.msra.mxu1 %v3567_v33 }
 0x65a   :  { %2890 = vmatprep.subr.bf16.mxu0 %v3569_v35  ;;  %2922 = vmatprep.subr.bf16.mxu1 %v3571_v13 }
 0x65d   :  { %2892 = vmatpush1.bf16.msra.mxu0 %v3574_v51  ;;  %2924 = vmatpush1.bf16.msra.mxu1 %v3578_v52 }
 0x712   :  { %v1983_v31 = vpop.f32.mrb[12].mxu0  ;;  %v2054_v50 = vpop.f32.mrb[12].mxu1 }
 0x713   :  { %v2937_v56 = vadd.f32 %v1983_v31, %v3376_v37  ;;  %v1985_v10 = vpop.f32.mrb[13].mxu0  ;;  %v2056_v46 = vpop.f32.mrb[13].mxu1  ;;  %v2953_v54 = vadd.f32 %v2054_v50, %v3385_v61 }
 0x714   :  { %v2938_v1 = vadd.f32 %v1985_v10, %v3378_v42  ;;  %v2954_v36 = vadd.f32 %v2056_v46, %v3381_v49 }
 0x715   :  { %v2063_v2 = vmul.f32 0.5, %v2937_v56  ;;  %v2065_v58 = vmul.f32 0.5, %v2953_v54 }
 0x716   :  { %v2064_v23 = vmul.f32 0.5, %v2938_v1 }
 0x717   :  { %3054 = vtanh.f32 %v2063_v2 }
 0x718   :  { %3056 = vtanh.f32 %v2064_v23 }
 0x719   :  { %3058 = vtanh.f32 %v2954_v36 }
 0x71a   :  { %3060 = vtanh.f32 %v2065_v58 }
 0x721   :  { %v3055_v14 = vpop.eup %3054 }
 0x722   :  { %v2069_v27 = vmul.f32 0.5, %v3055_v14  ;;  %v3057_v8 = vpop.eup %3056 }
 0x723   :  { %v2070_v33 = vmul.f32 0.5, %v3057_v8  ;;  %v3059_v35 = vpop.eup %3058 }
 0x724   :  { %v2072_v20 = vadd.f32 0.5, %v2069_v27  ;;  %v3061_v4 = vpop.eup %3060 }
 0x725   :  { %v2073_v13 = vadd.f32 0.5, %v2070_v33  ;;  %v2071_v28 = vmul.f32 0.5, %v3061_v4 }
 0x726   :  { %v2077_v51 = vmul.f32 %v3059_v35, %v2072_v20 }
 0x727   :  { %v2076_v52 = vmul.f32 %v2073_v13, %v3678_v44  ;;  %v2074_v9 = vadd.f32 0.5, %v2071_v28 }
 0x729   :  { %v2078_v17 = vadd.f32 %v2077_v51, %v2076_v52 }
 0x72b   :  { %3062 = vtanh.f32 %v2078_v17 }
 0x735   :  { %v3063_v18 = vpop.eup %3062 }
 0x736   :  { %v2080_v22 = vmul.f32 %v3063_v18, %v2074_v9 }
 0x738   :  { %2347 = vst [vmem:[%s3733_s6 + $0x30] sm:$0xff] %v2080_v22  ;;  %2221 = vmatmul.mubr.f32.vlgmr.msra.gmra.mrb[14].mxu0 %v2080_v22  ;;  %2292 = vmatmul.mubr.f32.vlgmr.msra.gmra.mrb[14].mxu1 %v2080_v22 }
 0x80b   :  { %v2222_v25 = vpop.f32.mrb[14].mxu0  ;;  %v2293_v11 = vpop.f32.mrb[14].mxu1 }
 0x80c   :  { %v2939_v12 = vadd.f32 %v2222_v25, %v3376_v37  ;;  %v2224_v15 = vpop.f32.mrb[15].mxu0  ;;  %v2295_v59 = vpop.f32.mrb[15].mxu1  ;;  %v2955_v63 = vadd.f32 %v2293_v11, %v3385_v61 }
 0x80d   :  { %v2940_v44 = vadd.f32 %v2224_v15, %v3378_v42  ;;  %v2956_v60 = vadd.f32 %v2295_v59, %v3381_v49 }
 0x80e   :  { %v2302_v21 = vmul.f32 0.5, %v2939_v12  ;;  %v2304_v43 = vmul.f32 0.5, %v2955_v63 }
 0x80f   :  { %v2303_v24 = vmul.f32 0.5, %v2940_v44 }
 0x810   :  { %3064 = vtanh.f32 %v2302_v21 }
 0x811   :  { %3066 = vtanh.f32 %v2303_v24 }
 0x812   :  { %3068 = vtanh.f32 %v2956_v60 }
 0x813   :  { %3070 = vtanh.f32 %v2304_v43 }
 0x81a   :  { %v3065_v30 = vpop.eup %3064 }
 0x81b   :  { %v2308_v34 = vmul.f32 0.5, %v3065_v30  ;;  %v3067_v0 = vpop.eup %3066 }
 0x81c   :  { %v2309_v37 = vmul.f32 0.5, %v3067_v0  ;;  %v3069_v3 = vpop.eup %3068 }
 0x81d   :  { %v2311_v53 = vadd.f32 0.5, %v2308_v34  ;;  %v3071_v49 = vpop.eup %3070 }
 0x81e   :  { %v2312_v6 = vadd.f32 0.5, %v2309_v37  ;;  %v2310_v55 = vmul.f32 0.5, %v3071_v49 }
 0x81f   :  { %v2316_v39 = vmul.f32 %v3069_v3, %v2311_v53 }
 0x820   :  { %v2315_v42 = vmul.f32 %v2312_v6, %v2078_v17  ;;  %v2313_v61 = vadd.f32 0.5, %v2310_v55 }
 0x822   :  { %v2317_v38 = vadd.f32 %v2316_v39, %v2315_v42 }
 0x824   :  { %3072 = vtanh.f32 %v2317_v38  ;;  %2327 = vst [vmem:[%s3735_s8] sm:$0xff] %v2317_v38 }
 0x82e   :  { %v3073_v57 = vpop.eup %3072 }
 0x82f   :  { %v2319_v5 = vmul.f32 %v3073_v57, %v2313_v61 }
 0x831   :  { %2348 = vst [vmem:[%s3733_s6 + $0x38] sm:$0xff] %v2319_v5  ;;  %2325 = vst [vmem:[%s3734_s7] sm:$0xff] %v2319_v5 }
 0x832   :  { %2340 = vsyncpa [#allocation6], 1 }
 0x833   :  { %2341 = vsyncpa [#allocation8], 1 }

</bundles_post_ra>
